<compile_context>
chip_gen: v5e
topology: v5e:2x2
jax: 0.10.0
libtpu: 0.0.40
codegen_flags: <defaults>
</compile_context>

<pallas_src>
import functools
import math

import jax
import jax.numpy as jnp
from jax.experimental import pallas as pl
from jax.experimental.pallas import tpu as pltpu

IMAGENET_NORMALIZATION_VALS = ((0.485, 0.456, 0.406), (0.229, 0.224, 0.225))

# ----------------------------------------------------------------------------
# Small element-wise helpers used inside kernels
# ----------------------------------------------------------------------------

def _layer_norm(x, g, b, eps=1e-6):
    mu = jnp.mean(x, axis=-1, keepdims=True)
    xc = x - mu
    var = jnp.mean(xc * xc, axis=-1, keepdims=True)
    return xc * jax.lax.rsqrt(var + eps) * g + b


def _gelu_tanh(x):
    # TODO(synk): DINO/timm use exact erf-GELU; the tanh approximation is used
    # because erf has no guaranteed Mosaic lowering inside the fused kernel.
    c = 0.7978845608028654  # sqrt(2/pi)
    return 0.5 * x * (1.0 + jnp.tanh(c * (x + 0.044715 * x * x * x)))


def _sum_all(x):
    """Two-stage lane -> sublane sum of a 2-D value, returns a (1, 1) value."""
    return jnp.sum(jnp.sum(x, axis=1, keepdims=True), axis=0, keepdims=True)


# ----------------------------------------------------------------------------
# Fused matmul + bias (patch embedding), bf16 MXU operands, f32 accumulation
# ----------------------------------------------------------------------------

def _mm_bias_kernel(a_ref, b_ref, bias_ref, o_ref):
    o_ref[...] = jnp.dot(a_ref[...], b_ref[...],
                         preferred_element_type=jnp.float32) + bias_ref[...]


def matmul_bias(a, b, bias):
    """(M, K) @ (K, N) + bias, row-tiled; bf16 operands hit native MXU rate."""
    a = a.astype(jnp.bfloat16)
    b = b.astype(jnp.bfloat16)
    M, K = a.shape
    N = b.shape[1]
    bias2 = jnp.reshape(bias, (1, N)).astype(jnp.float32)
    tm = M
    for cand in (1024, 512, 256, 128, 64, 32):
        if M >= cand and M % cand == 0:
            tm = cand
            break
    return pl.pallas_call(
        _mm_bias_kernel,
        grid=(M // tm,),
        in_specs=[pl.BlockSpec((tm, K), lambda i: (i, 0)),
                  pl.BlockSpec((K, N), lambda i: (0, 0)),
                  pl.BlockSpec((1, N), lambda i: (0, 0))],
        out_specs=pl.BlockSpec((tm, N), lambda i: (i, 0)),
        out_shape=jax.ShapeDtypeStruct((M, N), jnp.float32),
        compiler_params=pltpu.CompilerParams(dimension_semantics=("parallel",)),
    )(a, b, bias2)


# ----------------------------------------------------------------------------
# Fused ViT transformer blocks (one pallas_call for all 12 blocks, all images)
# ----------------------------------------------------------------------------

_BLOCK_WEIGHT_NAMES = ('ln1_g', 'ln1_b', 'qkv_w', 'qkv_b', 'proj_w', 'proj_b',
                       'ln2_g', 'ln2_b', 'fc1_w', 'fc1_b', 'fc2_w', 'fc2_b')
_BLOCK_W_BF16 = frozenset(('qkv_w', 'proj_w', 'fc1_w', 'fc2_w'))


def _img_index(g, d):
    return (g, 0, 0)


def _w_index(g, d):
    return (d, 0, 0)


def _vit_blocks_kernel(x0_ref,
                       ln1g_ref, ln1b_ref, qkvw_ref, qkvb_ref,
                       projw_ref, projb_ref, ln2g_ref, ln2b_ref,
                       fc1w_ref, fc1b_ref, fc2w_ref, fc2b_ref,
                       x_ref, keys_ref, attn_sc, *, heads):
    G, T, D = x_ref.shape               # images per group, tokens, embed dim
    dh = D // heads
    scale = float(dh) ** -0.5
    d_idx = pl.program_id(1)
    depth = pl.num_programs(1)

    # The x output block is resident across the depth axis -> use it as the
    # residual-stream accumulator.
    @pl.when(d_idx == 0)
    def _init():
        x_ref[...] = x0_ref[...]

    ln1g, ln1b = ln1g_ref[...], ln1b_ref[...]
    qkvw, qkvb = qkvw_ref[...], qkvb_ref[...]       # qkvw is bf16
    projw, projb = projw_ref[...], projb_ref[...]   # projw is bf16
    ln2g, ln2b = ln2g_ref[...], ln2b_ref[...]
    fc1w, fc1b = fc1w_ref[...], fc1b_ref[...]       # fc1w is bf16
    fc2w, fc2b = fc2w_ref[...], fc2b_ref[...]       # fc2w is bf16

    for i in range(G):                               # G == 1: trivial unroll
        x = x_ref[i]                                 # (T, D) f32
        h = _layer_norm(x, ln1g, ln1b)
        qkv = jnp.dot(h.astype(jnp.bfloat16), qkvw,
                      preferred_element_type=jnp.float32) + qkvb   # (T, 3D) f32

        # Only the layer-11 keys are ever consumed: store them once, on the
        # last depth step (no wasted vst bandwidth on the other 11 blocks).
        @pl.when(d_idx == depth - 1)
        def _store_keys():
            keys_ref[i] = qkv[:, D:2 * D]

        # Multi-head attention. Head outputs are assembled into a (T, D) VMEM
        # scratch slab so the output projection is ONE K=D matmul (full MXU
        # depth) instead of `heads` K=dh matmuls.
        # TODO(synk): at real DINO-S sizes (dh=64) the per-head lane slices are
        # not 128-aligned; a head-major (3, heads, T, dh) qkv layout would
        # avoid the cross-lane shuffles. Irrelevant at this toy D.
        for hh in range(heads):
            q = qkv[:, hh * dh:(hh + 1) * dh]
            k = qkv[:, D + hh * dh:D + (hh + 1) * dh]
            v = qkv[:, 2 * D + hh * dh:2 * D + (hh + 1) * dh]
            s = jax.lax.dot_general(q.astype(jnp.bfloat16), k.astype(jnp.bfloat16),
                                    (((1,), (1,)), ((), ())),
                                    preferred_element_type=jnp.float32) * scale
            s = s - jnp.max(s, axis=-1, keepdims=True)
            pr = jnp.exp(s)
            pr = pr * pl.reciprocal(jnp.sum(pr, axis=-1, keepdims=True),
                                    approx=True)
            o_h = jnp.dot(pr.astype(jnp.bfloat16), v.astype(jnp.bfloat16),
                          preferred_element_type=jnp.float32)      # (T, dh)
            attn_sc[:, hh * dh:(hh + 1) * dh] = o_h

        x = x + jnp.dot(attn_sc[...].astype(jnp.bfloat16), projw,
                        preferred_element_type=jnp.float32) + projb
        h2 = _layer_norm(x, ln2g, ln2b)
        m = jnp.dot(h2.astype(jnp.bfloat16), fc1w,
                    preferred_element_type=jnp.float32) + fc1b
        m = _gelu_tanh(m)
        x = x + jnp.dot(m.astype(jnp.bfloat16), fc2w,
                        preferred_element_type=jnp.float32) + fc2b
        x_ref[i] = x


def vit_blocks(x0, p):
    """Run all transformer blocks in one pallas_call.

    Returns (x_last (N, T, D), keys_layer11 (N, T, D)).
    """
    N, T, D = x0.shape
    depth = p['depth']
    heads = p['heads']
    G = 1                      # one image per group: bounded VMEM, max parallel
    n_groups = N // G

    weights = [p[name].astype(jnp.bfloat16) if name in _BLOCK_W_BF16
               else p[name].astype(jnp.float32)
               for name in _BLOCK_WEIGHT_NAMES]
    w_specs = [pl.BlockSpec((None,) + tuple(p[name].shape[1:]), _w_index)
               for name in _BLOCK_WEIGHT_NAMES]

    # Adaptive scoped-VMEM limit: only raised above the default when the
    # estimated footprint (double-buffered per-block weights + resident
    # activations + intermediates) demands it.  Capped at 64 MiB (v7x).
    w_bytes = sum(math.prod(p[name].shape[1:]) * (2 if name in _BLOCK_W_BF16 else 4)
                  for name in _BLOCK_WEIGHT_NAMES)
    mlp = p['fc1_w'].shape[2]
    act_bytes = 4 * G * T * D * 4                       # x0(2x buffered) + x + keys
    tmp_bytes = G * T * (4 * D + mlp + T) * 4           # qkv, mlp act, scores, scratch
    est = 2 * w_bytes + act_bytes + tmp_bytes
    vmem_limit = None
    if 2 * est > 32 * 1024 * 1024:
        vmem_limit = int(min(64 * 1024 * 1024, 2 * est))

    x_out, keys_out = pl.pallas_call(
        functools.partial(_vit_blocks_kernel, heads=heads),
        grid=(n_groups, depth),
        in_specs=[pl.BlockSpec((G, T, D), _img_index)] + w_specs,
        out_specs=(pl.BlockSpec((G, T, D), _img_index),
                   pl.BlockSpec((G, T, D), _img_index)),
        out_shape=(jax.ShapeDtypeStruct((N, T, D), jnp.float32),
                   jax.ShapeDtypeStruct((N, T, D), jnp.float32)),
        scratch_shapes=[pltpu.VMEM((T, D), jnp.float32)],
        compiler_params=pltpu.CompilerParams(
            dimension_semantics=("parallel", "arbitrary"),
            vmem_limit_bytes=vmem_limit),
    )(x0.astype(jnp.float32), *weights)
    return x_out, keys_out


# ----------------------------------------------------------------------------
# Fused loss reductions (3 pallas_calls total)
# ----------------------------------------------------------------------------

def _vit_feature_losses_kernel(ka_ref, kb_ref, ca_ref, cb_ref,
                               ssim_ref, cls_ref, id_ref):
    i = pl.program_id(0)

    @pl.when(i == 0)
    def _init():
        ssim_ref[...] = jnp.zeros_like(ssim_ref)
        cls_ref[...] = jnp.zeros_like(cls_ref)
        id_ref[...] = jnp.zeros_like(id_ref)

    ka = ka_ref[0]                       # (T, D) keys of input image i
    kb = kb_ref[0]                       # (T, D) keys of output image i

    # identity loss: sum of squared key differences
    dk = ka - kb
    id_ref[...] += _sum_all(dk * dk)

    # cls loss
    dc = ca_ref[0] - cb_ref[0]           # (1, D)
    cls_ref[...] += _sum_all(dc * dc)

    # ssim loss: cosine self-similarity computed in-kernel (never hits HBM);
    # rsqrt on the (T,1)/(1,T) squared norms + broadcast multiplies.
    def cos_self_sim(k):
        gram = jax.lax.dot_general(k, k, (((1,), (1,)), ((), ())),
                                   preferred_element_type=jnp.float32)   # (T, T)
        ksq = k * k
        nsq_col = jnp.sum(ksq, axis=1, keepdims=True)                    # (T, 1)
        ones_row = jnp.ones((1, k.shape[1]), jnp.float32)
        nsq_row = jax.lax.dot_general(ones_row, ksq, (((1,), (1,)), ((), ())),
                                      preferred_element_type=jnp.float32)  # (1, T)
        inv_col = jax.lax.rsqrt(jnp.maximum(nsq_col, 1e-16))
        inv_row = jax.lax.rsqrt(jnp.maximum(nsq_row, 1e-16))
        return gram * inv_col * inv_row

    ds = cos_self_sim(ka) - cos_self_sim(kb)
    ssim_ref[...] += _sum_all(ds * ds)


def vit_feature_losses(keys, cls_tok):
    """keys: (2B, T, D), cls_tok: (2B, D); rows [:B] inputs, rows [B:] outputs.
    Returns (ssim_loss, cls_loss, identity_loss) -- single fused pallas_call,
    tiled over the batch with resident (1,1) accumulators."""
    NN, T, D = keys.shape
    B = NN // 2
    cls3 = cls_tok.reshape(NN, 1, D)
    scalar = jax.ShapeDtypeStruct((1, 1), jnp.float32)
    ssim_s, cls_s, id_s = pl.pallas_call(
        _vit_feature_losses_kernel,
        grid=(B,),
        in_specs=[pl.BlockSpec((1, T, D), lambda i: (i, 0, 0)),
                  pl.BlockSpec((1, T, D), lambda i: (i + B, 0, 0)),
                  pl.BlockSpec((1, 1, D), lambda i: (i, 0, 0)),
                  pl.BlockSpec((1, 1, D), lambda i: (i + B, 0, 0))],
        out_specs=(pl.BlockSpec((1, 1), lambda i: (0, 0)),
                   pl.BlockSpec((1, 1), lambda i: (0, 0)),
                   pl.BlockSpec((1, 1), lambda i: (0, 0))),
        out_shape=(scalar, scalar, scalar),
        compiler_params=pltpu.CompilerParams(dimension_semantics=("arbitrary",)),
    )(keys, keys, cls3, cls3)
    ssim_loss = ssim_s[0, 0] / (B * T * T)
    cls_loss = cls_s[0, 0] / (B * D)
    id_loss = id_s[0, 0] / (B * T * D)
    return ssim_loss, cls_loss, id_loss


def _pixel_losses_kernel(a_ref, b_ref, l1_ref, l2_ref):
    i = pl.program_id(0)

    @pl.when(i == 0)
    def _init():
        l1_ref[...] = jnp.zeros_like(l1_ref)
        l2_ref[...] = jnp.zeros_like(l2_ref)

    d = a_ref[0] - b_ref[0]              # (1, F)
    l1_ref[...] += _sum_all(jnp.abs(d))
    l2_ref[...] += _sum_all(d * d)


def pixel_l1_l2(inputs, outputs):
    """Single pass over the images computes BOTH mean-abs and mean-square."""
    B = inputs.shape[0]
    F = inputs.size // B
    a = inputs.reshape(B, 1, F).astype(jnp.float32)
    b = outputs.reshape(B, 1, F).astype(jnp.float32)
    scalar = jax.ShapeDtypeStruct((1, 1), jnp.float32)
    s1, s2 = pl.pallas_call(
        _pixel_losses_kernel,
        grid=(B,),
        in_specs=[pl.BlockSpec((1, 1, F), lambda i: (i, 0, 0)),
                  pl.BlockSpec((1, 1, F), lambda i: (i, 0, 0))],
        out_specs=(pl.BlockSpec((1, 1), lambda i: (0, 0)),
                   pl.BlockSpec((1, 1), lambda i: (0, 0))),
        out_shape=(scalar, scalar),
        compiler_params=pltpu.CompilerParams(dimension_semantics=("arbitrary",)),
    )(a, b)
    n = inputs.size
    return s1[0, 0] / n, s2[0, 0] / n


def _embedding_losses_kernel(ce_ref, cl_ref, occ_ref, ocl_ref, emb_ref, reg_ref):
    d1 = occ_ref[...] - ce_ref[...]
    d2 = ocl_ref[...] - cl_ref[...]
    emb_ref[...] = _sum_all(d1 * d1) + _sum_all(d2 * d2)
    c = ce_ref[...]
    reg_ref[...] = _sum_all(c * c)


def embedding_losses(content_embedding, class_embedding,
                     out_content_codes, out_class_codes):
    """Returns (dino_embedding_l2, content_reg) from one tiny pallas_call."""
    B, E = content_embedding.shape
    scalar = jax.ShapeDtypeStruct((1, 1), jnp.float32)
    emb_s, reg_s = pl.pallas_call(
        _embedding_losses_kernel,
        out_shape=(scalar, scalar),
    )(content_embedding.astype(jnp.float32), class_embedding.astype(jnp.float32),
      out_content_codes.astype(jnp.float32), out_class_codes.astype(jnp.float32))
    emb_l2 = emb_s[0, 0] / (B * E)           # mse(occ, ce) + mse(ocl, cle)
    content_reg = reg_s[0, 0] / B            # sum(ce**2, dim=1).mean()
    return emb_l2, content_reg


# ----------------------------------------------------------------------------
# ViT parameter init + extractor
# ----------------------------------------------------------------------------

def init_vit_params(key, *, img_size, patch=8, dim=32, depth=12, heads=2, mlp=128):
    # TODO(synk): synthetic weights stand in for the pretrained dino_vits8
    # checkpoint (no file / network access allowed).
    nP = (img_size // patch) ** 2
    T = nP + 1
    std = 0.02
    k = jax.random.split(key, 7)
    p = {
        'patch': patch, 'dim': dim, 'heads': heads, 'depth': depth,
        'patch_w': jax.random.normal(k[0], (3 * patch * patch, dim), jnp.float32) * std,
        'patch_b': jnp.zeros((dim,), jnp.float32),
        'cls_token': jax.random.normal(k[1], (1, dim), jnp.float32) * std,
        'pos_embed': jax.random.normal(k[2], (T, dim), jnp.float32) * std,
        # Per-block weights are stacked along a leading depth axis so the fused
        # block kernel can fetch block d's weights via a depth-indexed BlockSpec.
        'ln1_g': jnp.ones((depth, 1, dim), jnp.float32),
        'ln1_b': jnp.zeros((depth, 1, dim), jnp.float32),
        'qkv_w': jax.random.normal(k[3], (depth, dim, 3 * dim), jnp.float32) * std,
        'qkv_b': jnp.zeros((depth, 1, 3 * dim), jnp.float32),
        'proj_w': jax.random.normal(k[4], (depth, dim, dim), jnp.float32) * std,
        'proj_b': jnp.zeros((depth, 1, dim), jnp.float32),
        'ln2_g': jnp.ones((depth, 1, dim), jnp.float32),
        'ln2_b': jnp.zeros((depth, 1, dim), jnp.float32),
        'fc1_w': jax.random.normal(k[5], (depth, dim, mlp), jnp.float32) * std,
        'fc1_b': jnp.zeros((depth, 1, mlp), jnp.float32),
        'fc2_w': jax.random.normal(k[6], (depth, mlp, dim), jnp.float32) * std,
        'fc2_b': jnp.zeros((depth, 1, dim), jnp.float32),
    }
    return p


class VitExtractor:
    """Batched DINO-style ViT feature extractor backed by the fused Pallas forward."""

    def __init__(self, params):
        self.p = params

    def features(self, images):
        """images: (N, 3, H, W) RAW images (ImageNet normalization is folded
        into the patch-embedding affine).  Runs the ViT ONCE for all N images:
          cls_token (N, D)    last block output, token 0
          keys      (N, T, D) layer-11 attention keys (head-concatenated)
        """
        p = self.p
        N, C, H, W = images.shape
        P, D = p['patch'], p['dim']

        # Fold (x - mean) / std into the linear patch embedding: scale the
        # weight rows per channel by 1/std and shift the bias accordingly.
        mean = jnp.asarray(IMAGENET_NORMALIZATION_VALS[0], jnp.float32)
        inv_std = 1.0 / jnp.asarray(IMAGENET_NORMALIZATION_VALS[1], jnp.float32)
        row_scale = jnp.repeat(inv_std, P * P)            # (3*P*P,)
        row_shift = jnp.repeat(mean * inv_std, P * P)     # (3*P*P,)
        w_fold = p['patch_w'] * row_scale[:, None]
        b_fold = p['patch_b'] - row_shift @ p['patch_w']

        nh, nw = H // P, W // P
        patches = images.astype(jnp.float32).reshape(N, C, nh, P, nw, P)
        patches = patches.transpose(0, 2, 4, 1, 3, 5).reshape(N * nh * nw, C * P * P)
        tok = matmul_bias(patches, w_fold, b_fold).reshape(N, nh * nw, D)
        cls = jnp.broadcast_to(p['cls_token'][None], (N, 1, D))
        x0 = jnp.concatenate([cls, tok], axis=1) + p['pos_embed'][None]

        x_last, keys = vit_blocks(x0, p)
        # TODO(synk): cls token is the last-block output pre final LayerNorm;
        # matches a raw block-output hook in the torch VitExtractor.
        return {'cls_token': x_last[:, 0, :], 'keys': keys}


# ----------------------------------------------------------------------------
# LossG
# ----------------------------------------------------------------------------

class LossG:
    """JAX/Pallas port of losses.LossG.  The whole forward is one jitted program;
    the ssim / cls / identity losses share a single batched ViT forward and one
    fused loss-reduction kernel."""

    def __init__(self, cfg, vit_params):
        self.cfg = cfg
        self.extractor = VitExtractor(vit_params)
        self.lambdas = dict(
            content_embedding_reg=cfg['content_reg_dino'],
            lambda_l1=cfg['lambda_l1'], lambda_l2=cfg['lambda_l2'],
            dino_embedding_l2=cfg['dino_embedding_l2'],
            lambda_cls=cfg['lambda_global_cls'],
            lambda_ssim=cfg['lambda_global_ssim'],
            lambda_identity=cfg['lambda_global_identity'])
        self._forward_jit = jax.jit(self._forward_impl)

    def global_transform(self, imgs):
        # TODO(synk): torchvision Resize(dino_global_patch_size, max_size=480)
        # is an identity at these sizes, and the ImageNet normalization is
        # folded into the patch-embedding weights inside VitExtractor.features.
        return imgs

    def calculate_dino_embedding_l2(self, content_embedding, class_embedding,
                                    out_content_codes, out_class_codes):
        emb_l2, _ = embedding_losses(content_embedding, class_embedding,
                                     out_content_codes, out_class_codes)
        return emb_l2

    def _forward_impl(self, outputs, inputs, content_embedding, class_embedding,
                      out_content_codes, out_class_codes):
        lam = self.lambdas
        losses = {}
        loss_G = 0.0
        B = outputs.shape[0]

        need_vit = (lam['lambda_ssim'] > 0 or lam['lambda_cls'] > 0
                    or lam['lambda_identity'] > 0)
        if need_vit:
            # ONE ViT forward for all 2B images; rows [:B] inputs, [B:] outputs.
            imgs = self.global_transform(jnp.concatenate([inputs, outputs], axis=0))
            feats = self.extractor.features(imgs)
            ssim_l, cls_l, id_l = vit_feature_losses(feats['keys'],
                                                     feats['cls_token'])
            if lam['lambda_ssim'] > 0:       # calculate_global_ssim_loss
                losses['lambda_ssim'] = ssim_l
                loss_G += ssim_l * lam['lambda_ssim']
            if lam['lambda_cls'] > 0:        # calculate_crop_cls_loss
                losses['lambda_cls'] = cls_l
                loss_G += cls_l * lam['lambda_cls']
            if lam['lambda_identity'] > 0:   # calculate_global_id_loss
                losses['lambda_identity'] = id_l
                loss_G += id_l * lam['lambda_identity']

        if lam['lambda_l1'] > 0 or lam['lambda_l2'] > 0:
            l1_l, l2_l = pixel_l1_l2(inputs, outputs)
            if lam['lambda_l1'] > 0:
                losses['lambda_l1'] = l1_l
                loss_G += l1_l * lam['lambda_l1']
            if lam['lambda_l2'] > 0:
                losses['lambda_l2'] = l2_l
                loss_G += l2_l * lam['lambda_l2']

        if lam['content_embedding_reg'] > 0 or lam['dino_embedding_l2'] > 0:
            emb_l2, c_reg = embedding_losses(content_embedding, class_embedding,
                                             out_content_codes, out_class_codes)
            if lam['content_embedding_reg'] > 0:
                loss_G += lam['content_embedding_reg'] * c_reg
            if lam['dino_embedding_l2'] > 0:
                losses['dino_embedding_l2'] = emb_l2
                loss_G += lam['dino_embedding_l2'] * emb_l2

        losses['loss'] = loss_G
        return losses

    def forward(self, outputs, inputs, content_embedding, class_embedding,
                out_dict, epoch=None):
        del epoch
        return self._forward_jit(outputs, inputs, content_embedding,
                                 class_embedding,
                                 out_dict['out_content_codes'],
                                 out_dict['out_class_codes'])


# ----------------------------------------------------------------------------

if __name__ == "__main__":
    key = jax.random.PRNGKey(0)
    k_model, k1, k2, k3, k4, k5, k6 = jax.random.split(key, 7)

    cfg = dict(
        dino_model_name='dino_vits8',
        dino_global_patch_size=32,
        content_reg_dino=0.1,
        lambda_l1=1.0,
        lambda_l2=1.0,
        dino_embedding_l2=1.0,
        lambda_global_cls=0.1,
        lambda_global_ssim=0.1,
        lambda_global_identity=0.1,
    )

    B, S = 2, 32
    outputs = jax.random.uniform(k1, (B, 3, S, S), jnp.float32)
    inputs = jax.random.uniform(k2, (B, 3, S, S), jnp.float32)
    content_embedding = jax.random.normal(k3, (B, 16), jnp.float32)
    class_embedding = jax.random.normal(k4, (B, 16), jnp.float32)
    out_dict = {
        'out_content_codes': jax.random.normal(k5, (B, 16), jnp.float32),
        'out_class_codes': jax.random.normal(k6, (B, 16), jnp.float32),
    }

    vit_params = init_vit_params(k_model, img_size=S, patch=8, dim=32,
                                 depth=12, heads=2, mlp=128)
    model = LossG(cfg, vit_params)

    losses = model.forward(outputs, inputs, content_embedding, class_embedding,
                           out_dict, epoch=7)
    jax.block_until_ready(losses)
    assert bool(jnp.isfinite(losses['loss'])), "LossG produced a non-finite loss"
    print("KERNEL_OK")
</pallas_src>

<mosaic_0001>
module attributes {stable_mosaic.version = 11 : i64} {
  func.func @_mm_bias_kernel(%arg0: i32, %arg1: memref<64x192xbf16, #tpu.memory_space<vmem>>, %arg2: memref<192x32xbf16, #tpu.memory_space<vmem>>, %arg3: memref<1x32xf32, #tpu.memory_space<vmem>>, %arg4: memref<64x32xf32, #tpu.memory_space<vmem>>) attributes {dimension_semantics = [#tpu.dimension_semantics<parallel>], iteration_bounds = array<i64: 1>, scalar_prefetch = 0 : i64, scratch_operands = 0 : i64, tpu.core_type = #tpu.core_type<tc>, window_params = [{transform_indices = @transform_0, window_bounds = array<i64: 64, 192>}, {pipeline_mode = #tpu.pipeline_mode<synchronous>, transform_indices = @transform_1, window_bounds = array<i64: 192, 32>}, {pipeline_mode = #tpu.pipeline_mode<synchronous>, transform_indices = @transform_2, window_bounds = array<i64: 1, 32>}, {transform_indices = @transform_3, window_bounds = array<i64: 64, 32>}]} {
    %c0 = arith.constant 0 : index
    %c0_0 = arith.constant 0 : index
    %0 = vector.load %arg1[%c0, %c0_0] : memref<64x192xbf16, #tpu.memory_space<vmem>>, vector<64x192xbf16>
    %c0_1 = arith.constant 0 : index
    %c0_2 = arith.constant 0 : index
    %1 = vector.load %arg2[%c0_1, %c0_2] : memref<192x32xbf16, #tpu.memory_space<vmem>>, vector<192x32xbf16>
    %cst = arith.constant dense<0.000000e+00> : vector<64x32xf32>
    %2 = tpu.matmul %0, %1, %cst {dimension_numbers = #tpu.dot_dimension_numbers<[1], [0], [0], [1], [0, 0, 1, 1], [], []>} : vector<64x192xbf16>, vector<192x32xbf16>, vector<64x32xf32> -> vector<64x32xf32>
    %c0_3 = arith.constant 0 : index
    %c0_4 = arith.constant 0 : index
    %3 = vector.load %arg3[%c0_3, %c0_4] : memref<1x32xf32, #tpu.memory_space<vmem>>, vector<1x32xf32>
    %4 = vector.broadcast %3 : vector<1x32xf32> to vector<64x32xf32>
    %5 = arith.addf %2, %4 : vector<64x32xf32>
    %c0_5 = arith.constant 0 : index
    %c0_6 = arith.constant 0 : index
    %6 = vector.load %arg4[%c0_5, %c0_6] : memref<64x32xf32, #tpu.memory_space<vmem>>, vector<64x32xf32>
    tpu.vector_store %arg4[%c0_5, %c0_6], %5 {strides = array<i32>} : memref<64x32xf32, #tpu.memory_space<vmem>>, vector<64x32xf32>,
    return
  }
  func.func @transform_0(%arg0: i32) -> (i32, i32) {
    %c0_i32 = arith.constant 0 : i32
    %c0_i32_0 = arith.constant 0 : i32
    return %arg0, %c0_i32 : i32, i32
  }
  func.func @transform_1(%arg0: i32) -> (i32, i32) {
    %c0_i32 = arith.constant 0 : i32
    %c0_i32_0 = arith.constant 0 : i32
    %c0_i32_1 = arith.constant 0 : i32
    return %c0_i32, %c0_i32_0 : i32, i32
  }
  func.func @transform_2(%arg0: i32) -> (i32, i32) {
    %c0_i32 = arith.constant 0 : i32
    %c0_i32_0 = arith.constant 0 : i32
    %c0_i32_1 = arith.constant 0 : i32
    return %c0_i32, %c0_i32_0 : i32, i32
  }
  func.func @transform_3(%arg0: i32) -> (i32, i32) {
    %c0_i32 = arith.constant 0 : i32
    %c0_i32_0 = arith.constant 0 : i32
    return %arg0, %c0_i32 : i32, i32
  }
}

module attributes {stable_mosaic.version = 11 : i64} {
  func.func @_vit_feature_losses_kernel(%arg0: i32, %arg1: memref<1x17x32xf32, #tpu.memory_space<vmem>>, %arg2: memref<1x17x32xf32, #tpu.memory_space<vmem>>, %arg3: memref<1x1x32xf32, #tpu.memory_space<vmem>>, %arg4: memref<1x1x32xf32, #tpu.memory_space<vmem>>, %arg5: memref<1x1xf32, #tpu.memory_space<vmem>>, %arg6: memref<1x1xf32, #tpu.memory_space<vmem>>, %arg7: memref<1x1xf32, #tpu.memory_space<vmem>>) attributes {dimension_semantics = [#tpu.dimension_semantics<arbitrary>], iteration_bounds = array<i64: 2>, scalar_prefetch = 0 : i64, scratch_operands = 0 : i64, tpu.core_type = #tpu.core_type<tc>, window_params = [{transform_indices = @transform_0, window_bounds = array<i64: 1, 17, 32>}, {transform_indices = @transform_1, window_bounds = array<i64: 1, 17, 32>}, {transform_indices = @transform_2, window_bounds = array<i64: 1, 1, 32>}, {transform_indices = @transform_3, window_bounds = array<i64: 1, 1, 32>}, {pipeline_mode = #tpu.pipeline_mode<synchronous>, transform_indices = @transform_4, window_bounds = array<i64: 1, 1>}, {pipeline_mode = #tpu.pipeline_mode<synchronous>, transform_indices = @transform_5, window_bounds = array<i64: 1, 1>}, {pipeline_mode = #tpu.pipeline_mode<synchronous>, transform_indices = @transform_6, window_bounds = array<i64: 1, 1>}]} {
    %c0_i32 = arith.constant 0 : i32
    %0 = arith.cmpi eq, %arg0, %c0_i32 : i32
    %1 = arith.extui %0 : i1 to i32
    %c0_i32_0 = arith.constant 0 : i32
    %2 = arith.cmpi ne, %1, %c0_i32_0 : i32
    scf.if %2 {
      %cst_41 = arith.constant 0.000000e+00 : f32
      %70 = vector.broadcast %cst_41 : f32 to vector<1x1xf32>
      %c0_42 = arith.constant 0 : index
      %c0_43 = arith.constant 0 : index
      %71 = vector.load %arg5[%c0_42, %c0_43] : memref<1x1xf32, #tpu.memory_space<vmem>>, vector<1x1xf32>
      tpu.vector_store %arg5[%c0_42, %c0_43], %70 {strides = array<i32>} : memref<1x1xf32, #tpu.memory_space<vmem>>, vector<1x1xf32>,
      %cst_44 = arith.constant 0.000000e+00 : f32
      %72 = vector.broadcast %cst_44 : f32 to vector<1x1xf32>
      %c0_45 = arith.constant 0 : index
      %c0_46 = arith.constant 0 : index
      %73 = vector.load %arg6[%c0_45, %c0_46] : memref<1x1xf32, #tpu.memory_space<vmem>>, vector<1x1xf32>
      tpu.vector_store %arg6[%c0_45, %c0_46], %72 {strides = array<i32>} : memref<1x1xf32, #tpu.memory_space<vmem>>, vector<1x1xf32>,
      %cst_47 = arith.constant 0.000000e+00 : f32
      %74 = vector.broadcast %cst_47 : f32 to vector<1x1xf32>
      %c0_48 = arith.constant 0 : index
      %c0_49 = arith.constant 0 : index
      %75 = vector.load %arg7[%c0_48, %c0_49] : memref<1x1xf32, #tpu.memory_space<vmem>>, vector<1x1xf32>
      tpu.vector_store %arg7[%c0_48, %c0_49], %74 {strides = array<i32>} : memref<1x1xf32, #tpu.memory_space<vmem>>, vector<1x1xf32>,
    } else {
    }
    %c0 = arith.constant 0 : index
    %c0_1 = arith.constant 0 : index
    %c0_2 = arith.constant 0 : index
    %3 = vector.load %arg1[%c0, %c0_1, %c0_2] : memref<1x17x32xf32, #tpu.memory_space<vmem>>, vector<1x17x32xf32>
    %4 = vector.shape_cast %3 : vector<1x17x32xf32> to vector<17x32xf32>
    %c0_3 = arith.constant 0 : index
    %c0_4 = arith.constant 0 : index
    %c0_5 = arith.constant 0 : index
    %5 = vector.load %arg2[%c0_3, %c0_4, %c0_5] : memref<1x17x32xf32, #tpu.memory_space<vmem>>, vector<1x17x32xf32>
    %6 = vector.shape_cast %5 : vector<1x17x32xf32> to vector<17x32xf32>
    %7 = arith.subf %4, %6 : vector<17x32xf32>
    %c0_6 = arith.constant 0 : index
    %c0_7 = arith.constant 0 : index
    %8 = vector.load %arg7[%c0_6, %c0_7] : memref<1x1xf32, #tpu.memory_space<vmem>>, vector<1x1xf32>
    %9 = arith.mulf %7, %7 : vector<17x32xf32>
    %cst = arith.constant dense<0.000000e+00> : vector<17xf32>
    %10 = vector.multi_reduction <add>, %9, %cst [1] : vector<17x32xf32> to vector<17xf32>
    %11 = vector.shape_cast %10 : vector<17xf32> to vector<17x1xf32>
    %cst_8 = arith.constant dense<0.000000e+00> : vector<1xf32>
    %12 = vector.multi_reduction <add>, %11, %cst_8 [0] : vector<17x1xf32> to vector<1xf32>
    %13 = vector.shape_cast %12 : vector<1xf32> to vector<1x1xf32>
    %14 = arith.addf %8, %13 : vector<1x1xf32>
    %c0_9 = arith.constant 0 : index
    %c0_10 = arith.constant 0 : index
    %15 = vector.load %arg7[%c0_9, %c0_10] : memref<1x1xf32, #tpu.memory_space<vmem>>, vector<1x1xf32>
    tpu.vector_store %arg7[%c0_9, %c0_10], %14 {strides = array<i32>} : memref<1x1xf32, #tpu.memory_space<vmem>>, vector<1x1xf32>,
    %c0_11 = arith.constant 0 : index
    %c0_12 = arith.constant 0 : index
    %c0_13 = arith.constant 0 : index
    %16 = vector.load %arg3[%c0_11, %c0_12, %c0_13] : memref<1x1x32xf32, #tpu.memory_space<vmem>>, vector<1x1x32xf32>
    %17 = vector.shape_cast %16 : vector<1x1x32xf32> to vector<1x32xf32>
    %c0_14 = arith.constant 0 : index
    %c0_15 = arith.constant 0 : index
    %c0_16 = arith.constant 0 : index
    %18 = vector.load %arg4[%c0_14, %c0_15, %c0_16] : memref<1x1x32xf32, #tpu.memory_space<vmem>>, vector<1x1x32xf32>
    %19 = vector.shape_cast %18 : vector<1x1x32xf32> to vector<1x32xf32>
    %20 = arith.subf %17, %19 : vector<1x32xf32>
    %c0_17 = arith.constant 0 : index
    %c0_18 = arith.constant 0 : index
    %21 = vector.load %arg6[%c0_17, %c0_18] : memref<1x1xf32, #tpu.memory_space<vmem>>, vector<1x1xf32>
    %22 = arith.mulf %20, %20 : vector<1x32xf32>
    %cst_19 = arith.constant dense<0.000000e+00> : vector<1xf32>
    %23 = vector.multi_reduction <add>, %22, %cst_19 [1] : vector<1x32xf32> to vector<1xf32>
    %24 = vector.shape_cast %23 : vector<1xf32> to vector<1x1xf32>
    %cst_20 = arith.constant dense<0.000000e+00> : vector<1xf32>
    %25 = vector.multi_reduction <add>, %24, %cst_20 [0] : vector<1x1xf32> to vector<1xf32>
    %26 = vector.shape_cast %25 : vector<1xf32> to vector<1x1xf32>
    %27 = arith.addf %21, %26 : vector<1x1xf32>
    %c0_21 = arith.constant 0 : index
    %c0_22 = arith.constant 0 : index
    %28 = vector.load %arg6[%c0_21, %c0_22] : memref<1x1xf32, #tpu.memory_space<vmem>>, vector<1x1xf32>
    tpu.vector_store %arg6[%c0_21, %c0_22], %27 {strides = array<i32>} : memref<1x1xf32, #tpu.memory_space<vmem>>, vector<1x1xf32>,
    %cst_23 = arith.constant dense<0.000000e+00> : vector<17x17xf32>
    %29 = tpu.matmul %4, %4, %cst_23 {dimension_numbers = #tpu.dot_dimension_numbers<[1], [1], [0], [0], [0, 0, 1, 0], [], []>} : vector<17x32xf32>, vector<17x32xf32>, vector<17x17xf32> -> vector<17x17xf32>
    %30 = arith.mulf %4, %4 : vector<17x32xf32>
    %cst_24 = arith.constant dense<0.000000e+00> : vector<17xf32>
    %31 = vector.multi_reduction <add>, %30, %cst_24 [1] : vector<17x32xf32> to vector<17xf32>
    %32 = vector.shape_cast %31 : vector<17xf32> to vector<17x1xf32>
    %cst_25 = arith.constant 1.000000e+00 : f32
    %33 = vector.broadcast %cst_25 : f32 to vector<1x32xf32>
    %cst_26 = arith.constant dense<0.000000e+00> : vector<1x17xf32>
    %34 = tpu.matmul %33, %30, %cst_26 {dimension_numbers = #tpu.dot_dimension_numbers<[1], [1], [0], [0], [0, 0, 1, 0], [], []>} : vector<1x32xf32>, vector<17x32xf32>, vector<1x17xf32> -> vector<1x17xf32>
    %cst_27 = arith.constant 1.000000e-16 : f32
    %35 = vector.broadcast %cst_27 : f32 to vector<17x1xf32>
    %36 = arith.maximumf %32, %35 : vector<17x1xf32>
    %37 = math.rsqrt %36 : vector<17x1xf32>
    %cst_28 = arith.constant 1.000000e-16 : f32
    %38 = vector.broadcast %cst_28 : f32 to vector<1x17xf32>
    %39 = arith.maximumf %34, %38 : vector<1x17xf32>
    %40 = math.rsqrt %39 : vector<1x17xf32>
    %41 = vector.broadcast %37 : vector<17x1xf32> to vector<17x17xf32>
    %42 = arith.mulf %29, %41 : vector<17x17xf32>
    %43 = vector.broadcast %40 : vector<1x17xf32> to vector<17x17xf32>
    %44 = arith.mulf %42, %43 : vector<17x17xf32>
    %cst_29 = arith.constant dense<0.000000e+00> : vector<17x17xf32>
    %45 = tpu.matmul %6, %6, %cst_29 {dimension_numbers = #tpu.dot_dimension_numbers<[1], [1], [0], [0], [0, 0, 1, 0], [], []>} : vector<17x32xf32>, vector<17x32xf32>, vector<17x17xf32> -> vector<17x17xf32>
    %46 = arith.mulf %6, %6 : vector<17x32xf32>
    %cst_30 = arith.constant dense<0.000000e+00> : vector<17xf32>
    %47 = vector.multi_reduction <add>, %46, %cst_30 [1] : vector<17x32xf32> to vector<17xf32>
    %48 = vector.shape_cast %47 : vector<17xf32> to vector<17x1xf32>
    %cst_31 = arith.constant 1.000000e+00 : f32
    %49 = vector.broadcast %cst_31 : f32 to vector<1x32xf32>
    %cst_32 = arith.constant dense<0.000000e+00> : vector<1x17xf32>
    %50 = tpu.matmul %49, %46, %cst_32 {dimension_numbers = #tpu.dot_dimension_numbers<[1], [1], [0], [0], [0, 0, 1, 0], [], []>} : vector<1x32xf32>, vector<17x32xf32>, vector<1x17xf32> -> vector<1x17xf32>
    %cst_33 = arith.constant 1.000000e-16 : f32
    %51 = vector.broadcast %cst_33 : f32 to vector<17x1xf32>
    %52 = arith.maximumf %48, %51 : vector<17x1xf32>
    %53 = math.rsqrt %52 : vector<17x1xf32>
    %cst_34 = arith.constant 1.000000e-16 : f32
    %54 = vector.broadcast %cst_34 : f32 to vector<1x17xf32>
    %55 = arith.maximumf %50, %54 : vector<1x17xf32>
    %56 = math.rsqrt %55 : vector<1x17xf32>
    %57 = vector.broadcast %53 : vector<17x1xf32> to vector<17x17xf32>
    %58 = arith.mulf %45, %57 : vector<17x17xf32>
    %59 = vector.broadcast %56 : vector<1x17xf32> to vector<17x17xf32>
    %60 = arith.mulf %58, %59 : vector<17x17xf32>
    %61 = arith.subf %44, %60 : vector<17x17xf32>
    %c0_35 = arith.constant 0 : index
    %c0_36 = arith.constant 0 : index
    %62 = vector.load %arg5[%c0_35, %c0_36] : memref<1x1xf32, #tpu.memory_space<vmem>>, vector<1x1xf32>
    %63 = arith.mulf %61, %61 : vector<17x17xf32>
    %cst_37 = arith.constant dense<0.000000e+00> : vector<17xf32>
    %64 = vector.multi_reduction <add>, %63, %cst_37 [1] : vector<17x17xf32> to vector<17xf32>
    %65 = vector.shape_cast %64 : vector<17xf32> to vector<17x1xf32>
    %cst_38 = arith.constant dense<0.000000e+00> : vector<1xf32>
    %66 = vector.multi_reduction <add>, %65, %cst_38 [0] : vector<17x1xf32> to vector<1xf32>
    %67 = vector.shape_cast %66 : vector<1xf32> to vector<1x1xf32>
    %68 = arith.addf %62, %67 : vector<1x1xf32>
    %c0_39 = arith.constant 0 : index
    %c0_40 = arith.constant 0 : index
    %69 = vector.load %arg5[%c0_39, %c0_40] : memref<1x1xf32, #tpu.memory_space<vmem>>, vector<1x1xf32>
    tpu.vector_store %arg5[%c0_39, %c0_40], %68 {strides = array<i32>} : memref<1x1xf32, #tpu.memory_space<vmem>>, vector<1x1xf32>,
    return
  }
  func.func @transform_0(%arg0: i32) -> (i32, i32, i32) {
    %c0_i32 = arith.constant 0 : i32
    %c0_i32_0 = arith.constant 0 : i32
    %c0_i32_1 = arith.constant 0 : i32
    return %arg0, %c0_i32, %c0_i32_0 : i32, i32, i32
  }
  func.func @transform_1(%arg0: i32) -> (i32, i32, i32) {
    %c2_i32 = arith.constant 2 : i32
    %0 = arith.addi %arg0, %c2_i32 : i32
    %c0_i32 = arith.constant 0 : i32
    %c0_i32_0 = arith.constant 0 : i32
    %c0_i32_1 = arith.constant 0 : i32
    return %0, %c0_i32, %c0_i32_0 : i32, i32, i32
  }
  func.func @transform_2(%arg0: i32) -> (i32, i32, i32) {
    %c0_i32 = arith.constant 0 : i32
    %c0_i32_0 = arith.constant 0 : i32
    %c0_i32_1 = arith.constant 0 : i32
    return %arg0, %c0_i32, %c0_i32_0 : i32, i32, i32
  }
  func.func @transform_3(%arg0: i32) -> (i32, i32, i32) {
    %c2_i32 = arith.constant 2 : i32
    %0 = arith.addi %arg0, %c2_i32 : i32
    %c0_i32 = arith.constant 0 : i32
    %c0_i32_0 = arith.constant 0 : i32
    %c0_i32_1 = arith.constant 0 : i32
    return %0, %c0_i32, %c0_i32_0 : i32, i32, i32
  }
  func.func @transform_4(%arg0: i32) -> (i32, i32) {
    %c0_i32 = arith.constant 0 : i32
    %c0_i32_0 = arith.constant 0 : i32
    %c0_i32_1 = arith.constant 0 : i32
    return %c0_i32, %c0_i32_0 : i32, i32
  }
  func.func @transform_5(%arg0: i32) -> (i32, i32) {
    %c0_i32 = arith.constant 0 : i32
    %c0_i32_0 = arith.constant 0 : i32
    %c0_i32_1 = arith.constant 0 : i32
    return %c0_i32, %c0_i32_0 : i32, i32
  }
  func.func @transform_6(%arg0: i32) -> (i32, i32) {
    %c0_i32 = arith.constant 0 : i32
    %c0_i32_0 = arith.constant 0 : i32
    %c0_i32_1 = arith.constant 0 : i32
    return %c0_i32, %c0_i32_0 : i32, i32
  }
}

module attributes {stable_mosaic.version = 11 : i64} {
  func.func @_vit_blocks_kernel(%arg0: i32, %arg1: i32, %arg2: memref<1x17x32xf32, #tpu.memory_space<vmem>>, %arg3: memref<1x1x32xf32, #tpu.memory_space<vmem>>, %arg4: memref<1x1x32xf32, #tpu.memory_space<vmem>>, %arg5: memref<1x32x96xbf16, #tpu.memory_space<vmem>>, %arg6: memref<1x1x96xf32, #tpu.memory_space<vmem>>, %arg7: memref<1x32x32xbf16, #tpu.memory_space<vmem>>, %arg8: memref<1x1x32xf32, #tpu.memory_space<vmem>>, %arg9: memref<1x1x32xf32, #tpu.memory_space<vmem>>, %arg10: memref<1x1x32xf32, #tpu.memory_space<vmem>>, %arg11: memref<1x32x128xbf16, #tpu.memory_space<vmem>>, %arg12: memref<1x1x128xf32, #tpu.memory_space<vmem>>, %arg13: memref<1x128x32xbf16, #tpu.memory_space<vmem>>, %arg14: memref<1x1x32xf32, #tpu.memory_space<vmem>>, %arg15: memref<1x17x32xf32, #tpu.memory_space<vmem>>, %arg16: memref<1x17x32xf32, #tpu.memory_space<vmem>>, %arg17: memref<17x32xf32, #tpu.memory_space<vmem>>) attributes {dimension_semantics = [#tpu.dimension_semantics<parallel>, #tpu.dimension_semantics<arbitrary>], iteration_bounds = array<i64: 4, 12>, scalar_prefetch = 0 : i64, scratch_operands = 1 : i64, tpu.core_type = #tpu.core_type<tc>, window_params = [{transform_indices = @transform_0, window_bounds = array<i64: 1, 17, 32>}, {transform_indices = @transform_1, window_bounds = array<i64: 1, 1, 32>}, {transform_indices = @transform_2, window_bounds = array<i64: 1, 1, 32>}, {transform_indices = @transform_3, window_bounds = array<i64: 1, 32, 96>}, {transform_indices = @transform_4, window_bounds = array<i64: 1, 1, 96>}, {transform_indices = @transform_5, window_bounds = array<i64: 1, 32, 32>}, {transform_indices = @transform_6, window_bounds = array<i64: 1, 1, 32>}, {transform_indices = @transform_7, window_bounds = array<i64: 1, 1, 32>}, {transform_indices = @transform_8, window_bounds = array<i64: 1, 1, 32>}, {transform_indices = @transform_9, window_bounds = array<i64: 1, 32, 128>}, {transform_indices = @transform_10, window_bounds = array<i64: 1, 1, 128>}, {transform_indices = @transform_11, window_bounds = array<i64: 1, 128, 32>}, {transform_indices = @transform_12, window_bounds = array<i64: 1, 1, 32>}, {transform_indices = @transform_13, window_bounds = array<i64: 1, 17, 32>}, {transform_indices = @transform_14, window_bounds = array<i64: 1, 17, 32>}]} {
    %c0_i32 = arith.constant 0 : i32
    %0 = arith.cmpi eq, %arg1, %c0_i32 : i32
    %1 = arith.extui %0 : i1 to i32
    %c0_i32_0 = arith.constant 0 : i32
    %2 = arith.cmpi ne, %1, %c0_i32_0 : i32
    scf.if %2 {
      %c0_75 = arith.constant 0 : index
      %c0_76 = arith.constant 0 : index
      %c0_77 = arith.constant 0 : index
      %151 = vector.load %arg2[%c0_75, %c0_76, %c0_77] : memref<1x17x32xf32, #tpu.memory_space<vmem>>, vector<1x17x32xf32>
      %c0_78 = arith.constant 0 : index
      %c0_79 = arith.constant 0 : index
      %c0_80 = arith.constant 0 : index
      %152 = vector.load %arg15[%c0_78, %c0_79, %c0_80] : memref<1x17x32xf32, #tpu.memory_space<vmem>>, vector<1x17x32xf32>
      tpu.vector_store %arg15[%c0_78, %c0_79, %c0_80], %151 {strides = array<i32>} : memref<1x17x32xf32, #tpu.memory_space<vmem>>, vector<1x17x32xf32>,
    } else {
    }
    %c0 = arith.constant 0 : index
    %c0_1 = arith.constant 0 : index
    %c0_2 = arith.constant 0 : index
    %3 = vector.load %arg3[%c0, %c0_1, %c0_2] : memref<1x1x32xf32, #tpu.memory_space<vmem>>, vector<1x1x32xf32>
    %4 = vector.shape_cast %3 : vector<1x1x32xf32> to vector<1x32xf32>
    %c0_3 = arith.constant 0 : index
    %c0_4 = arith.constant 0 : index
    %c0_5 = arith.constant 0 : index
    %5 = vector.load %arg4[%c0_3, %c0_4, %c0_5] : memref<1x1x32xf32, #tpu.memory_space<vmem>>, vector<1x1x32xf32>
    %6 = vector.shape_cast %5 : vector<1x1x32xf32> to vector<1x32xf32>
    %c0_6 = arith.constant 0 : index
    %c0_7 = arith.constant 0 : index
    %c0_8 = arith.constant 0 : index
    %7 = vector.load %arg5[%c0_6, %c0_7, %c0_8] : memref<1x32x96xbf16, #tpu.memory_space<vmem>>, vector<1x32x96xbf16>
    %8 = vector.shape_cast %7 : vector<1x32x96xbf16> to vector<32x96xbf16>
    %c0_9 = arith.constant 0 : index
    %c0_10 = arith.constant 0 : index
    %c0_11 = arith.constant 0 : index
    %9 = vector.load %arg6[%c0_9, %c0_10, %c0_11] : memref<1x1x96xf32, #tpu.memory_space<vmem>>, vector<1x1x96xf32>
    %10 = vector.shape_cast %9 : vector<1x1x96xf32> to vector<1x96xf32>
    %c0_12 = arith.constant 0 : index
    %c0_13 = arith.constant 0 : index
    %c0_14 = arith.constant 0 : index
    %11 = vector.load %arg7[%c0_12, %c0_13, %c0_14] : memref<1x32x32xbf16, #tpu.memory_space<vmem>>, vector<1x32x32xbf16>
    %12 = vector.shape_cast %11 : vector<1x32x32xbf16> to vector<32x32xbf16>
    %c0_15 = arith.constant 0 : index
    %c0_16 = arith.constant 0 : index
    %c0_17 = arith.constant 0 : index
    %13 = vector.load %arg8[%c0_15, %c0_16, %c0_17] : memref<1x1x32xf32, #tpu.memory_space<vmem>>, vector<1x1x32xf32>
    %14 = vector.shape_cast %13 : vector<1x1x32xf32> to vector<1x32xf32>
    %c0_18 = arith.constant 0 : index
    %c0_19 = arith.constant 0 : index
    %c0_20 = arith.constant 0 : index
    %15 = vector.load %arg9[%c0_18, %c0_19, %c0_20] : memref<1x1x32xf32, #tpu.memory_space<vmem>>, vector<1x1x32xf32>
    %16 = vector.shape_cast %15 : vector<1x1x32xf32> to vector<1x32xf32>
    %c0_21 = arith.constant 0 : index
    %c0_22 = arith.constant 0 : index
    %c0_23 = arith.constant 0 : index
    %17 = vector.load %arg10[%c0_21, %c0_22, %c0_23] : memref<1x1x32xf32, #tpu.memory_space<vmem>>, vector<1x1x32xf32>
    %18 = vector.shape_cast %17 : vector<1x1x32xf32> to vector<1x32xf32>
    %c0_24 = arith.constant 0 : index
    %c0_25 = arith.constant 0 : index
    %c0_26 = arith.constant 0 : index
    %19 = vector.load %arg11[%c0_24, %c0_25, %c0_26] : memref<1x32x128xbf16, #tpu.memory_space<vmem>>, vector<1x32x128xbf16>
    %20 = vector.shape_cast %19 : vector<1x32x128xbf16> to vector<32x128xbf16>
    %c0_27 = arith.constant 0 : index
    %c0_28 = arith.constant 0 : index
    %c0_29 = arith.constant 0 : index
    %21 = vector.load %arg12[%c0_27, %c0_28, %c0_29] : memref<1x1x128xf32, #tpu.memory_space<vmem>>, vector<1x1x128xf32>
    %22 = vector.shape_cast %21 : vector<1x1x128xf32> to vector<1x128xf32>
    %c0_30 = arith.constant 0 : index
    %c0_31 = arith.constant 0 : index
    %c0_32 = arith.constant 0 : index
    %23 = vector.load %arg13[%c0_30, %c0_31, %c0_32] : memref<1x128x32xbf16, #tpu.memory_space<vmem>>, vector<1x128x32xbf16>
    %24 = vector.shape_cast %23 : vector<1x128x32xbf16> to vector<128x32xbf16>
    %c0_33 = arith.constant 0 : index
    %c0_34 = arith.constant 0 : index
    %c0_35 = arith.constant 0 : index
    %25 = vector.load %arg14[%c0_33, %c0_34, %c0_35] : memref<1x1x32xf32, #tpu.memory_space<vmem>>, vector<1x1x32xf32>
    %26 = vector.shape_cast %25 : vector<1x1x32xf32> to vector<1x32xf32>
    %c0_36 = arith.constant 0 : index
    %c0_37 = arith.constant 0 : index
    %c0_38 = arith.constant 0 : index
    %27 = vector.load %arg15[%c0_36, %c0_37, %c0_38] : memref<1x17x32xf32, #tpu.memory_space<vmem>>, vector<1x17x32xf32>
    %28 = vector.shape_cast %27 : vector<1x17x32xf32> to vector<17x32xf32>
    %cst = arith.constant dense<0.000000e+00> : vector<17xf32>
    %29 = vector.multi_reduction <add>, %28, %cst [1] : vector<17x32xf32> to vector<17xf32>
    %30 = vector.shape_cast %29 : vector<17xf32> to vector<17x1xf32>
    %cst_39 = arith.constant 3.200000e+01 : f32
    %31 = vector.broadcast %cst_39 : f32 to vector<17x1xf32>
    %32 = arith.divf %30, %31 : vector<17x1xf32>
    %33 = vector.broadcast %32 : vector<17x1xf32> to vector<17x32xf32>
    %34 = arith.subf %28, %33 : vector<17x32xf32>
    %35 = arith.mulf %34, %34 : vector<17x32xf32>
    %cst_40 = arith.constant dense<0.000000e+00> : vector<17xf32>
    %36 = vector.multi_reduction <add>, %35, %cst_40 [1] : vector<17x32xf32> to vector<17xf32>
    %37 = vector.shape_cast %36 : vector<17xf32> to vector<17x1xf32>
    %cst_41 = arith.constant 3.200000e+01 : f32
    %38 = vector.broadcast %cst_41 : f32 to vector<17x1xf32>
    %39 = arith.divf %37, %38 : vector<17x1xf32>
    %cst_42 = arith.constant 9.99999997E-7 : f32
    %40 = vector.broadcast %cst_42 : f32 to vector<17x1xf32>
    %41 = arith.addf %39, %40 : vector<17x1xf32>
    %42 = math.rsqrt %41 : vector<17x1xf32>
    %43 = vector.broadcast %42 : vector<17x1xf32> to vector<17x32xf32>
    %44 = arith.mulf %34, %43 : vector<17x32xf32>
    %45 = vector.broadcast %4 : vector<1x32xf32> to vector<17x32xf32>
    %46 = arith.mulf %44, %45 : vector<17x32xf32>
    %47 = vector.broadcast %6 : vector<1x32xf32> to vector<17x32xf32>
    %48 = arith.addf %46, %47 : vector<17x32xf32>
    %49 = arith.truncf %48 : vector<17x32xf32> to vector<17x32xbf16>
    %cst_43 = arith.constant dense<0.000000e+00> : vector<17x96xf32>
    %50 = tpu.matmul %49, %8, %cst_43 {dimension_numbers = #tpu.dot_dimension_numbers<[1], [0], [0], [1], [0, 0, 1, 1], [], []>} : vector<17x32xbf16>, vector<32x96xbf16>, vector<17x96xf32> -> vector<17x96xf32>
    %51 = vector.broadcast %10 : vector<1x96xf32> to vector<17x96xf32>
    %52 = arith.addf %50, %51 : vector<17x96xf32>
    %c11_i32 = arith.constant 11 : i32
    %53 = arith.cmpi eq, %arg1, %c11_i32 : i32
    %54 = arith.extui %53 : i1 to i32
    %c0_i32_44 = arith.constant 0 : i32
    %55 = arith.cmpi ne, %54, %c0_i32_44 : i32
    scf.if %55 {
      %151 = vector.extract_strided_slice %52 {offsets = [0, 32], sizes = [17, 32], strides = [1, 1]} : vector<17x96xf32> to vector<17x32xf32>
      %c0_75 = arith.constant 0 : index
      %c0_76 = arith.constant 0 : index
      %c0_77 = arith.constant 0 : index
      %152 = vector.load %arg16[%c0_75, %c0_76, %c0_77] : memref<1x17x32xf32, #tpu.memory_space<vmem>>, vector<1x17x32xf32>
      %153 = vector.shape_cast %152 : vector<1x17x32xf32> to vector<17x32xf32>
      %154 = vector.shape_cast %151 : vector<17x32xf32> to vector<1x17x32xf32>
      tpu.vector_store %arg16[%c0_75, %c0_76, %c0_77], %154 {strides = array<i32>} : memref<1x17x32xf32, #tpu.memory_space<vmem>>, vector<1x17x32xf32>,
    } else {
    }
    %56 = vector.extract_strided_slice %52 {offsets = [0, 0], sizes = [17, 16], strides = [1, 1]} : vector<17x96xf32> to vector<17x16xf32>
    %57 = vector.extract_strided_slice %52 {offsets = [0, 32], sizes = [17, 16], strides = [1, 1]} : vector<17x96xf32> to vector<17x16xf32>
    %58 = vector.extract_strided_slice %52 {offsets = [0, 64], sizes = [17, 16], strides = [1, 1]} : vector<17x96xf32> to vector<17x16xf32>
    %59 = arith.truncf %56 : vector<17x16xf32> to vector<17x16xbf16>
    %60 = arith.truncf %57 : vector<17x16xf32> to vector<17x16xbf16>
    %cst_45 = arith.constant dense<0.000000e+00> : vector<17x17xf32>
    %61 = tpu.matmul %59, %60, %cst_45 {dimension_numbers = #tpu.dot_dimension_numbers<[1], [1], [0], [0], [0, 0, 1, 0], [], []>} : vector<17x16xbf16>, vector<17x16xbf16>, vector<17x17xf32> -> vector<17x17xf32>
    %cst_46 = arith.constant 2.500000e-01 : f32
    %62 = vector.broadcast %cst_46 : f32 to vector<17x17xf32>
    %63 = arith.mulf %61, %62 : vector<17x17xf32>
    %cst_47 = arith.constant dense<0xFF800000> : vector<17xf32>
    %64 = vector.multi_reduction <maximumf>, %63, %cst_47 [1] : vector<17x17xf32> to vector<17xf32>
    %65 = vector.shape_cast %64 : vector<17xf32> to vector<17x1xf32>
    %66 = vector.broadcast %65 : vector<17x1xf32> to vector<17x17xf32>
    %67 = arith.subf %63, %66 : vector<17x17xf32>
    %68 = math.exp %67 : vector<17x17xf32>
    %cst_48 = arith.constant dense<0.000000e+00> : vector<17xf32>
    %69 = vector.multi_reduction <add>, %68, %cst_48 [1] : vector<17x17xf32> to vector<17xf32>
    %70 = vector.shape_cast %69 : vector<17xf32> to vector<17x1xf32>
    %71 = tpu.reciprocal %70 {approx = true} : vector<17x1xf32> -> vector<17x1xf32>
    %72 = vector.broadcast %71 : vector<17x1xf32> to vector<17x17xf32>
    %73 = arith.mulf %68, %72 : vector<17x17xf32>
    %74 = arith.truncf %73 : vector<17x17xf32> to vector<17x17xbf16>
    %75 = arith.truncf %58 : vector<17x16xf32> to vector<17x16xbf16>
    %cst_49 = arith.constant dense<0.000000e+00> : vector<17x16xf32>
    %76 = tpu.matmul %74, %75, %cst_49 {dimension_numbers = #tpu.dot_dimension_numbers<[1], [0], [0], [1], [0, 0, 1, 1], [], []>} : vector<17x17xbf16>, vector<17x16xbf16>, vector<17x16xf32> -> vector<17x16xf32>
    %c0_50 = arith.constant 0 : index
    %c0_51 = arith.constant 0 : index
    %77 = vector.load %arg17[%c0_50, %c0_51] : memref<17x32xf32, #tpu.memory_space<vmem>>, vector<17x16xf32>
    tpu.vector_store %arg17[%c0_50, %c0_51], %76 {strides = array<i32>} : memref<17x32xf32, #tpu.memory_space<vmem>>, vector<17x16xf32>,
    %78 = vector.extract_strided_slice %52 {offsets = [0, 16], sizes = [17, 16], strides = [1, 1]} : vector<17x96xf32> to vector<17x16xf32>
    %79 = vector.extract_strided_slice %52 {offsets = [0, 48], sizes = [17, 16], strides = [1, 1]} : vector<17x96xf32> to vector<17x16xf32>
    %80 = vector.extract_strided_slice %52 {offsets = [0, 80], sizes = [17, 16], strides = [1, 1]} : vector<17x96xf32> to vector<17x16xf32>
    %81 = arith.truncf %78 : vector<17x16xf32> to vector<17x16xbf16>
    %82 = arith.truncf %79 : vector<17x16xf32> to vector<17x16xbf16>
    %cst_52 = arith.constant dense<0.000000e+00> : vector<17x17xf32>
    %83 = tpu.matmul %81, %82, %cst_52 {dimension_numbers = #tpu.dot_dimension_numbers<[1], [1], [0], [0], [0, 0, 1, 0], [], []>} : vector<17x16xbf16>, vector<17x16xbf16>, vector<17x17xf32> -> vector<17x17xf32>
    %cst_53 = arith.constant 2.500000e-01 : f32
    %84 = vector.broadcast %cst_53 : f32 to vector<17x17xf32>
    %85 = arith.mulf %83, %84 : vector<17x17xf32>
    %cst_54 = arith.constant dense<0xFF800000> : vector<17xf32>
    %86 = vector.multi_reduction <maximumf>, %85, %cst_54 [1] : vector<17x17xf32> to vector<17xf32>
    %87 = vector.shape_cast %86 : vector<17xf32> to vector<17x1xf32>
    %88 = vector.broadcast %87 : vector<17x1xf32> to vector<17x17xf32>
    %89 = arith.subf %85, %88 : vector<17x17xf32>
    %90 = math.exp %89 : vector<17x17xf32>
    %cst_55 = arith.constant dense<0.000000e+00> : vector<17xf32>
    %91 = vector.multi_reduction <add>, %90, %cst_55 [1] : vector<17x17xf32> to vector<17xf32>
    %92 = vector.shape_cast %91 : vector<17xf32> to vector<17x1xf32>
    %93 = tpu.reciprocal %92 {approx = true} : vector<17x1xf32> -> vector<17x1xf32>
    %94 = vector.broadcast %93 : vector<17x1xf32> to vector<17x17xf32>
    %95 = arith.mulf %90, %94 : vector<17x17xf32>
    %96 = arith.truncf %95 : vector<17x17xf32> to vector<17x17xbf16>
    %97 = arith.truncf %80 : vector<17x16xf32> to vector<17x16xbf16>
    %cst_56 = arith.constant dense<0.000000e+00> : vector<17x16xf32>
    %98 = tpu.matmul %96, %97, %cst_56 {dimension_numbers = #tpu.dot_dimension_numbers<[1], [0], [0], [1], [0, 0, 1, 1], [], []>} : vector<17x17xbf16>, vector<17x16xbf16>, vector<17x16xf32> -> vector<17x16xf32>
    %c0_57 = arith.constant 0 : index
    %c16 = arith.constant 16 : index
    %99 = vector.load %arg17[%c0_57, %c16] : memref<17x32xf32, #tpu.memory_space<vmem>>, vector<17x16xf32>
    tpu.vector_store %arg17[%c0_57, %c16], %98 {strides = array<i32>} : memref<17x32xf32, #tpu.memory_space<vmem>>, vector<17x16xf32>,
    %c0_58 = arith.constant 0 : index
    %c0_59 = arith.constant 0 : index
    %100 = vector.load %arg17[%c0_58, %c0_59] : memref<17x32xf32, #tpu.memory_space<vmem>>, vector<17x32xf32>
    %101 = arith.truncf %100 : vector<17x32xf32> to vector<17x32xbf16>
    %cst_60 = arith.constant dense<0.000000e+00> : vector<17x32xf32>
    %102 = tpu.matmul %101, %12, %cst_60 {dimension_numbers = #tpu.dot_dimension_numbers<[1], [0], [0], [1], [0, 0, 1, 1], [], []>} : vector<17x32xbf16>, vector<32x32xbf16>, vector<17x32xf32> -> vector<17x32xf32>
    %103 = arith.addf %28, %102 : vector<17x32xf32>
    %104 = vector.broadcast %14 : vector<1x32xf32> to vector<17x32xf32>
    %105 = arith.addf %103, %104 : vector<17x32xf32>
    %cst_61 = arith.constant dense<0.000000e+00> : vector<17xf32>
    %106 = vector.multi_reduction <add>, %105, %cst_61 [1] : vector<17x32xf32> to vector<17xf32>
    %107 = vector.shape_cast %106 : vector<17xf32> to vector<17x1xf32>
    %cst_62 = arith.constant 3.200000e+01 : f32
    %108 = vector.broadcast %cst_62 : f32 to vector<17x1xf32>
    %109 = arith.divf %107, %108 : vector<17x1xf32>
    %110 = vector.broadcast %109 : vector<17x1xf32> to vector<17x32xf32>
    %111 = arith.subf %105, %110 : vector<17x32xf32>
    %112 = arith.mulf %111, %111 : vector<17x32xf32>
    %cst_63 = arith.constant dense<0.000000e+00> : vector<17xf32>
    %113 = vector.multi_reduction <add>, %112, %cst_63 [1] : vector<17x32xf32> to vector<17xf32>
    %114 = vector.shape_cast %113 : vector<17xf32> to vector<17x1xf32>
    %cst_64 = arith.constant 3.200000e+01 : f32
    %115 = vector.broadcast %cst_64 : f32 to vector<17x1xf32>
    %116 = arith.divf %114, %115 : vector<17x1xf32>
    %cst_65 = arith.constant 9.99999997E-7 : f32
    %117 = vector.broadcast %cst_65 : f32 to vector<17x1xf32>
    %118 = arith.addf %116, %117 : vector<17x1xf32>
    %119 = math.rsqrt %118 : vector<17x1xf32>
    %120 = vector.broadcast %119 : vector<17x1xf32> to vector<17x32xf32>
    %121 = arith.mulf %111, %120 : vector<17x32xf32>
    %122 = vector.broadcast %16 : vector<1x32xf32> to vector<17x32xf32>
    %123 = arith.mulf %121, %122 : vector<17x32xf32>
    %124 = vector.broadcast %18 : vector<1x32xf32> to vector<17x32xf32>
    %125 = arith.addf %123, %124 : vector<17x32xf32>
    %126 = arith.truncf %125 : vector<17x32xf32> to vector<17x32xbf16>
    %cst_66 = arith.constant dense<0.000000e+00> : vector<17x128xf32>
    %127 = tpu.matmul %126, %20, %cst_66 {dimension_numbers = #tpu.dot_dimension_numbers<[1], [0], [0], [1], [0, 0, 1, 1], [], []>} : vector<17x32xbf16>, vector<32x128xbf16>, vector<17x128xf32> -> vector<17x128xf32>
    %128 = vector.broadcast %22 : vector<1x128xf32> to vector<17x128xf32>
    %129 = arith.addf %127, %128 : vector<17x128xf32>
    %cst_67 = arith.constant 5.000000e-01 : f32
    %130 = vector.broadcast %cst_67 : f32 to vector<17x128xf32>
    %131 = arith.mulf %130, %129 : vector<17x128xf32>
    %cst_68 = arith.constant 4.471500e-02 : f32
    %132 = vector.broadcast %cst_68 : f32 to vector<17x128xf32>
    %133 = arith.mulf %132, %129 : vector<17x128xf32>
    %134 = arith.mulf %133, %129 : vector<17x128xf32>
    %135 = arith.mulf %134, %129 : vector<17x128xf32>
    %136 = arith.addf %129, %135 : vector<17x128xf32>
    %cst_69 = arith.constant 0.797884583 : f32
    %137 = vector.broadcast %cst_69 : f32 to vector<17x128xf32>
    %138 = arith.mulf %137, %136 : vector<17x128xf32>
    %139 = math.tanh %138 : vector<17x128xf32>
    %cst_70 = arith.constant 1.000000e+00 : f32
    %140 = vector.broadcast %cst_70 : f32 to vector<17x128xf32>
    %141 = arith.addf %140, %139 : vector<17x128xf32>
    %142 = arith.mulf %131, %141 : vector<17x128xf32>
    %143 = arith.truncf %142 : vector<17x128xf32> to vector<17x128xbf16>
    %cst_71 = arith.constant dense<0.000000e+00> : vector<17x32xf32>
    %144 = tpu.matmul %143, %24, %cst_71 {dimension_numbers = #tpu.dot_dimension_numbers<[1], [0], [0], [1], [0, 0, 1, 1], [], []>} : vector<17x128xbf16>, vector<128x32xbf16>, vector<17x32xf32> -> vector<17x32xf32>
    %145 = arith.addf %105, %144 : vector<17x32xf32>
    %146 = vector.broadcast %26 : vector<1x32xf32> to vector<17x32xf32>
    %147 = arith.addf %145, %146 : vector<17x32xf32>
    %c0_72 = arith.constant 0 : index
    %c0_73 = arith.constant 0 : index
    %c0_74 = arith.constant 0 : index
    %148 = vector.load %arg15[%c0_72, %c0_73, %c0_74] : memref<1x17x32xf32, #tpu.memory_space<vmem>>, vector<1x17x32xf32>
    %149 = vector.shape_cast %148 : vector<1x17x32xf32> to vector<17x32xf32>
    %150 = vector.shape_cast %147 : vector<17x32xf32> to vector<1x17x32xf32>
    tpu.vector_store %arg15[%c0_72, %c0_73, %c0_74], %150 {strides = array<i32>} : memref<1x17x32xf32, #tpu.memory_space<vmem>>, vector<1x17x32xf32>,
    return
  }
  func.func @transform_0(%arg0: i32, %arg1: i32) -> (i32, i32, i32) {
    %c0_i32 = arith.constant 0 : i32
    %c0_i32_0 = arith.constant 0 : i32
    %c0_i32_1 = arith.constant 0 : i32
    return %arg0, %c0_i32, %c0_i32_0 : i32, i32, i32
  }
  func.func @transform_1(%arg0: i32, %arg1: i32) -> (i32, i32, i32) {
    %c0_i32 = arith.constant 0 : i32
    %c0_i32_0 = arith.constant 0 : i32
    %c0_i32_1 = arith.constant 0 : i32
    return %arg1, %c0_i32, %c0_i32_0 : i32, i32, i32
  }
  func.func @transform_2(%arg0: i32, %arg1: i32) -> (i32, i32, i32) {
    %c0_i32 = arith.constant 0 : i32
    %c0_i32_0 = arith.constant 0 : i32
    %c0_i32_1 = arith.constant 0 : i32
    return %arg1, %c0_i32, %c0_i32_0 : i32, i32, i32
  }
  func.func @transform_3(%arg0: i32, %arg1: i32) -> (i32, i32, i32) {
    %c0_i32 = arith.constant 0 : i32
    %c0_i32_0 = arith.constant 0 : i32
    %c0_i32_1 = arith.constant 0 : i32
    return %arg1, %c0_i32, %c0_i32_0 : i32, i32, i32
  }
  func.func @transform_4(%arg0: i32, %arg1: i32) -> (i32, i32, i32) {
    %c0_i32 = arith.constant 0 : i32
    %c0_i32_0 = arith.constant 0 : i32
    %c0_i32_1 = arith.constant 0 : i32
    return %arg1, %c0_i32, %c0_i32_0 : i32, i32, i32
  }
  func.func @transform_5(%arg0: i32, %arg1: i32) -> (i32, i32, i32) {
    %c0_i32 = arith.constant 0 : i32
    %c0_i32_0 = arith.constant 0 : i32
    %c0_i32_1 = arith.constant 0 : i32
    return %arg1, %c0_i32, %c0_i32_0 : i32, i32, i32
  }
  func.func @transform_6(%arg0: i32, %arg1: i32) -> (i32, i32, i32) {
    %c0_i32 = arith.constant 0 : i32
    %c0_i32_0 = arith.constant 0 : i32
    %c0_i32_1 = arith.constant 0 : i32
    return %arg1, %c0_i32, %c0_i32_0 : i32, i32, i32
  }
  func.func @transform_7(%arg0: i32, %arg1: i32) -> (i32, i32, i32) {
    %c0_i32 = arith.constant 0 : i32
    %c0_i32_0 = arith.constant 0 : i32
    %c0_i32_1 = arith.constant 0 : i32
    return %arg1, %c0_i32, %c0_i32_0 : i32, i32, i32
  }
  func.func @transform_8(%arg0: i32, %arg1: i32) -> (i32, i32, i32) {
    %c0_i32 = arith.constant 0 : i32
    %c0_i32_0 = arith.constant 0 : i32
    %c0_i32_1 = arith.constant 0 : i32
    return %arg1, %c0_i32, %c0_i32_0 : i32, i32, i32
  }
  func.func @transform_9(%arg0: i32, %arg1: i32) -> (i32, i32, i32) {
    %c0_i32 = arith.constant 0 : i32
    %c0_i32_0 = arith.constant 0 : i32
    %c0_i32_1 = arith.constant 0 : i32
    return %arg1, %c0_i32, %c0_i32_0 : i32, i32, i32
  }
  func.func @transform_10(%arg0: i32, %arg1: i32) -> (i32, i32, i32) {
    %c0_i32 = arith.constant 0 : i32
    %c0_i32_0 = arith.constant 0 : i32
    %c0_i32_1 = arith.constant 0 : i32
    return %arg1, %c0_i32, %c0_i32_0 : i32, i32, i32
  }
  func.func @transform_11(%arg0: i32, %arg1: i32) -> (i32, i32, i32) {
    %c0_i32 = arith.constant 0 : i32
    %c0_i32_0 = arith.constant 0 : i32
    %c0_i32_1 = arith.constant 0 : i32
    return %arg1, %c0_i32, %c0_i32_0 : i32, i32, i32
  }
  func.func @transform_12(%arg0: i32, %arg1: i32) -> (i32, i32, i32) {
    %c0_i32 = arith.constant 0 : i32
    %c0_i32_0 = arith.constant 0 : i32
    %c0_i32_1 = arith.constant 0 : i32
    return %arg1, %c0_i32, %c0_i32_0 : i32, i32, i32
  }
  func.func @transform_13(%arg0: i32, %arg1: i32) -> (i32, i32, i32) {
    %c0_i32 = arith.constant 0 : i32
    %c0_i32_0 = arith.constant 0 : i32
    %c0_i32_1 = arith.constant 0 : i32
    return %arg0, %c0_i32, %c0_i32_0 : i32, i32, i32
  }
  func.func @transform_14(%arg0: i32, %arg1: i32) -> (i32, i32, i32) {
    %c0_i32 = arith.constant 0 : i32
    %c0_i32_0 = arith.constant 0 : i32
    %c0_i32_1 = arith.constant 0 : i32
    return %arg0, %c0_i32, %c0_i32_0 : i32, i32, i32
  }
}

module attributes {stable_mosaic.version = 11 : i64} {
  func.func @_pixel_losses_kernel(%arg0: i32, %arg1: memref<1x1x3072xf32, #tpu.memory_space<vmem>>, %arg2: memref<1x1x3072xf32, #tpu.memory_space<vmem>>, %arg3: memref<1x1xf32, #tpu.memory_space<vmem>>, %arg4: memref<1x1xf32, #tpu.memory_space<vmem>>) attributes {dimension_semantics = [#tpu.dimension_semantics<arbitrary>], iteration_bounds = array<i64: 2>, scalar_prefetch = 0 : i64, scratch_operands = 0 : i64, tpu.core_type = #tpu.core_type<tc>, window_params = [{transform_indices = @transform_0, window_bounds = array<i64: 1, 1, 3072>}, {transform_indices = @transform_1, window_bounds = array<i64: 1, 1, 3072>}, {pipeline_mode = #tpu.pipeline_mode<synchronous>, transform_indices = @transform_2, window_bounds = array<i64: 1, 1>}, {pipeline_mode = #tpu.pipeline_mode<synchronous>, transform_indices = @transform_3, window_bounds = array<i64: 1, 1>}]} {
    %c0_i32 = arith.constant 0 : i32
    %0 = arith.cmpi eq, %arg0, %c0_i32 : i32
    %1 = arith.extui %0 : i1 to i32
    %c0_i32_0 = arith.constant 0 : i32
    %2 = arith.cmpi ne, %1, %c0_i32_0 : i32
    scf.if %2 {
      %cst_17 = arith.constant 0.000000e+00 : f32
      %24 = vector.broadcast %cst_17 : f32 to vector<1x1xf32>
      %c0_18 = arith.constant 0 : index
      %c0_19 = arith.constant 0 : index
      %25 = vector.load %arg3[%c0_18, %c0_19] : memref<1x1xf32, #tpu.memory_space<vmem>>, vector<1x1xf32>
      tpu.vector_store %arg3[%c0_18, %c0_19], %24 {strides = array<i32>} : memref<1x1xf32, #tpu.memory_space<vmem>>, vector<1x1xf32>,
      %cst_20 = arith.constant 0.000000e+00 : f32
      %26 = vector.broadcast %cst_20 : f32 to vector<1x1xf32>
      %c0_21 = arith.constant 0 : index
      %c0_22 = arith.constant 0 : index
      %27 = vector.load %arg4[%c0_21, %c0_22] : memref<1x1xf32, #tpu.memory_space<vmem>>, vector<1x1xf32>
      tpu.vector_store %arg4[%c0_21, %c0_22], %26 {strides = array<i32>} : memref<1x1xf32, #tpu.memory_space<vmem>>, vector<1x1xf32>,
    } else {
    }
    %c0 = arith.constant 0 : index
    %c0_1 = arith.constant 0 : index
    %c0_2 = arith.constant 0 : index
    %3 = vector.load %arg1[%c0, %c0_1, %c0_2] : memref<1x1x3072xf32, #tpu.memory_space<vmem>>, vector<1x1x3072xf32>
    %4 = vector.shape_cast %3 : vector<1x1x3072xf32> to vector<1x3072xf32>
    %c0_3 = arith.constant 0 : index
    %c0_4 = arith.constant 0 : index
    %c0_5 = arith.constant 0 : index
    %5 = vector.load %arg2[%c0_3, %c0_4, %c0_5] : memref<1x1x3072xf32, #tpu.memory_space<vmem>>, vector<1x1x3072xf32>
    %6 = vector.shape_cast %5 : vector<1x1x3072xf32> to vector<1x3072xf32>
    %7 = arith.subf %4, %6 : vector<1x3072xf32>
    %c0_6 = arith.constant 0 : index
    %c0_7 = arith.constant 0 : index
    %8 = vector.load %arg3[%c0_6, %c0_7] : memref<1x1xf32, #tpu.memory_space<vmem>>, vector<1x1xf32>
    %9 = math.absf %7 : vector<1x3072xf32>
    %cst = arith.constant dense<0.000000e+00> : vector<1xf32>
    %10 = vector.multi_reduction <add>, %9, %cst [1] : vector<1x3072xf32> to vector<1xf32>
    %11 = vector.shape_cast %10 : vector<1xf32> to vector<1x1xf32>
    %cst_8 = arith.constant dense<0.000000e+00> : vector<1xf32>
    %12 = vector.multi_reduction <add>, %11, %cst_8 [0] : vector<1x1xf32> to vector<1xf32>
    %13 = vector.shape_cast %12 : vector<1xf32> to vector<1x1xf32>
    %14 = arith.addf %8, %13 : vector<1x1xf32>
    %c0_9 = arith.constant 0 : index
    %c0_10 = arith.constant 0 : index
    %15 = vector.load %arg3[%c0_9, %c0_10] : memref<1x1xf32, #tpu.memory_space<vmem>>, vector<1x1xf32>
    tpu.vector_store %arg3[%c0_9, %c0_10], %14 {strides = array<i32>} : memref<1x1xf32, #tpu.memory_space<vmem>>, vector<1x1xf32>,
    %c0_11 = arith.constant 0 : index
    %c0_12 = arith.constant 0 : index
    %16 = vector.load %arg4[%c0_11, %c0_12] : memref<1x1xf32, #tpu.memory_space<vmem>>, vector<1x1xf32>
    %17 = arith.mulf %7, %7 : vector<1x3072xf32>
    %cst_13 = arith.constant dense<0.000000e+00> : vector<1xf32>
    %18 = vector.multi_reduction <add>, %17, %cst_13 [1] : vector<1x3072xf32> to vector<1xf32>
    %19 = vector.shape_cast %18 : vector<1xf32> to vector<1x1xf32>
    %cst_14 = arith.constant dense<0.000000e+00> : vector<1xf32>
    %20 = vector.multi_reduction <add>, %19, %cst_14 [0] : vector<1x1xf32> to vector<1xf32>
    %21 = vector.shape_cast %20 : vector<1xf32> to vector<1x1xf32>
    %22 = arith.addf %16, %21 : vector<1x1xf32>
    %c0_15 = arith.constant 0 : index
    %c0_16 = arith.constant 0 : index
    %23 = vector.load %arg4[%c0_15, %c0_16] : memref<1x1xf32, #tpu.memory_space<vmem>>, vector<1x1xf32>
    tpu.vector_store %arg4[%c0_15, %c0_16], %22 {strides = array<i32>} : memref<1x1xf32, #tpu.memory_space<vmem>>, vector<1x1xf32>,
    return
  }
  func.func @transform_0(%arg0: i32) -> (i32, i32, i32) {
    %c0_i32 = arith.constant 0 : i32
    %c0_i32_0 = arith.constant 0 : i32
    %c0_i32_1 = arith.constant 0 : i32
    return %arg0, %c0_i32, %c0_i32_0 : i32, i32, i32
  }
  func.func @transform_1(%arg0: i32) -> (i32, i32, i32) {
    %c0_i32 = arith.constant 0 : i32
    %c0_i32_0 = arith.constant 0 : i32
    %c0_i32_1 = arith.constant 0 : i32
    return %arg0, %c0_i32, %c0_i32_0 : i32, i32, i32
  }
  func.func @transform_2(%arg0: i32) -> (i32, i32) {
    %c0_i32 = arith.constant 0 : i32
    %c0_i32_0 = arith.constant 0 : i32
    %c0_i32_1 = arith.constant 0 : i32
    return %c0_i32, %c0_i32_0 : i32, i32
  }
  func.func @transform_3(%arg0: i32) -> (i32, i32) {
    %c0_i32 = arith.constant 0 : i32
    %c0_i32_0 = arith.constant 0 : i32
    %c0_i32_1 = arith.constant 0 : i32
    return %c0_i32, %c0_i32_0 : i32, i32
  }
}

module attributes {stable_mosaic.version = 11 : i64} {
  func.func @_embedding_losses_kernel(%arg0: memref<2x16xf32, #tpu.memory_space<vmem>>, %arg1: memref<2x16xf32, #tpu.memory_space<vmem>>, %arg2: memref<2x16xf32, #tpu.memory_space<vmem>>, %arg3: memref<2x16xf32, #tpu.memory_space<vmem>>, %arg4: memref<1x1xf32, #tpu.memory_space<vmem>>, %arg5: memref<1x1xf32, #tpu.memory_space<vmem>>) attributes {dimension_semantics = [], scalar_prefetch = 0 : i64, scratch_operands = 0 : i64, tpu.core_type = #tpu.core_type<tc>} {
    %c0 = arith.constant 0 : index
    %c0_0 = arith.constant 0 : index
    %0 = vector.load %arg2[%c0, %c0_0] : memref<2x16xf32, #tpu.memory_space<vmem>>, vector<2x16xf32>
    %c0_1 = arith.constant 0 : index
    %c0_2 = arith.constant 0 : index
    %1 = vector.load %arg0[%c0_1, %c0_2] : memref<2x16xf32, #tpu.memory_space<vmem>>, vector<2x16xf32>
    %2 = arith.subf %0, %1 : vector<2x16xf32>
    %c0_3 = arith.constant 0 : index
    %c0_4 = arith.constant 0 : index
    %3 = vector.load %arg3[%c0_3, %c0_4] : memref<2x16xf32, #tpu.memory_space<vmem>>, vector<2x16xf32>
    %c0_5 = arith.constant 0 : index
    %c0_6 = arith.constant 0 : index
    %4 = vector.load %arg1[%c0_5, %c0_6] : memref<2x16xf32, #tpu.memory_space<vmem>>, vector<2x16xf32>
    %5 = arith.subf %3, %4 : vector<2x16xf32>
    %6 = arith.mulf %2, %2 : vector<2x16xf32>
    %cst = arith.constant dense<0.000000e+00> : vector<2xf32>
    %7 = vector.multi_reduction <add>, %6, %cst [1] : vector<2x16xf32> to vector<2xf32>
    %8 = vector.shape_cast %7 : vector<2xf32> to vector<2x1xf32>
    %cst_7 = arith.constant dense<0.000000e+00> : vector<1xf32>
    %9 = vector.multi_reduction <add>, %8, %cst_7 [0] : vector<2x1xf32> to vector<1xf32>
    %10 = vector.shape_cast %9 : vector<1xf32> to vector<1x1xf32>
    %11 = arith.mulf %5, %5 : vector<2x16xf32>
    %cst_8 = arith.constant dense<0.000000e+00> : vector<2xf32>
    %12 = vector.multi_reduction <add>, %11, %cst_8 [1] : vector<2x16xf32> to vector<2xf32>
    %13 = vector.shape_cast %12 : vector<2xf32> to vector<2x1xf32>
    %cst_9 = arith.constant dense<0.000000e+00> : vector<1xf32>
    %14 = vector.multi_reduction <add>, %13, %cst_9 [0] : vector<2x1xf32> to vector<1xf32>
    %15 = vector.shape_cast %14 : vector<1xf32> to vector<1x1xf32>
    %16 = arith.addf %10, %15 : vector<1x1xf32>
    %c0_10 = arith.constant 0 : index
    %c0_11 = arith.constant 0 : index
    %17 = vector.load %arg4[%c0_10, %c0_11] : memref<1x1xf32, #tpu.memory_space<vmem>>, vector<1x1xf32>
    tpu.vector_store %arg4[%c0_10, %c0_11], %16 {strides = array<i32>} : memref<1x1xf32, #tpu.memory_space<vmem>>, vector<1x1xf32>,
    %c0_12 = arith.constant 0 : index
    %c0_13 = arith.constant 0 : index
    %18 = vector.load %arg0[%c0_12, %c0_13] : memref<2x16xf32, #tpu.memory_space<vmem>>, vector<2x16xf32>
    %19 = arith.mulf %18, %18 : vector<2x16xf32>
    %cst_14 = arith.constant dense<0.000000e+00> : vector<2xf32>
    %20 = vector.multi_reduction <add>, %19, %cst_14 [1] : vector<2x16xf32> to vector<2xf32>
    %21 = vector.shape_cast %20 : vector<2xf32> to vector<2x1xf32>
    %cst_15 = arith.constant dense<0.000000e+00> : vector<1xf32>
    %22 = vector.multi_reduction <add>, %21, %cst_15 [0] : vector<2x1xf32> to vector<1xf32>
    %23 = vector.shape_cast %22 : vector<1xf32> to vector<1x1xf32>
    %c0_16 = arith.constant 0 : index
    %c0_17 = arith.constant 0 : index
    %24 = vector.load %arg5[%c0_16, %c0_17] : memref<1x1xf32, #tpu.memory_space<vmem>>, vector<1x1xf32>
    tpu.vector_store %arg5[%c0_16, %c0_17], %23 {strides = array<i32>} : memref<1x1xf32, #tpu.memory_space<vmem>>, vector<1x1xf32>,
    return
  }
}

</mosaic_0001>

<bundles_post_ra>
// kernel: mul.9
= control target key start
LH: loop header
LB: loop body
LE: loop exit
PB: predicated region body
PF: predicated region fallthrough
CT: control target
= control target key end

     0   :  { %vm8_vm0 = vcmask 523264   ;;  %s23_s8 = smov 64   ;;  %vm14_vm1 = vcmask 1048064   ;;  %s40_s0 = inlined_call_operand.vmem [shape: f32[3,64], index: 0, kind: input, shape index: {}]   ;;  %s41_s1 = inlined_call_operand.vmem [shape: f32[192], index: 1, kind: output, shape index: {}]  }
   0x1   :  { %v4_v0 = vld [vmem:[%s40_s0] sm:$0xf]  ;;  %s6_s0 = smov 3 }
   0x2   :  { %5 = vst [vmem:[#allocation1] sm:$0xf] %v4_v0 }
   0x9   :  { %v11_v1 = vld [vmem:[#allocation1 + $0x1] sm:$0x1]   ;;  %v7_v2 = vld [vmem:[#allocation1] ss:$2 sm:%s6_s0]  }
   0xa   :  { %12 = vrot.lane.b32.xlu0 %v11_v1, %s23_s8  ;;  %9 = vst.msk [vmem:[#allocation0] sm:$0x3] %vm8_vm0, %v7_v2  }
  0x7c   :  { %v13_v3 = vpop.permute.xlu0 %12  }
  0x7d   :  { %15 = vst.msk [vmem:[#allocation0] sm:$0x1] %vm14_vm1, %v13_v3  }
  0x84   :  { %v18_v4 = vld [vmem:[#allocation0] sm:$0x3] }
  0x85   :  { %21 = vst [vmem:[%s41_s1] sm:$0x3] %v18_v4 }

// kernel: _forward_impl.5
= control target key start
LH: loop header
LB: loop body
LE: loop exit
PB: predicated region body
PF: predicated region fallthrough
CT: control target
= control target key end

     0   :  { %vm159_vm0 = vcmask 523264   ;;  %vm230_vm1 = vcmask 261120   ;;  %s503_s1 = inlined_call_operand.vmem [shape: bf16[192,32], index: 1, kind: input, shape index: {}]   ;;  %s504_s0 = inlined_call_operand.vmem [shape: bf16[64,192], index: 0, kind: input, shape index: {}]   ;;  %s505_s2 = inlined_call_operand.vmem [shape: f32[1,32], index: 2, kind: input, shape index: {}]   ;;  %s506_s3 = inlined_call_operand.vmem [shape: f32[64,32], index: 3, kind: output, shape index: {}]  }
   0x1   :  { %v342_v0 = vld [vmem:[%s503_s1 + $0x38] sm:$0xff]  ;;  %v341_v2 = vld [vmem:[%s503_s1 + $0x30] sm:$0xff]  ;;  %v340_v4 = vld [vmem:[%s503_s1 + $0x28] sm:$0xff] }
   0x2   :  { %v346_v1 = vld [vmem:[%s503_s1 + $0x58] sm:$0xff]  ;;  %172 = vmatpush.bf16.msra.mxu0 %v342_v0  ;;  %347 = vmatpush.bf16.msra.mxu2 %v342_v0  ;;  %v345_v3 = vld [vmem:[%s503_s1 + $0x50] sm:$0xff]  ;;  %v344_v5 = vld [vmem:[%s503_s1 + $0x48] sm:$0xff] }
   0x3   :  { %355 = vmatpush.bf16.msra.mxu3 %v346_v1  ;;  %205 = vmatpush.bf16.msra.mxu1 %v346_v1  ;;  %v339_v6 = vld [vmem:[%s503_s1 + $0x20] sm:$0xff]  ;;  %v329_v8 = vld [vmem:[%s504_s0 + $0x14] sm:$0xf]  ;;  %v255_v9 = vld [vmem:[%s504_s0 + $0x18] sm:$0xf0] }
   0x4   :  { %v343_v7 = vld [vmem:[%s503_s1 + $0x40] sm:$0xff]  ;;  %v247_v11 = vld [vmem:[%s504_s0 + $0x8] sm:$0xf0]  ;;  %v258_v12 = vor.u32 %v329_v8, %v255_v9  ;;  %v338_v13 = vld [vmem:[%s503_s1 + $0x18] sm:$0xff] }
   0x5   :  { %v327_v10 = vld [vmem:[%s504_s0 + $0x4] sm:$0xf]  ;;  %v337_v15 = vld [vmem:[%s503_s1 + $0x10] sm:$0xff]  ;;  %v336_v16 = vld [vmem:[%s503_s1 + $0x8] sm:$0xff] }
   0x6   :  { %173 = vmatpush.bf16.msra.mxu0 %v341_v2  ;;  %348 = vmatpush.bf16.msra.mxu2 %v341_v2  ;;  %v250_v14 = vor.u32 %v327_v10, %v247_v11  ;;  %v335_v17 = vld [vmem:[%s503_s1] sm:$0xff]  ;;  %v328_v19 = vld [vmem:[%s504_s0 + $0x4] sm:$0xf0]  ;;  %v263_v23 = vld [vmem:[%s504_s0 + $0x28] sm:$0xf0] }
   0x7   :  { %356 = vmatpush.bf16.msra.mxu3 %v345_v3  ;;  %206 = vmatpush.bf16.msra.mxu1 %v345_v3  ;;  %v245_v18 = vld [vmem:[%s504_s0] sm:$0xf]  ;;  %v332_v21 = vld [vmem:[%s504_s0 + $0x24] sm:$0xf0]  ;;  %v331_v22 = vld [vmem:[%s504_s0 + $0x24] sm:$0xf] }
   0x8   :  { %v261_v20 = vld [vmem:[%s504_s0 + $0x20] sm:$0xf]  ;;  %v246_v24 = vor.u32 %v328_v19, %v245_v18  ;;  %v266_v26 = vor.u32 %v331_v22, %v263_v23  ;;  %v253_v27 = vld [vmem:[%s504_s0 + $0x10] sm:$0xf]  ;;  %v330_v28 = vld [vmem:[%s504_s0 + $0x14] sm:$0xf0] }
   0x9   :  { %v262_v25 = vor.u32 %v332_v21, %v261_v20  ;;  %v269_v29 = vld [vmem:[%s504_s0 + $0x30] sm:$0xf]  ;;  %v334_v30 = vld [vmem:[%s504_s0 + $0x34] sm:$0xf0]  ;;  %v333_v31 = vld [vmem:[%s504_s0 + $0x34] sm:$0xf]  ;;  %v254_v33 = vor.u32 %v330_v28, %v253_v27 }
   0xa   :  { %174 = vmatpush.bf16.msra.mxu0 %v340_v4  ;;  %349 = vmatpush.bf16.msra.mxu2 %v340_v4  ;;  %v271_v32 = vld [vmem:[%s504_s0 + $0x38] sm:$0xf0]  ;;  %v270_v34 = vor.u32 %v334_v30, %v269_v29  ;;  %v359_v37 = vld [vmem:[%s505_s2] ss:$0 sm:$0xff] }
   0xb   :  { %357 = vmatpush.bf16.msra.mxu3 %v344_v5  ;;  %207 = vmatpush.bf16.msra.mxu1 %v344_v5  ;;  %v274_v35 = vor.u32 %v333_v31, %v271_v32 }
   0xe   :  { %175 = vmatpush.bf16.msra.mxu0 %v339_v6  ;;  %350 = vmatpush.bf16.msra.mxu2 %v339_v6 }
   0xf   :  { %358 = vmatpush.bf16.msra.mxu3 %v343_v7  ;;  %208 = vmatpush.bf16.msra.mxu1 %v343_v7 }
  0x12   :  { %324 = vmatmul.msk.bf16.vlgmr.msra.gmra.mxu3 %vm159_vm0, %v258_v12  ;;  %176 = vmatpush.bf16.msra.mxu0 %v338_v13 }
  0x13   :  { %351 = vmatpush.bf16.msra.mxu2 %v338_v13  ;;  %323 = vmatmul.msk.bf16.vlgmr.msra.gmra.mxu1 %vm159_vm0, %v250_v14 }
  0x16   :  { %177 = vmatpush.bf16.msra.mxu0 %v337_v15 }
  0x17   :  { %352 = vmatpush.bf16.msra.mxu2 %v337_v15 }
  0x1a   :  { %178 = vmatpush.bf16.msra.mxu0 %v336_v16 }
  0x1b   :  { %353 = vmatpush.bf16.msra.mxu2 %v336_v16 }
  0x1e   :  { %179 = vmatpush.bf16.msra.mxu0 %v335_v17 }
  0x1f   :  { %354 = vmatpush.bf16.msra.mxu2 %v335_v17 }
  0x21   :  { %180 = vmatmul.bf16.vlgmr.msra.gmra.mxu0 %v246_v24 }
  0x22   :  { %190 = vmatmul.bf16.vlgmr.msra.gmra.mxu2 %v262_v25  ;;  %325 = vmatmul.msk.bf16.gmra.mxu3 %vm159_vm0, %v266_v26 }
  0x31   :  { %185 = vmatmul.bf16.gmra.mxu0 %v254_v33 }
  0x32   :  { %195 = vmatmul.bf16.gmra.mxu2 %v270_v34  ;;  %326 = vmatmul.msk.bf16.gmra.mxu3 %vm159_vm0, %v274_v35 }
  0x90   :  { %v210_v38 = vpop.f32.mrf.mxu1 }
  0x95   :  { %v215_v36 = vpop.f32.mrf.mxu3 }
  0x98   :  { %v212_v47 = vpop.f32.mrf.mxu1 }
  0x9d   :  { %v217_v39 = vpop.f32.mrf.mxu3 }
  0x9e   :  { %v181_v40 = vpop.f32.mrf.mxu0 }
  0x9f   :  { %v182_v41 = vadd.f32 %v359_v37, %v181_v40 }
  0xa1   :  { %v211_v42 = vadd.f32 %v210_v38, %v182_v41 }
  0xa3   :  { %231 = vst.msk [vmem:[%s506_s3] sm:$0xff] %vm230_vm1, %v211_v42 }
  0xa5   :  { %v191_v43 = vpop.f32.mrf.mxu2  ;;  %v220_v44 = vpop.f32.mrf.mxu3 }
  0xa6   :  { %v192_v45 = vadd.f32 %v359_v37, %v191_v43  ;;  %v183_v46 = vpop.f32.mrf.mxu0 }
  0xa7   :  { %v184_v48 = vadd.f32 %v359_v37, %v183_v46 }
  0xa8   :  { %v221_v49 = vadd.f32 %v220_v44, %v192_v45 }
  0xa9   :  { %v213_v50 = vadd.f32 %v212_v47, %v184_v48 }
  0xaa   :  { %235 = vst.msk [vmem:[%s506_s3 + $0x20] sm:$0xff] %vm230_vm1, %v221_v49 }
  0xab   :  { %232 = vst.msk [vmem:[%s506_s3 + $0x8] sm:$0xff] %vm230_vm1, %v213_v50 }
  0xad   :  { %v193_v51 = vpop.f32.mrf.mxu2  ;;  %v222_v52 = vpop.f32.mrf.mxu3 }
  0xae   :  { %v194_v53 = vadd.f32 %v359_v37, %v193_v51  ;;  %v186_v54 = vpop.f32.mrf.mxu0 }
  0xaf   :  { %v187_v55 = vadd.f32 %v359_v37, %v186_v54 }
  0xb0   :  { %v223_v56 = vadd.f32 %v222_v52, %v194_v53 }
  0xb1   :  { %v216_v57 = vadd.f32 %v215_v36, %v187_v55 }
  0xb2   :  { %236 = vst.msk [vmem:[%s506_s3 + $0x28] sm:$0xff] %vm230_vm1, %v223_v56 }
  0xb3   :  { %233 = vst.msk [vmem:[%s506_s3 + $0x10] sm:$0xff] %vm230_vm1, %v216_v57 }
  0xb5   :  { %v196_v58 = vpop.f32.mrf.mxu2  ;;  %v225_v59 = vpop.f32.mrf.mxu3 }
  0xb6   :  { %v197_v60 = vadd.f32 %v359_v37, %v196_v58  ;;  %v188_v61 = vpop.f32.mrf.mxu0 }
  0xb7   :  { %v189_v62 = vadd.f32 %v359_v37, %v188_v61 }
  0xb8   :  { %v226_v63 = vadd.f32 %v225_v59, %v197_v60 }
  0xb9   :  { %v218_v0 = vadd.f32 %v217_v39, %v189_v62 }
  0xba   :  { %237 = vst.msk [vmem:[%s506_s3 + $0x30] sm:$0xff] %vm230_vm1, %v226_v63 }
  0xbb   :  { %234 = vst.msk [vmem:[%s506_s3 + $0x18] sm:$0xff] %vm230_vm1, %v218_v0 }
  0xbd   :  { %v198_v1 = vpop.f32.mrf.mxu2  ;;  %v227_v3 = vpop.f32.mrf.mxu3 }
  0xbe   :  { %v199_v2 = vadd.f32 %v359_v37, %v198_v1 }
  0xc0   :  { %v228_v4 = vadd.f32 %v227_v3, %v199_v2 }
  0xc2   :  { %238 = vst.msk [vmem:[%s506_s3 + $0x38] sm:$0xff] %vm230_vm1, %v228_v4 }

// kernel: _forward_impl.7
= control target key start
LH: loop header
LB: loop body
LE: loop exit
PB: predicated region body
PF: predicated region fallthrough
CT: control target
= control target key end

     0   :  { %12 = vsyncpa [#allocation3], 0  ;;  %s1250_s0 = inlined_call_operand.vmem [shape: f32[4,17,32], index: 0, kind: input, shape index: {}, may-alias: {0,1}]   ;;  %s1251_s1 = inlined_call_operand.vmem [shape: f32[4,17,32], index: 1, kind: input, shape index: {}, may-alias: {0,1}]   ;;  %s1252_s2 = inlined_call_operand.vmem [shape: f32[4,1,32], index: 2, kind: input, shape index: {}, may-alias: {2,3}]   ;;  %s1253_s3 = inlined_call_operand.vmem [shape: f32[4,1,32], index: 3, kind: input, shape index: {}, may-alias: {2,3}]   ;;  %s1254_s4 = inlined_call_operand.hbm [shape: f32[1,1], index: 4, kind: output, shape index: {0}]   ;;  %s1255_s5 = inlined_call_operand.hbm [shape: f32[1,1], index: 5, kind: output, shape index: {1}]   ;;  %s1256_s6 = inlined_call_operand.hbm [shape: f32[1,1], index: 6, kind: output, shape index: {2}]  }
   0x1   :  { %13 = vsyncpa [#allocation5], 0  ;;  %s987_s21 = smov 0  }
   0x2 LB: > { %s993_s22 = sadd.s32 4294967295, %s945_s21   ;;  %p766_p0 = scmp.ge.s32.totalorder %s945_s21, 1  ;;  %s945_s21 = sphi %s987_s21, %s19_s21  }
   0x3   : > { %p238_p1 = scmp.lt.s32.totalorder %s945_s21, 3 }
   0x5   : > { %p239_p2 = pnand %p766_p0, %p238_p1 }
   0x6   : > { %p276_p3 = scmp.lt.s32.totalorder (!%p239_p2), %s993_s22, 3  ;;  %s281_s23 = sadd.s32 (!%p239_p2), 2, %s993_s22 }
   0x7   : > { %242 = sbr.rel (%p239_p2) target bundleno = 345 (0x159), region = 36  ;;  %p282_p4 = scmp.lt.s32.totalorder (!%p239_p2), %s281_s23, 3 }
   0x8   : > { %p769_p5 = scmp.ne.s32.totalorder (!%p239_p2), %s993_s22, 0 }
   0xc   : > { %s1000_s24 = scalar_select %p276_p3, %s993_s22, 3 }
   0xd   : > { %s1268_s23 = smov (!%p282_p4, %s281_s23), 3  ;;  %299 = sbr.rel (%p769_p5) target bundleno = 22 (0x16), region = 40 }
   0xe   : > { %s798_s25 = smul.u32 24, %s1000_s24  ;;  %s290_s28 = scalar_lea.vmem %s1252_s2, %s1000_s24 }
   0xf   : > { %s799_s29 = smul.u32 24, %s1268_s23  ;;  %s294_s8 = scalar_lea.vmem %s1253_s3, %s1268_s23 }
  0x10   : > { %s280_s11 = scalar_lea.vmem %s1250_s0, %s798_s25 }
  0x11   : > { %s286_s14 = scalar_lea.vmem %s1251_s1, %s799_s29 }
  0x12   : > { %vm300_vm0 = vcmask 0   ;;  %v947_v0 = vmov 0.0  }
  0x13   : > { %301 = vst.msk [vmem:[#allocation2] sm:$0x1] %vm300_vm0, %v947_v0 }
  0x14   : > { %302 = vst.msk [vmem:[#allocation4] sm:$0x1] %vm300_vm0, %v947_v0 }
  0x15   : > { %303 = vst.msk [vmem:[#allocation6] sm:$0x1] %vm300_vm0, %v947_v0 }
  0x16 PF: > { %v1021_v1 = vld [vmem:[%s280_s11 + $0x10] sm:$0x1]  ;;  %vm317_vm1 = vcmask 261120   ;;  %v305_v3 = vld [vmem:[%s280_s11 + $0x8] sm:$0xff]  ;;  %v304_v7 = vld [vmem:[%s280_s11] sm:$0xff]  ;;  %vm324_vm2 = vcmask 253952  }
  0x17   : > { %v1023_v2 = vld [vmem:[%s286_s14 + $0x10] sm:$0x1]  ;;  %770 = vmatpush.xpose.msk.msra.mxu0 %vm317_vm1, %v1021_v1  ;;  %v389_v4 = vmul.f32 %v1021_v1, %v1021_v1  ;;  %v308_v6 = vld [vmem:[%s286_s14 + $0x8] sm:$0xff]  ;;  %v307_v8 = vld [vmem:[%s286_s14] sm:$0xff]  ;;  %v387_v9 = vmul.f32 %v304_v7, %v304_v7  ;;  %v388_v11 = vmul.f32 %v305_v3, %v305_v3  ;;  %v948_v19 = vmov 1.0   ;;  %s949_s19 = smov [#allocation4]  }
  0x18   : > { %780 = vmatpush.xpose.msk.msra.mxu2 %vm317_vm1, %v1023_v2  ;;  %v519_v5 = vmul.f32 %v1023_v2, %v1023_v2  ;;  %v517_v10 = vmul.f32 %v307_v8, %v307_v8  ;;  %v518_v12 = vmul.f32 %v308_v6, %v308_v6  ;;  %v311_v23 = vsub.f32 %v305_v3, %v308_v6  ;;  %s656_s20 = sshll.u32 %s949_s19, 4  ;;  %s658_s25 = sshll.u32 %s1255_s5, 4  ;;  %s657_s20 = int_to_ptr.vmem [resolvable:$true] %s656_s20  ;;  %s659_s25 = int_to_ptr.hbm [resolvable:$true] %s658_s25 }
  0x19   : > { %776 = vmatpush.xpose.msk.msra.mxu1 %vm317_vm1, %v389_v4  ;;  %v396_v13 = vsel %vm324_vm2, %v389_v4, 0.0  ;;  %v390_v15 = vsel %vm317_vm1, %v387_v9, 0.0  ;;  %v393_v18 = vsel %vm317_vm1, %v388_v11, 0.0  ;;  %v310_v34 = vsub.f32 %v304_v7, %v307_v8  ;;  %s950_s26 = smov [#allocation6]   ;;  %s670_s30 = sshll.u32 %s1256_s6, 4  ;;  %s671_s30 = int_to_ptr.hbm [resolvable:$true] %s670_s30 }
  0x1a   : > { %786 = vmatpush.xpose.msk.msra.mxu3 %vm317_vm1, %v519_v5  ;;  %v520_v14 = vsel %vm317_vm1, %v517_v10, 0.0  ;;  %397 = vadd.xlane.f32.xlu2 %v396_v13  ;;  %v526_v16 = vsel %vm324_vm2, %v519_v5, 0.0  ;;  %v523_v17 = vsel %vm317_vm1, %v518_v12, 0.0  ;;  %v315_v25 = vmul.f32 %v311_v23, %v311_v23  ;;  %s668_s27 = sshll.u32 %s950_s26, 4  ;;  %p812_p6 = scmp.eq.s32.totalorder %s993_s22, 1  ;;  %s669_s27 = int_to_ptr.vmem [resolvable:$true] %s668_s27 }
  0x1b   : > { %771 = vmatpush.xpose.msk.msra.mxu0 %vm317_vm1, %v305_v3  ;;  %521 = vadd.xlane.f32.xlu1 %v520_v14  ;;  %v314_v36 = vmul.f32 %v310_v34, %v310_v34  ;;  %v312_v37 = vsub.f32 %v1021_v1, %v1023_v2  ;;  %s951_s7 = smov [#allocation2]   ;;  %s646_s11 = sshll.u32 %s1254_s4, 4  ;;  %s647_s11 = int_to_ptr.hbm [resolvable:$true] %s646_s11 }
  0x1c   : > { %781 = vmatpush.xpose.msk.msra.mxu2 %vm317_vm1, %v308_v6  ;;  %391 = vadd.xlane.f32.xlu0 %v390_v15  ;;  %v321_v28 = vsel %vm317_vm1, %v315_v25, 0.0 }
  0x1d   : > { %777 = vmatpush.xpose.msk.msra.mxu1 %vm317_vm1, %v388_v11  ;;  %v318_v39 = vsel %vm317_vm1, %v314_v36, 0.0  ;;  %v316_v43 = vmul.f32 %v312_v37, %v312_v37 }
  0x1e   : > { %787 = vmatpush.xpose.msk.msra.mxu3 %vm317_vm1, %v518_v12 }
  0x1f   : > { %772 = vmatpush.xpose.msk.msra.mxu0 %vm317_vm1, %v304_v7  ;;  %v325_v51 = vsel %vm324_vm2, %v316_v43, 0.0 }
  0x20   : > { %782 = vmatpush.xpose.msk.msra.mxu2 %vm317_vm1, %v307_v8 }
  0x21   : > { %778 = vmatpush.xpose.msk.msra.mxu1 %vm317_vm1, %v387_v9 }
  0x22   : > { %788 = vmatpush.xpose.msk.msra.mxu3 %vm317_vm1, %v517_v10  ;;  %773 = vmatmul.msk.f32.vlgmr.msra.gmra.mxu0 %vm317_vm1, %v304_v7 }
  0x23   : > { %783 = vmatmul.msk.f32.vlgmr.msra.gmra.mxu2 %vm317_vm1, %v307_v8  ;;  %527 = vadd.xlane.f32.xlu2 %v526_v16 }
  0x24   : > { %779 = vmatmul.msk.f32.vlgmr.msra.gmra.mxu1 %vm317_vm1, %v948_v19  ;;  %524 = vadd.xlane.f32.xlu1 %v523_v17 }
  0x25   : > { %789 = vmatmul.msk.f32.vlgmr.msra.gmra.mxu3 %vm317_vm1, %v948_v19  ;;  %394 = vadd.xlane.f32.xlu0 %v393_v18 }
  0x2a   : > { %774 = vmatmul.msk.f32.gmra.mxu0 %vm317_vm1, %v305_v3 }
  0x2b   : > { %784 = vmatmul.msk.f32.gmra.mxu2 %vm317_vm1, %v308_v6 }
  0x2c   : > { %322 = vadd.xlane.f32.xlu1 %v321_v28 }
  0x2d   : > { %319 = vadd.xlane.f32.xlu0 %v318_v39 }
  0x32   : > { %775 = vmatmul.msk.f32.gmra.mxu0 %vm317_vm1, %v1021_v1 }
  0x33   : > { %785 = vmatmul.msk.f32.gmra.mxu2 %vm317_vm1, %v1023_v2 }
  0x34   : > { %326 = vadd.xlane.f32.xlu1 %v325_v51 }
  0x8d   : > { %v398_v20 = vpop.xlane.xlu2 %397 }
  0x8e   : > { %v522_v21 = vpop.xlane.xlu1 %521  ;;  %v1074_v35 = vmax.f32 %v398_v20, 1e-16 }
  0x8f   : > { %v392_v22 = vpop.xlane.xlu0 %391  ;;  %v1059_v24 = vmax.f32 %v522_v21, 1e-16 }
  0x90   : > { %v1061_v26 = vmax.f32 %v392_v22, 1e-16 }
  0x91   : > { %831 = vrsqrt.f32 %v1059_v24  ;;  %vm567_vm5 = vweird.f32 %v1059_v24 }
  0x92   : > { %833 = vrsqrt.f32 %v1061_v26  ;;  %vm440_vm3 = vweird.f32 %v1061_v26 }
  0x96   : > { %v528_v27 = vpop.xlane.xlu2 %527 }
  0x97   : > { %v525_v29 = vpop.xlane.xlu1 %524  ;;  %v1069_v33 = vmax.f32 %v528_v27, 1e-16  ;;  %v1079_v38 = vpop.eup %831 }
  0x98   : > { %v395_v30 = vpop.xlane.xlu0 %394  ;;  %v1065_v31 = vmax.f32 %v525_v29, 1e-16  ;;  %v1082_v40 = vpop.eup %833  ;;  %v562_v47 = vmul.f32 %v1079_v38, %v1059_v24  ;;  %vm568_vm6 = vweird.f32 %v1079_v38 }
  0x99   : > { %v1067_v32 = vmax.f32 %v395_v30, 1e-16  ;;  %v435_v48 = vmul.f32 %v1082_v40, %v1061_v26  ;;  %vm441_vm4 = vweird.f32 %v1082_v40  ;;  %vm1151_vm14 = vmor %vm567_vm5, %vm568_vm6  ;;  %vm587_vm0 = vweird.f32 %v1069_v33 }
  0x9a   : > { %835 = vrsqrt.f32 %v1065_v31  ;;  %v563_v56 = vmul.f32 %v1079_v38, %v562_v47  ;;  %vm577_vm7 = vweird.f32 %v1065_v31  ;;  %vm1138_vm9 = vmor %vm440_vm3, %vm441_vm4 }
  0x9b   : > { %837 = vrsqrt.f32 %v1067_v32  ;;  %v436_v57 = vmul.f32 %v1082_v40, %v435_v48  ;;  %vm450_vm10 = vweird.f32 %v1067_v32 }
  0x9c   : > { %839 = vrsqrt.f32 %v1069_v33  ;;  %v564_v2 = vmul.f32 0.5, %v563_v56 }
  0x9d   : > { %841 = vrsqrt.f32 %v1074_v35  ;;  %v437_v3 = vmul.f32 0.5, %v436_v57 }
  0x9e   : > { %v565_v12 = vsub.f32 1.5, %v564_v2 }
  0x9f   : > { %v1115_v61 = vpop.f32.mrf.mxu0  ;;  %v438_v11 = vsub.f32 1.5, %v437_v3 }
  0xa0   : > { %v1084_v41 = vpop.eup %835  ;;  %v566_v27 = vmul.f32 %v1079_v38, %v565_v12  ;;  %v323_v12 = vpop.xlane.xlu1 %322 }
  0xa1   : > { %v428_v42 = vpop.f32.mrf.mxu1  ;;  %v1087_v44 = vpop.eup %837  ;;  %v572_v49 = vmul.f32 %v1084_v41, %v1065_v31  ;;  %vm578_vm8 = vweird.f32 %v1084_v41  ;;  %v439_v26 = vmul.f32 %v1082_v40, %v438_v11 }
  0xa2   : > { %v1089_v45 = vmax.f32 %v428_v42, 1e-16  ;;  %v1091_v46 = vpop.eup %839  ;;  %v445_v50 = vmul.f32 %v1087_v44, %v1067_v32  ;;  %vm451_vm11 = vweird.f32 %v1087_v44  ;;  %vm1161_vm15 = vmor %vm577_vm7, %vm578_vm8  ;;  %v570_v42 = vsel %vm1151_vm14, %v1079_v38, %v566_v27 }
  0xa3   : > { %v582_v52 = vmul.f32 %v1091_v46, %v1069_v33  ;;  %v1107_v54 = vpop.eup %841  ;;  %v573_v59 = vmul.f32 %v1084_v41, %v572_v49  ;;  %vm588_vm1 = vweird.f32 %v1091_v46  ;;  %vm1170_vm3 = vmor %vm450_vm10, %vm451_vm11  ;;  %v443_v32 = vsel %vm1138_vm9, %v1082_v40, %v439_v26 }
  0xa4   : > { %843 = vrsqrt.f32 %v1089_v45  ;;  %v446_v60 = vmul.f32 %v1087_v44, %v445_v50  ;;  %v455_v63 = vmul.f32 %v1107_v54, %v1074_v35  ;;  %vm471_vm12 = vweird.f32 %v1089_v45  ;;  %vm1177_vm6 = vmor %vm587_vm0, %vm588_vm1 }
  0xa5   : > { %v583_v0 = vmul.f32 %v1091_v46, %v582_v52  ;;  %v574_v4 = vmul.f32 0.5, %v573_v59  ;;  %vm460_vm7 = vweird.f32 %v1074_v35  ;;  %vm461_vm8 = vweird.f32 %v1107_v54 }
  0xa6   : > { %v1105_v53 = vpop.f32.mrf.mxu2  ;;  %v447_v5 = vmul.f32 0.5, %v446_v60  ;;  %v456_v7 = vmul.f32 %v1107_v54, %v455_v63  ;;  %v475_v49 = vmul.f32 %v443_v32, %v1115_v61  ;;  %vm462_vm11 = vmor %vm460_vm7, %vm461_vm8  ;;  %vm329_vm14 = vcmask 1040384  }
  0xa7   : > { %v584_v8 = vmul.f32 0.5, %v583_v0  ;;  %v575_v17 = vsub.f32 1.5, %v574_v4  ;;  %v381_v23 = vpop.f32.mrf.mxu0  ;;  %v602_v51 = vmul.f32 %v570_v42, %v1105_v53  ;;  %v341_v53 = vld [vmem:[%s290_s28] sm:$0x1] }
  0xa8   : > { %v555_v55 = vpop.f32.mrf.mxu3  ;;  %v448_v15 = vsub.f32 1.5, %v447_v5  ;;  %v457_v18 = vmul.f32 0.5, %v456_v7 }
  0xa9   : > { %v1111_v58 = vmax.f32 %v555_v55, 1e-16  ;;  %v585_v20 = vsub.f32 1.5, %v584_v8  ;;  %v576_v34 = vmul.f32 %v1084_v41, %v575_v17 }
  0xaa   : > { %v1117_v62 = vpop.eup %843  ;;  %v449_v24 = vmul.f32 %v1087_v44, %v448_v15  ;;  %v458_v33 = vsub.f32 1.5, %v457_v18  ;;  %v327_v15 = vpop.xlane.xlu1 %326 }
  0xab   : > { %845 = vrsqrt.f32 %v1111_v58  ;;  %v466_v1 = vmul.f32 %v1117_v62, %v1089_v45  ;;  %vm472_vm13 = vweird.f32 %v1117_v62  ;;  %v586_v31 = vmul.f32 %v1091_v46, %v585_v20 }
  0xac   : > { %vm473_vm4 = vmor %vm471_vm12, %vm472_vm13  ;;  %v453_v43 = vsel %vm1170_vm3, %v1087_v44, %v449_v24  ;;  %vm598_vm10 = vweird.f32 %v1111_v58  ;;  %v580_v47 = vsel %vm1161_vm15, %v1084_v41, %v576_v34  ;;  %v459_v44 = vmul.f32 %v1107_v54, %v458_v33  ;;  %v344_v24 = vld [vmem:[#allocation4] sm:$0x1] }
  0xad   : > { %v467_v6 = vmul.f32 %v1117_v62, %v466_v1  ;;  %v590_v38 = vsel %vm1177_vm6, %v1091_v46, %v586_v31  ;;  %v476_v52 = vmul.f32 %v453_v43, %v381_v23  ;;  %vm616_vm12 = vcmask 138240   ;;  %v313_v23 = vld [vmem:[#allocation6] sm:$0x1] }
  0xae   : > { %v511_v13 = vpop.f32.mrf.mxu2  ;;  %v463_v61 = vsel %vm462_vm11, %v1107_v54, %v459_v44  ;;  %vm623_vm13 = vcmask 131072  }
  0xaf   : > { %v468_v9 = vmul.f32 0.5, %v467_v6  ;;  %v603_v55 = vmul.f32 %v580_v47, %v511_v13  ;;  %v384_v41 = vpop.f32.mrf.mxu0  ;;  %v320_v13 = vpop.xlane.xlu0 %319 }
  0xb0   : > { %v477_v35 = vmul.f32 %v463_v61, %v384_v41 }
  0xb1   : > { %v846_v10 = vpop.eup %845  ;;  %v469_v14 = vsub.f32 1.5, %v468_v9 }
  0xb2   : > { %v593_v16 = vmul.f32 %v846_v10, %v1111_v58  ;;  %vm599_vm5 = vweird.f32 %v846_v10 }
  0xb3   : > { %v470_v21 = vmul.f32 %v1117_v62, %v469_v14  ;;  %vm600_vm9 = vmor %vm598_vm10, %vm599_vm5  ;;  %v328_v14 = vadd.f32 %v323_v12, %v320_v13 }
  0xb4   : > { %v594_v25 = vmul.f32 %v846_v10, %v593_v16  ;;  %v330_v16 = vsel %vm329_vm14, %v327_v15, 0.0 }
  0xb5   : > { %v474_v36 = vsel %vm473_vm4, %v1117_v62, %v470_v21  ;;  %v342_v62 = vld [vmem:[%s294_s8] sm:$0x1]  ;;  %v331_v17 = vadd.f32 %v330_v16, %v328_v14  ;;  %s644_s8 = sshll.u32 %s951_s7, 4  ;;  %s645_s8 = int_to_ptr.vmem [resolvable:$true] %s644_s8 }
  0xb6   : > { %v595_v30 = vmul.f32 0.5, %v594_v25  ;;  %v478_v40 = vperm.slane %v474_v36, 0  ;;  %v514_v48 = vpop.f32.mrf.mxu2  ;;  %v343_v5 = vsub.f32 %v341_v53, %v342_v62 }
  0xb7   : > { %v604_v57 = vmul.f32 %v590_v38, %v514_v48  ;;  %v332_v18 = vrot.slane %v331_v17, 4 }
  0xb8   : > { %v596_v37 = vsub.f32 1.5, %v595_v30  ;;  %v480_v46 = vmul.f32 %v478_v40, %v476_v52  ;;  %v479_v59 = vmul.f32 %v478_v40, %v475_v49  ;;  %v481_v2 = vmul.f32 %v478_v40, %v477_v35 }
  0xb9   : > { %v345_v8 = vmul.f32 %v343_v5, %v343_v5  ;;  %v333_v19 = vadd.f32 %v332_v18, %v331_v17 }
  0xba   : > { %v597_v45 = vmul.f32 %v846_v10, %v596_v37 }
  0xbb   : > { %v334_v20 = vrot.slane %v333_v19, 2 }
  0xbc   : > { %v601_v50 = vsel %vm600_vm9, %v846_v10, %v597_v45  ;;  %v346_v10 = vsel %vm324_vm2, %v345_v8, 0.0  ;;  %vm339_vm2 = vcmask 0   ;;  %v612_v45 = vld [vmem:[#allocation2] sm:$0x1] }
  0xbd   : > { %v605_v56 = vperm.slane %v601_v50, 0  ;;  %v335_v21 = vadd.f32 %v334_v20, %v333_v19 }
  0xbf   : > { %v607_v58 = vmul.f32 %v605_v56, %v603_v55  ;;  %v606_v60 = vmul.f32 %v605_v56, %v602_v51  ;;  %v608_v63 = vmul.f32 %v605_v56, %v604_v57  ;;  %v336_v22 = vrot.slane %v335_v21, 1 }
  0xc1   : > { %v609_v0 = vsub.f32 %v479_v59, %v606_v60  ;;  %v610_v1 = vsub.f32 %v480_v46, %v607_v58  ;;  %v611_v7 = vsub.f32 %v481_v2, %v608_v63  ;;  %v337_v25 = vadd.f32 %v336_v22, %v335_v21 }
  0xc3   : > { %v613_v3 = vmul.f32 %v609_v0, %v609_v0  ;;  %v614_v4 = vmul.f32 %v610_v1, %v610_v1  ;;  %v615_v9 = vmul.f32 %v611_v7, %v611_v7  ;;  %v338_v26 = vadd.f32 %v337_v25, %v313_v23 }
  0xc5   : > { %v617_v54 = vsel %vm616_vm12, %v613_v3, 0.0  ;;  %v620_v6 = vsel %vm616_vm12, %v614_v4, 0.0  ;;  %v624_v11 = vsel %vm623_vm13, %v615_v9, 0.0  ;;  %340 = vst.msk [vmem:[#allocation6] sm:$0x1] %vm339_vm2, %v338_v26 }
  0xc6   : > { %618 = vadd.xlane.f32.xlu2 %v617_v54  ;;  %621 = vadd.xlane.f32.xlu0 %v620_v6 }
  0xce   : > { %625 = vadd.xlane.f32.xlu2 %v624_v11  ;;  %347 = vadd.xlane.f32.xlu0 %v346_v10 }
 0x139   : > { %v619_v27 = vpop.xlane.xlu2 %618  ;;  %v622_v28 = vpop.xlane.xlu0 %621 }
 0x13a   : > { %v627_v29 = vadd.f32 %v622_v28, %v619_v27 }
 0x141   : > { %v626_v30 = vpop.xlane.xlu2 %625  ;;  %v348_v34 = vpop.xlane.xlu0 %347 }
 0x142   : > { %v628_v31 = vsel %vm329_vm14, %v626_v30, 0.0  ;;  %v350_v36 = vadd.f32 %v348_v34, %v344_v24 }
 0x143   : > { %v629_v37 = vadd.f32 %v628_v31, %v627_v29 }
 0x144   : > { %351 = vst.msk [vmem:[#allocation4] sm:$0x1] %vm339_vm2, %v350_v36 }
 0x145   : > { %v630_v33 = vrot.slane %v629_v37, 4  ;;  %803 = dma.vmem_to_hbm [thread:$0]  (%p812_p6), %s657_s20, 16, %s659_s25, [#allocation5]  }
 0x146   : > { %805 = dma.vmem_to_hbm [thread:$0]  (%p812_p6), %s669_s27, 16, %s671_s30, [#allocation5]  }
 0x147   : > { %v631_v39 = vadd.f32 %v630_v33, %v629_v37 }
 0x149   : > { %v632_v32 = vrot.slane %v631_v39, 2 }
 0x14b   : > { %v633_v42 = vadd.f32 %v632_v32, %v631_v39 }
 0x14d   : > { %v634_v43 = vrot.slane %v633_v42, 1 }
 0x14f   : > { %v635_v47 = vadd.f32 %v634_v43, %v633_v42 }
 0x151   : > { %v636_v40 = vadd.f32 %v635_v47, %v612_v45 }
 0x153   : > { %637 = vst.msk [vmem:[#allocation2] sm:$0x1] %vm339_vm2, %v636_v40 }
 0x154   : > { %801 = dma.vmem_to_hbm [thread:$0]  (%p812_p6), %s645_s8, 16, %s647_s11, [#allocation3]  }
 0x155   : > { %936 = dma.done.wait (%p812_p6), [#allocation3], 16  }
 0x156   : > { %938 = vsyncadd (%p812_p6), [#allocation3], 4294967280 }
 0x157   : > { %940 = dma.done.wait (%p812_p6), [#allocation5], 32  }
 0x158   : > { %942 = vsyncadd (%p812_p6), [#allocation5], 4294967264 }
 0x159 PF: > { %s19_s21 = sadd.s32 1, %s945_s21  }
 0x15a   : > { %p16_p7 = scmp.ge.s32.totalorder %s19_s21, 4  }
 0x15c   :  { %18 = sbr.rel (!%p16_p7) target bundleno = 2 (0x2), region = 92 }
 0x161   :  { %694 = vsyncpa [#allocation3], 1 }
 0x162   :  { %696 = vsyncpa [#allocation3 + $0x1], 1 }
 0x163   :  { %697 = vsyncpa [#allocation5], 1 }

// kernel: _forward_impl.8
= control target key start
LH: loop header
LB: loop body
LE: loop exit
PB: predicated region body
PF: predicated region fallthrough
CT: control target
= control target key end

     0   :  { %9 = vsyncpa [#allocation3], 0  ;;  %s745_s0 = inlined_call_operand.vmem [shape: f32[2,1,3072], index: 0, kind: input, shape index: {}]   ;;  %s746_s1 = inlined_call_operand.vmem [shape: f32[2,1,3072], index: 1, kind: input, shape index: {}]   ;;  %s747_s2 = inlined_call_operand.hbm [shape: f32[1,1], index: 2, kind: output, shape index: {0}]   ;;  %s748_s3 = inlined_call_operand.hbm [shape: f32[1,1], index: 3, kind: output, shape index: {1}]  }
   0x1   :  { %10 = vsyncpa [#allocation5], 0  ;;  %s616_s12 = smov 0  }
   0x2 LB: > { %s622_s13 = sadd.s32 4294967295, %s591_s12   ;;  %p489_p0 = scmp.ge.s32.totalorder %s591_s12, 1  ;;  %s591_s12 = sphi %s616_s12, %s16_s12  }
   0x3   : > { %p140_p1 = scmp.lt.s32.totalorder %s591_s12, 3 }
   0x5   : > { %p141_p2 = pnand %p489_p0, %p140_p1 }
   0x6   : > { %p162_p3 = scmp.lt.s32.totalorder (!%p141_p2), %s622_s13, 1  ;;  %p490_p4 = scmp.ne.s32.totalorder (!%p141_p2), %s622_s13, 0 }
   0x7   : > { %144 = sbr.rel (%p141_p2) target bundleno = 208 (0xd0), region = 28 }
   0xc   : > { %s163_s14 = scalar_select %p162_p3, %s622_s13, 1 }
   0xd   : > { %173 = sbr.rel (%p490_p4) target bundleno = 21 (0x15), region = 32 }
   0xe   : > { %s497_s15 = smul.u32 24, %s163_s14 }
  0x10   : > { %s631_s18 = scalar_lea.vmem %s745_s0, %s497_s15  ;;  %s636_s21 = scalar_lea.vmem %s746_s1, %s497_s15 }
  0x12   : > { %vm174_vm0 = vcmask 0   ;;  %v593_v0 = vmov 0.0  }
  0x13   : > { %175 = vst.msk [vmem:[#allocation2] sm:$0x1] %vm174_vm0, %v593_v0 }
  0x14   : > { %176 = vst.msk [vmem:[#allocation4] sm:$0x1] %vm174_vm0, %v593_v0 }
  0x15 PF: > { %v177_v1 = vld [vmem:[%s631_s18] sm:$0xff]  ;;  %v178_v5 = vld [vmem:[%s631_s18 + $0x8] sm:$0xff]  ;;  %vm241_vm1 = vcmask 1040384   ;;  %v179_v41 = vld [vmem:[%s631_s18 + $0x10] sm:$0xff]  ;;  %s594_s22 = smov [#allocation2]   ;;  %s410_s26 = sshll.u32 %s747_s2, 4  ;;  %s411_s26 = int_to_ptr.hbm [resolvable:$true] %s410_s26 }
  0x16   : > { %v180_v2 = vld [vmem:[%s636_s21] sm:$0xff]  ;;  %v181_v6 = vld [vmem:[%s636_s21 + $0x8] sm:$0xff]  ;;  %v182_v42 = vld [vmem:[%s636_s21 + $0x10] sm:$0xff]  ;;  %s408_s23 = sshll.u32 %s594_s22, 4  ;;  %vm293_vm2 = vcmask 0   ;;  %p506_p5 = scmp.eq.s32.totalorder %s622_s13, 1  ;;  %s409_s23 = int_to_ptr.vmem [resolvable:$true] %s408_s23 }
  0x17   : > { %v183_v3 = vsub.f32 %v177_v1, %v180_v2  ;;  %v184_v11 = vsub.f32 %v178_v5, %v181_v6  ;;  %v185_v53 = vsub.f32 %v179_v41, %v182_v42  ;;  %s595_s27 = smov [#allocation4]   ;;  %s422_s4 = sshll.u32 %s748_s3, 4  ;;  %s423_s4 = int_to_ptr.hbm [resolvable:$true] %s422_s4 }
  0x18   : > { %s420_s28 = sshll.u32 %s595_s27, 4  ;;  %s421_s28 = int_to_ptr.vmem [resolvable:$true] %s420_s28 }
  0x19   : > { %v187_v4 = vand.u32 2147483647, %v183_v3  ;;  %v647_v20 = vand.u32 2147483647, %v184_v11  ;;  %v296_v24 = vmul.f32 %v183_v3, %v183_v3  ;;  %v667_v58 = vmul.f32 %v184_v11, %v184_v11 }
  0x1a   : > { %v673_v3 = vand.u32 2147483647, %v185_v53 }
  0x1b   : > { %v193_v7 = vperm.slane %v187_v4, 0  ;;  %v194_v8 = vperm.slane %v187_v4, 1  ;;  %v195_v9 = vperm.slane %v187_v4, 2  ;;  %v196_v10 = vperm.slane %v187_v4, 3 }
  0x1c   : > { %v197_v12 = vperm.slane %v187_v4, 4  ;;  %v198_v17 = vperm.slane %v187_v4, 5  ;;  %v199_v21 = vperm.slane %v187_v4, 6  ;;  %v200_v25 = vperm.slane %v187_v4, 7 }
  0x1d   : > { %v242_v13 = vsel %vm241_vm1, %v193_v7, 0.0  ;;  %v243_v14 = vsel %vm241_vm1, %v194_v8, 0.0  ;;  %v245_v15 = vsel %vm241_vm1, %v195_v9, 0.0  ;;  %v247_v18 = vsel %vm241_vm1, %v196_v10, 0.0 }
  0x1e   : > { %v244_v16 = vadd.f32 %v243_v14, %v242_v13  ;;  %v249_v22 = vsel %vm241_vm1, %v197_v12, 0.0  ;;  %v251_v26 = vsel %vm241_vm1, %v198_v17, 0.0  ;;  %v201_v28 = vperm.slane %v647_v20, 0 }
  0x1f   : > { %v253_v29 = vsel %vm241_vm1, %v199_v21, 0.0  ;;  %v302_v31 = vperm.slane %v296_v24, 0  ;;  %v303_v32 = vperm.slane %v296_v24, 1  ;;  %v304_v33 = vperm.slane %v296_v24, 2 }
  0x20   : > { %v246_v19 = vadd.f32 %v245_v15, %v244_v16  ;;  %v202_v34 = vperm.slane %v647_v20, 1  ;;  %v255_v35 = vsel %vm241_vm1, %v200_v25, 0.0  ;;  %v305_v37 = vperm.slane %v296_v24, 3 }
  0x21   : > { %v203_v38 = vperm.slane %v647_v20, 2  ;;  %v257_v39 = vsel %vm241_vm1, %v201_v28, 0.0  ;;  %v306_v40 = vperm.slane %v296_v24, 4  ;;  %v350_v44 = vsel %vm241_vm1, %v302_v31, 0.0 }
  0x22   : > { %v248_v23 = vadd.f32 %v247_v18, %v246_v19  ;;  %v351_v45 = vsel %vm241_vm1, %v303_v32, 0.0  ;;  %v353_v46 = vsel %vm241_vm1, %v304_v33, 0.0  ;;  %v204_v47 = vperm.slane %v647_v20, 3 }
  0x23   : > { %v259_v48 = vsel %vm241_vm1, %v202_v34, 0.0  ;;  %v352_v49 = vadd.f32 %v351_v45, %v350_v44  ;;  %v307_v51 = vperm.slane %v296_v24, 5  ;;  %v355_v52 = vsel %vm241_vm1, %v305_v37, 0.0 }
  0x24   : > { %v250_v27 = vadd.f32 %v249_v22, %v248_v23  ;;  %v205_v54 = vperm.slane %v647_v20, 4  ;;  %v261_v55 = vsel %vm241_vm1, %v203_v38, 0.0  ;;  %v308_v59 = vperm.slane %v296_v24, 6 }
  0x25   : > { %v354_v56 = vadd.f32 %v353_v46, %v352_v49  ;;  %v357_v60 = vsel %vm241_vm1, %v306_v40, 0.0  ;;  %v206_v61 = vperm.slane %v647_v20, 5  ;;  %v263_v62 = vsel %vm241_vm1, %v204_v47, 0.0 }
  0x26   : > { %v252_v30 = vadd.f32 %v251_v26, %v250_v27  ;;  %v309_v1 = vperm.slane %v296_v24, 7  ;;  %v359_v2 = vsel %vm241_vm1, %v307_v51, 0.0  ;;  %v207_v4 = vperm.slane %v647_v20, 6 }
  0x27   : > { %v356_v63 = vadd.f32 %v355_v52, %v354_v56  ;;  %v265_v5 = vsel %vm241_vm1, %v205_v54, 0.0  ;;  %v310_v8 = vperm.slane %v667_v58, 0  ;;  %v361_v9 = vsel %vm241_vm1, %v308_v59, 0.0 }
  0x28   : > { %v254_v36 = vadd.f32 %v253_v29, %v252_v30  ;;  %v208_v10 = vperm.slane %v647_v20, 7  ;;  %v267_v11 = vsel %vm241_vm1, %v206_v61, 0.0  ;;  %v311_v14 = vperm.slane %v667_v58, 1 }
  0x29   : > { %v358_v6 = vadd.f32 %v357_v60, %v356_v63  ;;  %v363_v15 = vsel %vm241_vm1, %v309_v1, 0.0  ;;  %v209_v16 = vperm.slane %v673_v3, 0  ;;  %v269_v17 = vsel %vm241_vm1, %v207_v4, 0.0 }
  0x2a   : > { %v256_v43 = vadd.f32 %v255_v35, %v254_v36  ;;  %v312_v21 = vperm.slane %v667_v58, 2  ;;  %v365_v22 = vsel %vm241_vm1, %v310_v8, 0.0  ;;  %v210_v20 = vperm.slane %v673_v3, 1 }
  0x2b   : > { %v360_v12 = vadd.f32 %v359_v2, %v358_v6  ;;  %v271_v23 = vsel %vm241_vm1, %v208_v10, 0.0  ;;  %v313_v26 = vperm.slane %v667_v58, 3  ;;  %v367_v27 = vsel %vm241_vm1, %v311_v14, 0.0 }
  0x2c   : > { %v258_v50 = vadd.f32 %v257_v39, %v256_v43  ;;  %v211_v28 = vperm.slane %v673_v3, 2  ;;  %v273_v29 = vsel %vm241_vm1, %v209_v16, 0.0  ;;  %v314_v32 = vperm.slane %v667_v58, 4 }
  0x2d   : > { %v362_v18 = vadd.f32 %v361_v9, %v360_v12  ;;  %v369_v33 = vsel %vm241_vm1, %v312_v21, 0.0  ;;  %v212_v34 = vperm.slane %v673_v3, 3  ;;  %v275_v35 = vsel %vm241_vm1, %v210_v20, 0.0 }
  0x2e   : > { %v260_v57 = vadd.f32 %v259_v48, %v258_v50  ;;  %v315_v38 = vperm.slane %v667_v58, 5  ;;  %v371_v39 = vsel %vm241_vm1, %v313_v26, 0.0  ;;  %v213_v40 = vperm.slane %v673_v3, 4 }
  0x2f   : > { %v364_v24 = vadd.f32 %v363_v15, %v362_v18  ;;  %v277_v41 = vsel %vm241_vm1, %v211_v28, 0.0  ;;  %v298_v44 = vmul.f32 %v185_v53, %v185_v53  ;;  %v316_v45 = vperm.slane %v667_v58, 6 }
  0x30   : > { %v262_v0 = vadd.f32 %v261_v55, %v260_v57  ;;  %v373_v46 = vsel %vm241_vm1, %v314_v32, 0.0  ;;  %v214_v47 = vperm.slane %v673_v3, 5  ;;  %v279_v48 = vsel %vm241_vm1, %v212_v34, 0.0 }
  0x31   : > { %v366_v30 = vadd.f32 %v365_v22, %v364_v24  ;;  %v317_v51 = vperm.slane %v667_v58, 7  ;;  %v375_v52 = vsel %vm241_vm1, %v315_v38, 0.0  ;;  %v215_v54 = vperm.slane %v673_v3, 6 }
  0x32   : > { %v264_v7 = vadd.f32 %v263_v62, %v262_v0  ;;  %v281_v55 = vsel %vm241_vm1, %v213_v40, 0.0  ;;  %v318_v57 = vperm.slane %v298_v44, 0  ;;  %v377_v59 = vsel %vm241_vm1, %v316_v45, 0.0 }
  0x33   : > { %v368_v36 = vadd.f32 %v367_v27, %v366_v30  ;;  %v216_v60 = vperm.slane %v673_v3, 7  ;;  %v283_v61 = vsel %vm241_vm1, %v214_v47, 0.0  ;;  %v319_v0 = vperm.slane %v298_v44, 1  ;;  %v186_v30 = vld [vmem:[#allocation2] sm:$0x1] }
  0x34   : > { %v266_v13 = vadd.f32 %v265_v5, %v264_v7  ;;  %v379_v58 = vsel %vm241_vm1, %v317_v51, 0.0  ;;  %v285_v1 = vsel %vm241_vm1, %v215_v54, 0.0  ;;  %v320_v5 = vperm.slane %v298_v44, 2 }
  0x35   : > { %v370_v42 = vadd.f32 %v369_v33, %v368_v36  ;;  %v381_v6 = vsel %vm241_vm1, %v318_v57, 0.0  ;;  %v287_v7 = vsel %vm241_vm1, %v216_v60, 0.0  ;;  %v321_v10 = vperm.slane %v298_v44, 3  ;;  %v295_v33 = vld [vmem:[#allocation4] sm:$0x1] }
  0x36   : > { %v268_v19 = vadd.f32 %v267_v11, %v266_v13  ;;  %v383_v3 = vsel %vm241_vm1, %v319_v0, 0.0  ;;  %v322_v13 = vperm.slane %v298_v44, 4  ;;  %v385_v14 = vsel %vm241_vm1, %v320_v5, 0.0 }
  0x37   : > { %v372_v49 = vadd.f32 %v371_v39, %v370_v42  ;;  %v323_v16 = vperm.slane %v298_v44, 5  ;;  %v325_v20 = vperm.slane %v298_v44, 7 }
  0x38   : > { %v270_v25 = vadd.f32 %v269_v17, %v268_v19  ;;  %v387_v17 = vsel %vm241_vm1, %v321_v10, 0.0  ;;  %v324_v19 = vperm.slane %v298_v44, 6  ;;  %v389_v21 = vsel %vm241_vm1, %v322_v13, 0.0 }
  0x39   : > { %v374_v56 = vadd.f32 %v373_v46, %v372_v49  ;;  %v395_v27 = vsel %vm241_vm1, %v325_v20, 0.0 }
  0x3a   : > { %v272_v31 = vadd.f32 %v271_v23, %v270_v25  ;;  %v391_v23 = vsel %vm241_vm1, %v323_v16, 0.0  ;;  %v393_v25 = vsel %vm241_vm1, %v324_v19, 0.0 }
  0x3b   : > { %v376_v62 = vadd.f32 %v375_v52, %v374_v56 }
  0x3c   : > { %v274_v37 = vadd.f32 %v273_v29, %v272_v31 }
  0x3d   : > { %v378_v2 = vadd.f32 %v377_v59, %v376_v62 }
  0x3e   : > { %v276_v43 = vadd.f32 %v275_v35, %v274_v37 }
  0x3f   : > { %v380_v8 = vadd.f32 %v379_v58, %v378_v2 }
  0x40   : > { %v278_v50 = vadd.f32 %v277_v41, %v276_v43 }
  0x41   : > { %v382_v11 = vadd.f32 %v381_v6, %v380_v8 }
  0x42   : > { %v280_v53 = vadd.f32 %v279_v48, %v278_v50 }
  0x43   : > { %v384_v15 = vadd.f32 %v383_v3, %v382_v11 }
  0x44   : > { %v282_v63 = vadd.f32 %v281_v55, %v280_v53 }
  0x45   : > { %v386_v18 = vadd.f32 %v385_v14, %v384_v15 }
  0x46   : > { %v284_v4 = vadd.f32 %v283_v61, %v282_v63 }
  0x47   : > { %v388_v22 = vadd.f32 %v387_v17, %v386_v18 }
  0x48   : > { %v286_v9 = vadd.f32 %v285_v1, %v284_v4 }
  0x49   : > { %v390_v24 = vadd.f32 %v389_v21, %v388_v22 }
  0x4a   : > { %v288_v12 = vadd.f32 %v287_v7, %v286_v9 }
  0x4b   : > { %v392_v26 = vadd.f32 %v391_v23, %v390_v24 }
  0x4c   : > { %289 = vadd.xlane.f32.xlu0 %v288_v12 }
  0x4d   : > { %v394_v28 = vadd.f32 %v393_v25, %v392_v26 }
  0x4f   : > { %v396_v29 = vadd.f32 %v395_v27, %v394_v28 }
  0x54   : > { %397 = vadd.xlane.f32.xlu0 %v396_v29 }
  0xbf   : > { %v290_v31 = vpop.xlane.xlu0 %289 }
  0xc0   : > { %v292_v32 = vadd.f32 %v290_v31, %v186_v30 }
  0xc2   : > { %294 = vst.msk [vmem:[#allocation2] sm:$0x1] %vm293_vm2, %v292_v32 }
  0xc3   : > { %499 = dma.vmem_to_hbm [thread:$0]  (%p506_p5), %s409_s23, 16, %s411_s26, [#allocation3]  }
  0xc7   : > { %v398_v34 = vpop.xlane.xlu0 %397 }
  0xc8   : > { %v400_v35 = vadd.f32 %v398_v34, %v295_v33 }
  0xca   : > { %401 = vst.msk [vmem:[#allocation4] sm:$0x1] %vm293_vm2, %v400_v35 }
  0xcb   : > { %501 = dma.vmem_to_hbm [thread:$0]  (%p506_p5), %s421_s28, 16, %s423_s4, [#allocation5]  }
  0xcc   : > { %582 = dma.done.wait (%p506_p5), [#allocation3], 16  }
  0xcd   : > { %584 = vsyncadd (%p506_p5), [#allocation3], 4294967280 }
  0xce   : > { %586 = dma.done.wait (%p506_p5), [#allocation5], 16  }
  0xcf   : > { %588 = vsyncadd (%p506_p5), [#allocation5], 4294967280 }
  0xd0 PF: > { %s16_s12 = sadd.s32 1, %s591_s12  }
  0xd1   : > { %p13_p6 = scmp.ge.s32.totalorder %s16_s12, 4  }
  0xd3   :  { %15 = sbr.rel (!%p13_p6) target bundleno = 2 (0x2), region = 70 }
  0xd8   :  { %441 = vsyncpa [#allocation3], 1 }
  0xd9   :  { %443 = vsyncpa [#allocation3 + $0x1], 1 }
  0xda   :  { %444 = vsyncpa [#allocation5], 1 }

// kernel: _forward_impl.6
= control target key start
LH: loop header
LB: loop body
LE: loop exit
PB: predicated region body
PF: predicated region fallthrough
CT: control target
= control target key end

     0   :  { %s1951_s29 = smov 0   ;;  %s1953_s30 = smov 0   ;;  %s2365_s0 = inlined_call_operand.vmem [shape: f32[4,17,32], index: 0, kind: input, shape index: {}]   ;;  %s2366_s1 = inlined_call_operand.vmem [shape: f32[12,1,32], index: 1, kind: input, shape index: {}, may-alias: {1,7}]   ;;  %s2367_s2 = inlined_call_operand.vmem [shape: f32[12,1,32], index: 2, kind: input, shape index: {}, may-alias: {2,6,8,12}]   ;;  %s2368_s3 = inlined_call_operand.vmem [shape: bf16[12,32,96], index: 3, kind: input, shape index: {}]   ;;  %s2369_s4 = inlined_call_operand.vmem [shape: f32[12,1,96], index: 4, kind: input, shape index: {}]   ;;  %s2370_s5 = inlined_call_operand.vmem [shape: bf16[12,32,32], index: 5, kind: input, shape index: {}]   ;;  %s2371_s6 = inlined_call_operand.vmem [shape: f32[12,1,32], index: 6, kind: input, shape index: {}, may-alias: {2,6,8,12}]   ;;  %s2372_s7 = inlined_call_operand.vmem [shape: f32[12,1,32], index: 7, kind: input, shape index: {}, may-alias: {1,7}]   ;;  %s2373_s8 = inlined_call_operand.vmem [shape: f32[12,1,32], index: 8, kind: input, shape index: {}, may-alias: {2,6,8,12}]   ;;  %s2374_s9 = inlined_call_operand.vmem [shape: bf16[12,32,128], index: 9, kind: input, shape index: {}]   ;;  %s2375_s10 = inlined_call_operand.vmem [shape: f32[12,1,128], index: 10, kind: input, shape index: {}]   ;;  %s2376_s11 = inlined_call_operand.vmem [shape: bf16[12,128,32], index: 11, kind: input, shape index: {}]   ;;  %s2377_s12 = inlined_call_operand.vmem [shape: f32[12,1,32], index: 12, kind: input, shape index: {}, may-alias: {2,6,8,12}]   ;;  %s2378_s13 = inlined_call_operand.vmem [shape: f32[4,17,32], index: 13, kind: output, shape index: {0}]   ;;  %s2379_s14 = inlined_call_operand.vmem [shape: f32[4,17,32], index: 14, kind: output, shape index: {1}]  }
   0x1   :  { %2384 = sst [smem:[#allocation9_spill]] %s2365_s0  ;;  %s1955_s15 = smov 0  }
   0x2   :  { %2385 = sst [smem:[#allocation10_spill]] %s2367_s2  ;;  %s1957_s16 = smov 0  }
   0x3   :  { %2386 = sst [smem:[#allocation11_spill]] %s2368_s3  ;;  %s1959_s17 = smov 0  }
   0x4   :  { %2387 = sst [smem:[#allocation12_spill]] %s2370_s5 }
   0x5   :  { %2388 = sst [smem:[#allocation13_spill]] %s2374_s9 }
   0x6   :  { %2389 = sst [smem:[#allocation14_spill]] %s2378_s13 }
   0x7   :  { %2390 = sst [smem:[#allocation15_spill]] %s2379_s14 }
   0x8 LB: > { %2391 = sst [smem:[#allocation3_spill]] %s1849_s29  ;;  %s34_s18 = sadd.s32 1, %s1857_s15  ;;  %s1865_s17 = sphi %s1959_s17, %s25_s17   ;;  %s1861_s16 = sphi %s1957_s16, %s2417_s16   ;;  %s1857_s15 = sphi %s1955_s15, %s2416_s15   ;;  %s1853_s30 = sphi %s1953_s30, %s2415_s30   ;;  %s1849_s29 = sphi %s1951_s29, %s2414_s29  }
   0x9   : > { %2392 = sst [smem:[#allocation4_spill]] %s1857_s15  ;;  %s37_s19 = sadd.s32 1, %s1861_s16 }
   0xa   : > { %2393 = sst [smem:[#allocation5_spill]] %s1861_s16  ;;  %p35_p0 = scmp.ge.s32.totalorder %s34_s18, 12 }
   0xb   : > { %2394 = sst [smem:[#allocation6_spill]] %s1865_s17  ;;  %p1626_p1 = scmp.ge.s32.totalorder %s1865_s17, 1 }
   0xc   : > { %p531_p2 = scmp.lt.s32.totalorder %s1865_s17, 49  ;;  %s2419_s18 = smov (%p35_p0, %s34_s18), 0 }
   0xd   : > { %2395 = sst [smem:[#allocation7_spill]] %s2419_s18  ;;  %s2421_s19 = smov (!%p35_p0, %s37_s19), %s1861_s16 }
   0xe   : > { %p532_p3 = pnand %p1626_p1, %p531_p2  ;;  %p39_p4 = scmp.ge.s32.totalorder %s2421_s19, 4 }
   0xf   : > { %p626_p5 = scmp.lt.s32.totalorder (!%p532_p3), %s1853_s30, 3  ;;  %p631_p6 = scmp.lt.s32.totalorder (!%p532_p3), %s1849_s29, 11 }
  0x10   : > { %s2423_s19 = smov (%p39_p4, %s2421_s19), 0  ;;  %535 = sbr.rel (%p532_p3) target bundleno = 2175 (0x87f), region = 72 }
  0x11   : > { %2396 = sst [smem:[#allocation8_spill]] %s2423_s19 }
  0x12   : > { %s2398_s0 = sld [smem:[#allocation9_spill]] (!%p532_p3) }
  0x13   : > { %s2399_s3 = sld [smem:[#allocation11_spill]] (!%p532_p3) }
  0x14   : > { %s2400_s5 = sld [smem:[#allocation12_spill]] (!%p532_p3) }
  0x15   : > { %s2425_s30 = smov (!%p626_p5, %s1853_s30), 3  ;;  %s2401_s9 = sld [smem:[#allocation13_spill]] }
  0x16   : > { %s1985_s20 = scalar_select %p631_p6, %s1849_s29, 11 }
  0x17   : > { %s1730_s21 = smul.u32 24, %s2425_s30  ;;  %s2404_s23 = sld [smem:[#allocation3_spill]] }
  0x18   : > { %s1712_s16 = sshll.u32 %s1985_s20, 4  ;;  %s666_s13 = scalar_lea.vmem %s2375_s10, %s1985_s20 }
  0x19   : > { %s630_s18 = scalar_lea.vmem %s2398_s0, %s1730_s21  ;;  %s2002_s29 = scalar_lea.vmem %s2399_s3, %s1712_s16 }
  0x1a   : > { %s2011_s24 = scalar_lea.vmem %s2400_s5, %s1712_s16  ;;  %s1715_s5 = sshll.u32 %s1985_s20, 6 }
  0x1b   : > { %s2028_s30 = scalar_lea.vmem %s2401_s9, %s1712_s16  ;;  %s674_s19 = scalar_lea.vmem %s2377_s12, %s1985_s20 }
  0x1c   : > { %s2042_s0 = scalar_lea.vmem %s2376_s11, %s1715_s5  ;;  %s2402_s3 = sld [smem:[#allocation14_spill]] }
  0x1d   : > { %s2403_s9 = sld [smem:[#allocation15_spill]]  ;;  %p1638_p7 = scmp.ne.s32.totalorder %s2404_s23, 0 }
  0x1f   : > { %689 = sbr.rel (%p1638_p7) target bundleno = 40 (0x28), region = 76 }
  0x22   : > { %s2047_s2 = scalar_lea.vmem %s2402_s3, %s1730_s21 }
  0x23   : > { %s2052_s22 = scalar_lea.vmem %s2403_s9, %s1730_s21 }
  0x24   : > { %v690_v0 = vld [vmem:[%s630_s18] sm:$0xff]  ;;  %vm693_vm0 = vcmask 261120   ;;  %v691_v1 = vld [vmem:[%s630_s18 + $0x8] sm:$0xff]  ;;  %v692_v2 = vld [vmem:[%s630_s18 + $0x10] sm:$0x1]  ;;  %vm696_vm1 = vcmask 253952  }
  0x25   : > { %694 = vst.msk [vmem:[%s2047_s2] sm:$0xff] %vm693_vm0, %v690_v0 }
  0x26   : > { %695 = vst.msk [vmem:[%s2047_s2 + $0x8] sm:$0xff] %vm693_vm0, %v691_v1 }
  0x27   : > { %697 = vst.msk [vmem:[%s2047_s2 + $0x10] sm:$0x1] %vm696_vm1, %v692_v2 }
  0x28 PF: > { %vm737_vm2 = vcmask 261120   ;;  %vm744_vm3 = vcmask 253952   ;;  %v1867_v9 = vmov 32.0   ;;  %v1717_v31 = vld [vmem:[%s2002_s29 + $0x8] sm:$0xff]  ;;  %v1716_v34 = vld [vmem:[%s2002_s29] sm:$0xff]  ;;  %s2405_s9 = scalar_lea.vmem %s2371_s6, %s1985_s20  ;;  %s2406_s21 = scalar_lea.vmem %s2372_s7, %s1985_s20 }
  0x29   : > { %1783 = vrcp.f32 %v1867_v9  ;;  %853 = vmatpush.bf16.msra.mxu0 %v1717_v31  ;;  %v2100_v36 = vld [vmem:[%s2011_s24] sm:$0xf]  ;;  %v2103_v37 = vld [vmem:[%s2011_s24] sm:$0xf0]  ;;  %v2106_v38 = vld [vmem:[%s2011_s24 + $0x8] sm:$0xf]  ;;  %s2408_s15 = scalar_lea.vmem %s2366_s1, %s1985_s20 }
  0x2a   : > { %v2109_v39 = vld [vmem:[%s2011_s24 + $0x8] sm:$0xf0]  ;;  %v2116_v40 = vld [vmem:[%s2405_s9] sm:$0x1]  ;;  %s2407_s24 = scalar_lea.vmem %s2373_s8, %s1985_s20  ;;  %v2136_v45 = vld [vmem:[%s2028_s30] sm:$0xf0]  ;;  %s2411_s9 = scalar_lea.vmem %s2369_s4, %s1985_s20 }
  0x2b   : > { %v2123_v41 = vld [vmem:[%s2406_s21] sm:$0x1]  ;;  %v2140_v47 = vld [vmem:[%s2028_s30 + $0x8] sm:$0xf]  ;;  %v2143_v48 = vld [vmem:[%s2028_s30 + $0x8] sm:$0xf0] }
  0x2c   : > { %v2059_v3 = vld [vmem:[%s2047_s2] sm:$0xff]  ;;  %v2159_v52 = vld [vmem:[%s2042_s0 + $0x8] sm:$0xf]  ;;  %v2162_v55 = vld [vmem:[%s2042_s0 + $0x8] sm:$0xf0]  ;;  %s2409_s14 = sld [smem:[#allocation10_spill]] }
  0x2d   : > { %v738_v5 = vsel %vm737_vm2, %v2059_v3, 0.0  ;;  %v2069_v7 = vld [vmem:[%s2047_s2 + $0x8] sm:$0xff]  ;;  %854 = vmatpush.bf16.msra.mxu0 %v1716_v34  ;;  %v2130_v43 = vld [vmem:[%s2407_s24] sm:$0x1]  ;;  %v2156_v51 = vld [vmem:[%s2042_s0] sm:$0xf0] }
  0x2e   : > { %v2062_v4 = vld [vmem:[%s2047_s2 + $0x10] sm:$0x1]  ;;  %739 = vadd.xlane.f32.xlu0 %v738_v5  ;;  %v741_v8 = vsel %vm737_vm2, %v2069_v7, 0.0  ;;  %v2133_v44 = vld [vmem:[%s2028_s30] sm:$0xf]  ;;  %s2412_s29 = sld [smem:[#allocation3_spill]] }
  0x2f   : > { %v745_v6 = vsel %vm744_vm3, %v2062_v4, 0.0  ;;  %v1784_v10 = vpop.eup %1783  ;;  %v2150_v49 = vld [vmem:[%s666_s13] sm:$0x1]  ;;  %v2165_v56 = vld [vmem:[%s2042_s0 + $0x10] sm:$0xf] }
  0x30   : > { %746 = vadd.xlane.f32.xlu1 %v745_v6  ;;  %v749_v11 = vmul.f32 32.0, %v1784_v10  ;;  %vm753_vm4 = vweird.f32 %v1784_v10  ;;  %v2153_v50 = vld [vmem:[%s2042_s0] sm:$0xf]  ;;  %v2168_v58 = vld [vmem:[%s2042_s0 + $0x10] sm:$0xf0] }
  0x31   : > { %v2171_v59 = vld [vmem:[%s2042_s0 + $0x18] sm:$0xf]  ;;  %v2174_v60 = vld [vmem:[%s2042_s0 + $0x18] sm:$0xf0]  ;;  %v2177_v61 = vld [vmem:[%s2042_s0 + $0x20] sm:$0xf] }
  0x32   : > { %v750_v12 = vsub.f32 1.0, %v749_v11  ;;  %v2180_v62 = vld [vmem:[%s2042_s0 + $0x20] sm:$0xf0]  ;;  %v2183_v0 = vld [vmem:[%s2042_s0 + $0x28] sm:$0xf]  ;;  %s2410_s23 = scalar_lea.vmem %s2409_s14, %s1985_s20 }
  0x33   : > { %v2186_v1 = vld [vmem:[%s2042_s0 + $0x28] sm:$0xf0]  ;;  %v2189_v2 = vld [vmem:[%s2042_s0 + $0x30] sm:$0xf]  ;;  %v2192_v5 = vld [vmem:[%s2042_s0 + $0x30] sm:$0xf0] }
  0x34   : > { %v751_v13 = vmul.f32 %v1784_v10, %v750_v12  ;;  %v2195_v6 = vld [vmem:[%s2042_s0 + $0x38] sm:$0xf]  ;;  %v2205_v11 = vld [vmem:[%s674_s19] sm:$0x1]  ;;  %p1649_p8 = scmp.ne.s32.totalorder %s2412_s29, 11 }
  0x35   : > { %s1868_s18 = smov (!%p1649_p8), 96  }
  0x36   : > { %742 = vadd.xlane.f32.xlu0 %v741_v8  ;;  %v752_v14 = vadd.f32 %v1784_v10, %v751_v13  ;;  %v2198_v8 = vld [vmem:[%s2042_s0 + $0x38] sm:$0xf0] }
  0x38   : > { %v2073_v15 = vsel %vm753_vm4, %v1784_v10, %v752_v14 }
  0xa1   : > { %v740_v16 = vpop.xlane.xlu0 %739 }
  0xa2   : > { %v755_v17 = vmul.f32 %v2073_v15, %v740_v16 }
  0xa3   : > { %v747_v20 = vpop.xlane.xlu1 %746 }
  0xa4   : > { %v2077_v18 = vsub.f32 %v2059_v3, %v755_v17  ;;  %v757_v24 = vmul.f32 %v2073_v15, %v747_v20 }
  0xa6   : > { %v761_v19 = vmul.f32 %v2077_v18, %v2077_v18  ;;  %v2088_v26 = vsub.f32 %v2062_v4, %v757_v24 }
  0xa8   : > { %v764_v21 = vsel %vm737_vm2, %v761_v19, 0.0  ;;  %v763_v29 = vmul.f32 %v2088_v26, %v2088_v26 }
  0xa9   : > { %765 = vadd.xlane.f32.xlu1 %v764_v21  ;;  %v743_v22 = vpop.xlane.xlu0 %742 }
  0xaa   : > { %v756_v23 = vmul.f32 %v2073_v15, %v743_v22  ;;  %v770_v30 = vsel %vm744_vm3, %v763_v29, 0.0 }
  0xac   : > { %v2085_v25 = vsub.f32 %v2069_v7, %v756_v23 }
  0xae   : > { %v762_v27 = vmul.f32 %v2085_v25, %v2085_v25 }
  0xb0   : > { %v767_v28 = vsel %vm737_vm2, %v762_v27, 0.0 }
  0xb1   : > { %768 = vadd.xlane.f32.xlu2 %v767_v28  ;;  %v1780_v28 = vld [vmem:[%s2408_s15] ss:$0 sm:$0xff] }
  0xb9   : > { %771 = vadd.xlane.f32.xlu2 %v770_v30 }
 0x11c   : > { %v766_v32 = vpop.xlane.xlu1 %765 }
 0x11d   : > { %v773_v33 = vmul.f32 %v766_v32, %v2073_v15 }
 0x11f   : > { %v776_v35 = vadd.f32 1e-06, %v773_v33 }
 0x121   : > { %1785 = vrsqrt.f32 %v776_v35  ;;  %vm785_vm6 = vweird.f32 %v776_v35 }
 0x124   : > { %v769_v42 = vpop.xlane.xlu2 %768 }
 0x125   : > { %v774_v46 = vmul.f32 %v769_v42, %v2073_v15 }
 0x127   : > { %v1786_v53 = vpop.eup %1785  ;;  %v777_v54 = vadd.f32 1e-06, %v774_v46 }
 0x128   : > { %v780_v57 = vmul.f32 %v1786_v53, %v776_v35  ;;  %vm786_vm5 = vweird.f32 %v1786_v53  ;;  %v1781_v35 = vld [vmem:[%s2410_s23] ss:$0 sm:$0xff] }
 0x129   : > { %1787 = vrsqrt.f32 %v777_v54  ;;  %vm787_vm7 = vmor %vm785_vm6, %vm786_vm5  ;;  %vm795_vm9 = vweird.f32 %v777_v54 }
 0x12a   : > { %v781_v63 = vmul.f32 %v1786_v53, %v780_v57 }
 0x12c   : > { %v782_v9 = vmul.f32 0.5, %v781_v63  ;;  %v772_v10 = vpop.xlane.xlu2 %771 }
 0x12d   : > { %v775_v12 = vmul.f32 %v772_v10, %v2073_v15 }
 0x12e   : > { %v783_v13 = vsub.f32 1.5, %v782_v9 }
 0x12f   : > { %v1788_v14 = vpop.eup %1787  ;;  %v778_v16 = vadd.f32 1e-06, %v775_v12 }
 0x130   : > { %v784_v17 = vmul.f32 %v1786_v53, %v783_v13  ;;  %v790_v19 = vmul.f32 %v1788_v14, %v777_v54  ;;  %vm796_vm8 = vweird.f32 %v1788_v14 }
 0x131   : > { %1789 = vrsqrt.f32 %v778_v16  ;;  %vm797_vm10 = vmor %vm795_vm9, %vm796_vm8  ;;  %vm805_vm11 = vweird.f32 %v778_v16 }
 0x132   : > { %v791_v20 = vmul.f32 %v1788_v14, %v790_v19  ;;  %v788_v21 = vsel %vm787_vm7, %v1786_v53, %v784_v17 }
 0x133   : > { %v809_v27 = vmul.f32 %v788_v21, %v2077_v18 }
 0x134   : > { %v792_v22 = vmul.f32 0.5, %v791_v20 }
 0x135   : > { %v815_v34 = vmul.f32 %v1780_v28, %v809_v27 }
 0x136   : > { %v793_v23 = vsub.f32 1.5, %v792_v22 }
 0x137   : > { %v1790_v24 = vpop.eup %1789  ;;  %v821_v53 = vadd.f32 %v1781_v35, %v815_v34 }
 0x138   : > { %v794_v29 = vmul.f32 %v1788_v14, %v793_v23  ;;  %v800_v30 = vmul.f32 %v1790_v24, %v778_v16  ;;  %vm806_vm12 = vweird.f32 %v1790_v24 }
 0x139   : > { %vm807_vm13 = vmor %vm805_vm11, %vm806_vm12 }
 0x13a   : > { %v798_v31 = vsel %vm797_vm10, %v1788_v14, %v794_v29  ;;  %v801_v32 = vmul.f32 %v1790_v24, %v800_v30  ;;  %v1782_v14 = vld [vmem:[%s2411_s9] ss:$0 sm:$0xff] }
 0x13b   : > { %v810_v33 = vmul.f32 %v798_v31, %v2085_v25 }
 0x13c   : > { %v802_v18 = vmul.f32 0.5, %v801_v32 }
 0x13d   : > { %v816_v42 = vmul.f32 %v1780_v28, %v810_v33 }
 0x13e   : > { %v803_v46 = vsub.f32 1.5, %v802_v18 }
 0x13f   : > { %v822_v54 = vadd.f32 %v1781_v35, %v816_v42 }
 0x140   : > { %v804_v57 = vmul.f32 %v1790_v24, %v803_v46 }
 0x141   : > { %v824_v63 = vpack.c.bf16 %v822_v54, %v821_v53 }
 0x142   : > { %v808_v9 = vsel %vm807_vm13, %v1790_v24, %v804_v57 }
 0x143   : > { %1647 = vmatmul.msk.bf16.vlgmr.msra.gmra.mxu0 %vm737_vm2, %v824_v63  ;;  %v811_v25 = vmul.f32 %v808_v9, %v2088_v26 }
 0x145   : > { %v817_v10 = vmul.f32 %v1780_v28, %v811_v25 }
 0x147   : > { %v823_v12 = vadd.f32 %v1781_v35, %v817_v10 }
 0x149   : > { %v825_v13 = vpack.c.bf16 %v823_v12, %v823_v12 }
 0x153   : > { %1648 = vmatmul.msk.bf16.gmra.mxu0 %vm737_vm2, %v825_v13 }
 0x1c0   : > { %v856_v16 = vpop.f32.mrf.mxu0 }
 0x1c1   : > { %v857_v17 = vadd.f32 %v1782_v14, %v856_v16 }
 0x1c8   : > { %v858_v19 = vpop.f32.mrf.mxu0 }
 0x1c9   : > { %v859_v20 = vadd.f32 %v1782_v14, %v858_v19 }
 0x1d0   : > { %v861_v21 = vpop.f32.mrf.mxu0 }
 0x1d1   : > { %v862_v22 = vadd.f32 %v1782_v14, %v861_v21 }
 0x1d4   : > { %868 = sbr.rel (%p1649_p8) target bundleno = 597 (0x255), region = 80 }
 0x1d8   : > { %v863_v23 = vpop.f32.mrf.mxu0 }
 0x1d9   : > { %872 = vrot.lane.b32.xlu0 %v857_v17, %s1868_s18  ;;  %876 = vrot.lane.b32.xlu1 %v862_v22, %s1868_s18 }
 0x1e1   : > { %874 = vrot.lane.b32.xlu0 %v859_v20, %s1868_s18 }
 0x24b   : > { %v873_v26 = vpop.permute.xlu0 %872  ;;  %v877_v24 = vpop.permute.xlu1 %876 }
 0x24c   : > { %881 = vst.msk [vmem:[%s2052_s22] sm:$0xff] %vm737_vm2, %v873_v26 }
 0x24d   : > { %883 = vst.msk [vmem:[%s2052_s22 + $0x10] sm:$0x1] %vm744_vm3, %v877_v24 }
 0x253   : > { %v875_v27 = vpop.permute.xlu0 %874 }
 0x254   : > { %882 = vst.msk [vmem:[%s2052_s22 + $0x8] sm:$0xff] %vm737_vm2, %v875_v27 }
 0x255 PF: > { %v2235_v28 = vpack.c.bf16 %v862_v22, %v862_v22  ;;  %v2237_v29 = vpack.c.bf16 %v859_v20, %v857_v17  ;;  %s1869_s20 = smov 80   ;;  %s1870_s21 = smov 112   ;;  %vm892_vm14 = vcmask 130048   ;;  %vm926_vm15 = vcmask 138240  }
 0x256   : > { %s1871_s25 = smov 96   ;;  %vm933_vm0 = vcmask 131072   ;;  %s1872_s22 = smov 48   ;;  %vm974_vm1 = vcmask 1040384   ;;  %vm1000_vm4 = vcmask 122880   ;;  %vm1122_vm5 = vcmask 261248  }
 0x257   : > { %1008 = vrot.lane.b32.xlu0 %v2235_v28, %s1869_s20  ;;  %1002 = vrot.lane.b32.xlu1 %v2237_v29, %s1870_s21  ;;  %s1873_s26 = smov 64   ;;  %s1875_s24 = smov 16   ;;  %vm1125_vm6 = vcmask 254080  }
 0x258   : > { %888 = vrot.lane.b32.xlu2 %v2237_v29, %s1871_s25 }
 0x25f   : > { %890 = vrot.lane.b32.xlu1 %v2235_v28, %s1871_s25  ;;  %1006 = vrot.lane.b32.xlu0 %v2237_v29, %s1869_s20 }
 0x260   : > { %1004 = vrot.lane.b32.xlu2 %v2235_v28, %s1870_s21 }
 0x2b2   : > { %v889_v42 = vpop.permute.xlu2 %888 }
 0x2b3   : > { %v900_v46 = vsel %vm892_vm14, %v889_v42, 0 }
 0x2ba   : > { %v1005_v53 = vpop.permute.xlu2 %1004 }
 0x2c9   : > { %v1009_v30 = vpop.permute.xlu0 %1008  ;;  %v1003_v31 = vpop.permute.xlu1 %1002 }
 0x2ca   : > { %v1020_v32 = vsel %vm892_vm14, %v1009_v30, 0 }
 0x2cb   : > { %1028 = vmatpush.bf16.xpose.msra.mxu3 %v1020_v32 }
 0x2d1   : > { %v891_v33 = vpop.permute.xlu1 %890  ;;  %v1007_v34 = vpop.permute.xlu0 %1006 }
 0x2d2   : > { %v903_v35 = vsel %vm892_vm14, %v891_v33, 0  ;;  %v1017_v18 = vsel %vm892_vm14, %v1007_v34, 0 }
 0x2d3   : > { %911 = vmatpush.bf16.xpose.msra.mxu1 %v903_v35  ;;  %1029 = vmatpush.bf16.xpose.msra.mxu3 %v1017_v18 }
 0x2da   : > { %1654 = vmatmul.msk.bf16.vlgmr.msra.gmra.mxu3 %vm892_vm14, %v1003_v31 }
 0x2db   : > { %912 = vmatpush.bf16.xpose.msra.mxu1 %v900_v46 }
 0x2e2   : > { %1650 = vmatmul.msk.bf16.vlgmr.msra.gmra.mxu1 %vm892_vm14, %v2237_v29 }
 0x2ea   : > { %1655 = vmatmul.msk.bf16.gmra.mxu3 %vm892_vm14, %v1005_v53 }
 0x2f2   : > { %1651 = vmatmul.msk.bf16.gmra.mxu1 %vm892_vm14, %v2235_v28 }
 0x35d   : > { %v1031_v54 = vpop.f32.mrf.mxu3 }
 0x35e   : > { %v1040_v57 = vmul.f32 0.25, %v1031_v54 }
 0x35f   : > { %v914_v63 = vpop.f32.mrf.mxu1 }
 0x360   : > { %v923_v9 = vmul.f32 0.25, %v914_v63  ;;  %v1043_v25 = vsel %vm926_vm15, %v1040_v57, -inf }
 0x361   : > { %1044 = vmax.xlane.f32.xlu0 %v1043_v25 }
 0x362   : > { %v927_v10 = vsel %vm926_vm15, %v923_v9, -inf }
 0x363   : > { %928 = vmax.xlane.f32.xlu2 %v927_v10 }
 0x365   : > { %v1033_v12 = vpop.f32.mrf.mxu3 }
 0x366   : > { %v1041_v13 = vmul.f32 0.25, %v1033_v12 }
 0x367   : > { %v916_v14 = vpop.f32.mrf.mxu1 }
 0x368   : > { %v924_v16 = vmul.f32 0.25, %v916_v14  ;;  %v1046_v17 = vsel %vm926_vm15, %v1041_v13, -inf }
 0x369   : > { %1047 = vmax.xlane.f32.xlu1 %v1046_v17 }
 0x36a   : > { %v930_v19 = vsel %vm926_vm15, %v924_v16, -inf }
 0x36b   : > { %931 = vmax.xlane.f32.xlu2 %v930_v19 }
 0x36d   : > { %v1036_v20 = vpop.f32.mrf.mxu3 }
 0x36e   : > { %v1042_v21 = vmul.f32 0.25, %v1036_v20 }
 0x36f   : > { %v919_v22 = vpop.f32.mrf.mxu1 }
 0x370   : > { %v925_v23 = vmul.f32 0.25, %v919_v22  ;;  %v1049_v26 = vsel %vm933_vm0, %v1042_v21, -inf }
 0x371   : > { %1050 = vmax.xlane.f32.xlu0 %v1049_v26 }
 0x372   : > { %v934_v24 = vsel %vm933_vm0, %v925_v23, -inf }
 0x373   : > { %935 = vmax.xlane.f32.xlu2 %v934_v24 }
 0x375   : > { %v1038_v27 = vpop.f32.mrf.mxu3 }
 0x377   : > { %v921_v30 = vpop.f32.mrf.mxu1 }
 0x378   : > { %v1874_v30 = vmov 0  }
 0x385   : > { %1080 = vrot.lane.b32.xlu0 %v2235_v28, %s1872_s22 }
 0x3d4   : > { %v1045_v31 = vpop.xlane.xlu0 %1044 }
 0x3d5   : > { %v1052_v32 = vsub.f32 %v1040_v57, %v1045_v31  ;;  %v976_v31 = vsel %vm974_vm1, 65535, %v1874_v30 }
 0x3d6   : > { %v929_v33 = vpop.xlane.xlu2 %928 }
 0x3d7   : > { %v1055_v34 = vmul.f32 1.442695, %v1052_v32  ;;  %v937_v35 = vsub.f32 %v923_v9, %v929_v33 }
 0x3d9   : > { %1791 = vpow2.f32 %v1055_v34  ;;  %v940_v18 = vmul.f32 1.442695, %v937_v35 }
 0x3db   : > { %1793 = vpow2.f32 %v940_v18 }
 0x3dc   : > { %v1048_v12 = vpop.xlane.xlu1 %1047 }
 0x3de   : > { %v932_v42 = vpop.xlane.xlu2 %931 }
 0x3df   : > { %v2262_v46 = vpop.eup %1791  ;;  %v938_v53 = vsub.f32 %v924_v16, %v932_v42  ;;  %v1053_v16 = vsub.f32 %v1041_v13, %v1048_v12 }
 0x3e0   : > { %v1061_v54 = vsel %vm926_vm15, %v2262_v46, 0.0 }
 0x3e1   : > { %v1794_v63 = vpop.eup %1793  ;;  %v942_v25 = vmul.f32 1.442695, %v938_v53  ;;  %1062 = vadd.xlane.f32.xlu1 %v1061_v54  ;;  %v1057_v19 = vmul.f32 1.442695, %v1053_v16 }
 0x3e2   : > { %v946_v10 = vsel %vm926_vm15, %v1794_v63, 0.0 }
 0x3e3   : > { %1795 = vpow2.f32 %v942_v25  ;;  %947 = vadd.xlane.f32.xlu2 %v946_v10 }
 0x3e4   : > { %v1051_v14 = vpop.xlane.xlu0 %1050  ;;  %1797 = vpow2.f32 %v1057_v19 }
 0x3e5   : > { %v1054_v17 = vsub.f32 %v1042_v21, %v1051_v14 }
 0x3e6   : > { %v936_v21 = vpop.xlane.xlu2 %935 }
 0x3e7   : > { %v1059_v20 = vmul.f32 1.442695, %v1054_v17  ;;  %v939_v32 = vsub.f32 %v925_v23, %v936_v21 }
 0x3e9   : > { %v1796_v57 = vpop.eup %1795  ;;  %1799 = vpow2.f32 %v1059_v20  ;;  %v944_v34 = vmul.f32 1.442695, %v939_v32 }
 0x3ea   : > { %v949_v9 = vsel %vm926_vm15, %v1796_v57, 0.0  ;;  %v1798_v22 = vpop.eup %1797 }
 0x3eb   : > { %950 = vadd.xlane.f32.xlu0 %v949_v9  ;;  %v1064_v24 = vsel %vm926_vm15, %v1798_v22, 0.0  ;;  %1801 = vpow2.f32 %v944_v34 }
 0x3ef   : > { %v1800_v26 = vpop.eup %1799 }
 0x3f0   : > { %v1067_v27 = vsel %vm933_vm0, %v1800_v26, 0.0 }
 0x3f1   : > { %v1802_v42 = vpop.eup %1801 }
 0x3f2   : > { %v952_v54 = vsel %vm933_vm0, %v1802_v42, 0.0 }
 0x3fa   : > { %1078 = vrot.lane.b32.xlu1 %v2237_v29, %s1872_s22 }
 0x3fb   : > { %965 = vrot.lane.b32.xlu2 %v2235_v28, %s1873_s26  ;;  %v1081_v28 = vpop.permute.xlu0 %1080 }
 0x3fc   : > { %v1090_v13 = vand.u32 %v1081_v28, %v976_v31 }
 0x3fe   : > { %1098 = vmatpush.bf16.msrb.mxu0 %v1090_v13 }
 0x424   : > { %1065 = vadd.xlane.f32.xlu2 %v1064_v24  ;;  %1068 = vadd.xlane.f32.xlu1 %v1067_v27 }
 0x43c   : > { %963 = vrot.lane.b32.xlu2 %v2237_v29, %s1873_s26 }
 0x454   : > { %v1063_v53 = vpop.xlane.xlu1 %1062 }
 0x456   : > { %v948_v33 = vpop.xlane.xlu2 %947 }
 0x45e   : > { %v966_v35 = vpop.permute.xlu2 %965  ;;  %v951_v25 = vpop.xlane.xlu0 %950 }
 0x45f   : > { %v978_v18 = vand.u32 %v976_v31, %v966_v35  ;;  %1803 = vrcp.f32 %v951_v25 }
 0x460   : > { %1805 = vrcp.f32 %v1063_v53 }
 0x461   : > { %986 = vmatpush.bf16.msra.mxu2 %v978_v18  ;;  %1807 = vrcp.f32 %v948_v33 }
 0x465   : > { %953 = vadd.xlane.f32.xlu2 %v952_v54  ;;  %v1804_v23 = vpop.eup %1803 }
 0x466   : > { %v1806_v9 = vpop.eup %1805  ;;  %v959_v14 = vmul.f32 %v1804_v23, %v1796_v57 }
 0x467   : > { %v1808_v12 = vpop.eup %1807  ;;  %v1073_v20 = vmul.f32 %v1806_v9, %v2262_v46 }
 0x468   : > { %v958_v19 = vmul.f32 %v1808_v12, %v1794_v63 }
 0x46a   : > { %v961_v28 = vpack.c.bf16 %v959_v14, %v958_v19 }
 0x46c   : > { %v1079_v29 = vpop.permute.xlu1 %1078 }
 0x46d   : > { %1099 = vmatpush.bf16.msrb.mxu0 %v1079_v29  ;;  %v1661_v29 = vor.u32 %v2103_v37, %v2100_v36  ;;  %v1172_v36 = vperm.slane %v2116_v40, 0 }
 0x497   : > { %v1066_v10 = vpop.xlane.xlu2 %1065  ;;  %v1069_v27 = vpop.xlane.xlu1 %1068 }
 0x498   : > { %1809 = vrcp.f32 %v1066_v10 }
 0x499   : > { %1811 = vrcp.f32 %v1069_v27 }
 0x49e   : > { %v1810_v16 = vpop.eup %1809 }
 0x49f   : > { %v964_v17 = vpop.permute.xlu2 %963  ;;  %v1074_v24 = vmul.f32 %v1810_v16, %v1798_v22  ;;  %v1812_v31 = vpop.eup %1811 }
 0x4a0   : > { %987 = vmatpush.bf16.msra.mxu2 %v964_v17  ;;  %v1075_v13 = vmul.f32 %v1812_v31, %v1800_v26 }
 0x4a1   : > { %v1076_v30 = vpack.c.bf16 %v1074_v24, %v1073_v20 }
 0x4a2   : > { %v1077_v21 = vpack.c.bf16 %v1075_v13, %v1075_v13 }
 0x4a3   : > { %1652 = vmatmul.msk.bf16.vlgmr.msra.gmra.mxu2 %vm926_vm15, %v961_v28  ;;  %1656 = vmatmul.msk.bf16.vlgmr.msrb.gmra.mxu0 %vm926_vm15, %v1076_v30 }
 0x4b3   : > { %1657 = vmatmul.msk.bf16.gmra.mxu0 %vm926_vm15, %v1077_v21 }
 0x4d8   : > { %v954_v57 = vpop.xlane.xlu2 %953 }
 0x4d9   : > { %1813 = vrcp.f32 %v954_v57 }
 0x4df   : > { %v1814_v63 = vpop.eup %1813 }
 0x4e0   : > { %v960_v32 = vmul.f32 %v1814_v63, %v1802_v42  ;;  %v1665_v42 = vor.u32 %v2109_v39, %v2106_v38 }
 0x4e2   : > { %v962_v46 = vpack.c.bf16 %v960_v32, %v960_v32  ;;  %1156 = vmatpush.bf16.msrb.mxu2 %v1665_v42 }
 0x4e4   : > { %1653 = vmatmul.msk.bf16.gmra.mxu2 %vm926_vm15, %v962_v46 }
 0x4e6   : > { %1157 = vmatpush.bf16.msrb.mxu2 %v1661_v29 }
 0x520   : > { %v1101_v22 = vpop.f32.mrf.mxu0 }
 0x521   : > { %1113 = vrot.lane.b32.xlu0 %v1101_v22, %s1875_s24 }
 0x526   : > { %v989_v33 = vpop.f32.mrf.mxu2 }
 0x527   : > { %998 = vst.msk [vmem:[#allocation2] sm:$0xff] %vm892_vm14, %v989_v33 }
 0x528   : > { %v1103_v34 = vpop.f32.mrf.mxu0 }
 0x529   : > { %1115 = vrot.lane.b32.xlu1 %v1103_v34, %s1875_s24 }
 0x52e   : > { %v991_v35 = vpop.f32.mrf.mxu2 }
 0x52f   : > { %999 = vst.msk [vmem:[#allocation2 + $0x8] sm:$0xff] %vm892_vm14, %v991_v35 }
 0x530   : > { %v1106_v26 = vpop.f32.mrf.mxu0 }
 0x531   : > { %1117 = vrot.lane.b32.xlu0 %v1106_v26, %s1875_s24 }
 0x538   : > { %v1108_v18 = vpop.f32.mrf.mxu0 }
 0x567   : > { %v994_v53 = vpop.f32.mrf.mxu2 }
 0x568   : > { %1001 = vst.msk [vmem:[#allocation2 + $0x10] sm:$0x1] %vm1000_vm4, %v994_v53 }
 0x56f   : > { %v996_v54 = vpop.f32.mrf.mxu2 }
 0x570   : > { %v1675_v54 = vor.u32 %v2143_v48, %v2140_v47 }
 0x572   : > { %1284 = vmatpush.bf16.msrb.mxu1 %v1675_v54 }
 0x593   : > { %v1114_v25 = vpop.permute.xlu0 %1113 }
 0x594   : > { %1123 = vst.msk [vmem:[#allocation2] sm:$0xff] %vm1122_vm5, %v1114_v25 }
 0x59b   : > { %v1116_v10 = vpop.permute.xlu1 %1115  ;;  %v1127_v9 = vld [vmem:[#allocation2] sm:$0xff] }
 0x59c   : > { %1124 = vst.msk [vmem:[#allocation2 + $0x8] sm:$0xff] %vm1122_vm5, %v1116_v10 }
 0x5a3   : > { %v1118_v23 = vpop.permute.xlu0 %1117  ;;  %v1128_v12 = vld [vmem:[#allocation2 + $0x8] sm:$0xff] }
 0x5a4   : > { %1126 = vst.msk [vmem:[#allocation2 + $0x10] sm:$0x1] %vm1125_vm6, %v1118_v23  ;;  %v1130_v38 = vpack.c.bf16 %v1128_v12, %v1127_v9  ;;  %v1671_v23 = vor.u32 %v2136_v45, %v2133_v44 }
 0x5a6   : > { %1666 = vmatmul.msk.bf16.vlgmr.msrb.gmra.mxu2 %vm737_vm2, %v1130_v38  ;;  %1285 = vmatpush.bf16.msrb.mxu1 %v1671_v23  ;;  %v1705_v23 = vor.u32 %v2192_v5, %v2189_v2  ;;  %v1685_v2 = vor.u32 %v2162_v55, %v2159_v52 }
 0x5ab   : > { %v1129_v39 = vld [vmem:[#allocation2 + $0x10] sm:$0x1] }
 0x5ac   : > { %v1131_v14 = vpack.c.bf16 %v1129_v39, %v1129_v39 }
 0x5b6   : > { %1667 = vmatmul.msk.bf16.gmra.mxu2 %vm737_vm2, %v1131_v14 }
 0x629   : > { %v1159_v37 = vpop.f32.mrf.mxu2 }
 0x62a   : > { %v1168_v16 = vadd.f32 %v1159_v37, %v2059_v3 }
 0x62c   : > { %v2289_v17 = vadd.f32 %v1172_v36, %v1168_v16 }
 0x62e   : > { %v1177_v19 = vsel %vm737_vm2, %v2289_v17, 0.0 }
 0x62f   : > { %1178 = vadd.xlane.f32.xlu0 %v1177_v19 }
 0x631   : > { %v1161_v20 = vpop.f32.mrf.mxu2 }
 0x632   : > { %v1169_v24 = vadd.f32 %v1161_v20, %v2069_v7 }
 0x634   : > { %v2294_v27 = vadd.f32 %v1172_v36, %v1169_v24 }
 0x636   : > { %v1180_v28 = vsel %vm737_vm2, %v2294_v27, 0.0 }
 0x637   : > { %1181 = vadd.xlane.f32.xlu1 %v1180_v28 }
 0x639   : > { %v1164_v30 = vpop.f32.mrf.mxu2 }
 0x63a   : > { %v1170_v40 = vadd.f32 %v1164_v30, %v2062_v4 }
 0x63c   : > { %v2299_v31 = vadd.f32 %v1172_v36, %v1170_v40 }
 0x63e   : > { %v1183_v3 = vsel %vm744_vm3, %v2299_v31, 0.0 }
 0x63f   : > { %1184 = vadd.xlane.f32.xlu2 %v1183_v3 }
 0x641   : > { %v1166_v13 = vpop.f32.mrf.mxu2 }
 0x6a2   : > { %v1179_v21 = vpop.xlane.xlu0 %1178 }
 0x6a3   : > { %v1186_v57 = vmul.f32 %v1179_v21, %v2073_v15  ;;  %v1244_v21 = vperm.slane %v2123_v41, 0 }
 0x6a5   : > { %v1189_v7 = vsub.f32 %v2289_v17, %v1186_v57 }
 0x6a7   : > { %v1192_v63 = vmul.f32 %v1189_v7, %v1189_v7 }
 0x6a9   : > { %v1195_v32 = vsel %vm737_vm2, %v1192_v63, 0.0 }
 0x6aa   : > { %v1182_v46 = vpop.xlane.xlu1 %1181  ;;  %1196 = vadd.xlane.f32.xlu2 %v1195_v32 }
 0x6ab   : > { %v1187_v22 = vmul.f32 %v1182_v46, %v2073_v15 }
 0x6ad   : > { %v1190_v4 = vsub.f32 %v2294_v27, %v1187_v22 }
 0x6af   : > { %v1193_v33 = vmul.f32 %v1190_v4, %v1190_v4 }
 0x6b1   : > { %v1198_v34 = vsel %vm737_vm2, %v1193_v33, 0.0  ;;  %v1250_v33 = vperm.slane %v2130_v43, 0  ;;  %v1709_v43 = vor.u32 %v2198_v8, %v2195_v6  ;;  %v1689_v6 = vor.u32 %v2168_v58, %v2165_v56 }
 0x6b2   : > { %v1185_v35 = vpop.xlane.xlu2 %1184  ;;  %1199 = vadd.xlane.f32.xlu2 %v1198_v34 }
 0x6b3   : > { %v1188_v26 = vmul.f32 %v1185_v35, %v2073_v15  ;;  %1373 = vmatpush.bf16.msrb.mxu3 %v1709_v43 }
 0x6b5   : > { %v1191_v18 = vsub.f32 %v2299_v31, %v1188_v26 }
 0x6b7   : > { %v1194_v42 = vmul.f32 %v1191_v18, %v1191_v18  ;;  %1374 = vmatpush.bf16.msrb.mxu3 %v1705_v23 }
 0x6b9   : > { %v1201_v53 = vsel %vm744_vm3, %v1194_v42, 0.0 }
 0x6ba   : > { %1202 = vadd.xlane.f32.xlu2 %v1201_v53 }
 0x71d   : > { %v1197_v29 = vpop.xlane.xlu2 %1196 }
 0x71e   : > { %v1204_v25 = vmul.f32 %v1197_v29, %v2073_v15 }
 0x720   : > { %v1207_v10 = vadd.f32 1e-06, %v1204_v25 }
 0x722   : > { %1815 = vrsqrt.f32 %v1207_v10  ;;  %vm1216_vm8 = vweird.f32 %v1207_v10 }
 0x725   : > { %v1200_v9 = vpop.xlane.xlu2 %1199 }
 0x726   : > { %v1205_v12 = vmul.f32 %v1200_v9, %v2073_v15  ;;  %v1701_v9 = vor.u32 %v2186_v1, %v2183_v0  ;;  %v1681_v0 = vor.u32 %v2156_v51, %v2153_v50  ;;  %v1258_v1 = vperm.slane %v2150_v49, 0 }
 0x728   : > { %v1816_v38 = vpop.eup %1815  ;;  %v1208_v39 = vadd.f32 1e-06, %v1205_v12  ;;  %1375 = vmatpush.bf16.msrb.mxu3 %v1701_v9  ;;  %v1693_v12 = vor.u32 %v2174_v60, %v2171_v59 }
 0x729   : > { %v1211_v14 = vmul.f32 %v1816_v38, %v1207_v10  ;;  %vm1217_vm7 = vweird.f32 %v1816_v38 }
 0x72a   : > { %1817 = vrsqrt.f32 %v1208_v39  ;;  %vm1218_vm9 = vmor %vm1216_vm8, %vm1217_vm7  ;;  %vm1226_vm11 = vweird.f32 %v1208_v39 }
 0x72b   : > { %v1212_v36 = vmul.f32 %v1816_v38, %v1211_v14 }
 0x72d   : > { %v1213_v37 = vmul.f32 0.5, %v1212_v36  ;;  %v1203_v47 = vpop.xlane.xlu2 %1202 }
 0x72e   : > { %v1206_v48 = vmul.f32 %v1203_v47, %v2073_v15 }
 0x72f   : > { %v1214_v16 = vsub.f32 1.5, %v1213_v37 }
 0x730   : > { %v1818_v19 = vpop.eup %1817  ;;  %v1209_v20 = vadd.f32 1e-06, %v1206_v48 }
 0x731   : > { %v1215_v24 = vmul.f32 %v1816_v38, %v1214_v16  ;;  %v1221_v44 = vmul.f32 %v1818_v19, %v1208_v39  ;;  %vm1227_vm10 = vweird.f32 %v1818_v19 }
 0x732   : > { %1819 = vrsqrt.f32 %v1209_v20  ;;  %vm1228_vm12 = vmor %vm1226_vm11, %vm1227_vm10  ;;  %vm1236_vm14 = vweird.f32 %v1209_v20 }
 0x733   : > { %v1222_v45 = vmul.f32 %v1818_v19, %v1221_v44  ;;  %v1219_v28 = vsel %vm1218_vm9, %v1816_v38, %v1215_v24 }
 0x734   : > { %v1240_v13 = vmul.f32 %v1219_v28, %v1189_v7 }
 0x735   : > { %v1223_v30 = vmul.f32 0.5, %v1222_v45 }
 0x736   : > { %v1246_v22 = vmul.f32 %v1244_v21, %v1240_v13 }
 0x737   : > { %v1224_v40 = vsub.f32 1.5, %v1223_v30 }
 0x738   : > { %v1820_v3 = vpop.eup %1819  ;;  %v1252_v42 = vadd.f32 %v1250_v33, %v1246_v22 }
 0x739   : > { %v1225_v57 = vmul.f32 %v1818_v19, %v1224_v40  ;;  %v1231_v15 = vmul.f32 %v1820_v3, %v1209_v20  ;;  %vm1237_vm13 = vweird.f32 %v1820_v3 }
 0x73a   : > { %vm1238_vm15 = vmor %vm1236_vm14, %vm1237_vm13 }
 0x73b   : > { %v1229_v63 = vsel %vm1228_vm12, %v1818_v19, %v1225_v57  ;;  %v1232_v32 = vmul.f32 %v1820_v3, %v1231_v15 }
 0x73c   : > { %v1241_v46 = vmul.f32 %v1229_v63, %v1190_v4 }
 0x73d   : > { %v1233_v34 = vmul.f32 0.5, %v1232_v32 }
 0x73e   : > { %v1247_v35 = vmul.f32 %v1244_v21, %v1241_v46  ;;  %v1395_v46 = vperm.slane %v2205_v11, 0 }
 0x73f   : > { %v1234_v26 = vsub.f32 1.5, %v1233_v34 }
 0x740   : > { %v1253_v53 = vadd.f32 %v1250_v33, %v1247_v35 }
 0x741   : > { %v1235_v54 = vmul.f32 %v1820_v3, %v1234_v26 }
 0x742   : > { %v1255_v41 = vpack.c.bf16 %v1253_v53, %v1252_v42 }
 0x743   : > { %v1239_v7 = vsel %vm1238_vm15, %v1820_v3, %v1235_v54 }
 0x744   : > { %1676 = vmatmul.msk.bf16.vlgmr.msrb.gmra.mxu1 %vm737_vm2, %v1255_v41  ;;  %v1242_v29 = vmul.f32 %v1239_v7, %v1191_v18  ;;  %v1697_v18 = vor.u32 %v2180_v62, %v2177_v61 }
 0x746   : > { %v1248_v25 = vmul.f32 %v1244_v21, %v1242_v29  ;;  %1376 = vmatpush.bf16.msrb.mxu3 %v1697_v18 }
 0x748   : > { %v1254_v10 = vadd.f32 %v1250_v33, %v1248_v25 }
 0x74a   : > { %v1256_v4 = vpack.c.bf16 %v1254_v10, %v1254_v10  ;;  %1377 = vmatpush.bf16.msrb.mxu3 %v1693_v12 }
 0x74e   : > { %1378 = vmatpush.bf16.msrb.mxu3 %v1689_v6 }
 0x752   : > { %1379 = vmatpush.bf16.msrb.mxu3 %v1685_v2 }
 0x754   : > { %1677 = vmatmul.msk.bf16.gmra.mxu1 %vm737_vm2, %v1256_v4 }
 0x756   : > { %1380 = vmatpush.bf16.msrb.mxu3 %v1681_v0 }
 0x7c1   : > { %v1287_v5 = vpop.f32.mrf.mxu1 }
 0x7c2   : > { %v1288_v61 = vadd.f32 %v1287_v5, %v1258_v1 }
 0x7c4   : > { %v1299_v62 = vmul.f32 0.044715, %v1288_v61  ;;  %v1296_v45 = vmul.f32 0.5, %v1288_v61 }
 0x7c6   : > { %v1302_v8 = vmul.f32 %v1299_v62, %v1288_v61 }
 0x7c8   : > { %v1305_v59 = vmul.f32 %v1302_v8, %v1288_v61 }
 0x7c9   : > { %v1289_v60 = vpop.f32.mrf.mxu1 }
 0x7ca   : > { %v1290_v38 = vadd.f32 %v1289_v60, %v1258_v1  ;;  %v1308_v39 = vadd.f32 %v1305_v59, %v1288_v61 }
 0x7cc   : > { %v1300_v56 = vmul.f32 0.044715, %v1290_v38  ;;  %v1311_v14 = vmul.f32 0.7978846, %v1308_v39  ;;  %v1297_v28 = vmul.f32 0.5, %v1290_v38 }
 0x7ce   : > { %v1303_v58 = vmul.f32 %v1300_v56, %v1290_v38  ;;  %1821 = vtanh.f32 %v1311_v14 }
 0x7d0   : > { %v1306_v36 = vmul.f32 %v1303_v58, %v1290_v38 }
 0x7d1   : > { %v1292_v52 = vpop.f32.mrf.mxu1 }
 0x7d2   : > { %v1293_v55 = vadd.f32 %v1292_v52, %v1258_v1  ;;  %v1309_v37 = vadd.f32 %v1306_v36, %v1290_v38 }
 0x7d4   : > { %v1312_v50 = vmul.f32 0.7978846, %v1309_v37  ;;  %v1301_v51 = vmul.f32 0.044715, %v1293_v55  ;;  %v1822_v47 = vpop.eup %1821  ;;  %v1298_v15 = vmul.f32 0.5, %v1293_v55 }
 0x7d5   : > { %v1317_v20 = vadd.f32 1.0, %v1822_v47 }
 0x7d6   : > { %1823 = vtanh.f32 %v1312_v50  ;;  %v1304_v49 = vmul.f32 %v1301_v51, %v1293_v55 }
 0x7d7   : > { %v1320_v40 = vmul.f32 %v1317_v20, %v1296_v45 }
 0x7d8   : > { %v1307_v48 = vmul.f32 %v1304_v49, %v1293_v55 }
 0x7d9   : > { %v1294_v16 = vpop.f32.mrf.mxu1 }
 0x7da   : > { %v1310_v19 = vadd.f32 %v1307_v48, %v1293_v55 }
 0x7dc   : > { %v1824_v24 = vpop.eup %1823  ;;  %v1313_v44 = vmul.f32 0.7978846, %v1310_v19 }
 0x7dd   : > { %v1318_v30 = vadd.f32 1.0, %v1824_v24 }
 0x7de   : > { %1825 = vtanh.f32 %v1313_v44 }
 0x7df   : > { %v1321_v3 = vmul.f32 %v1318_v30, %v1297_v28 }
 0x7e1   : > { %v1323_v13 = vpack.c.bf16 %v1321_v3, %v1320_v40 }
 0x7e3   : > { %1381 = vmatmul.bf16.vlgmr.msrb.gmra.mxu3 %v1323_v13 }
 0x7e4   : > { %v1826_v21 = vpop.eup %1825 }
 0x7e5   : > { %v1319_v57 = vadd.f32 1.0, %v1826_v21 }
 0x7e7   : > { %v1322_v63 = vmul.f32 %v1319_v57, %v1298_v15 }
 0x7e9   : > { %v1324_v32 = vpack.c.bf16 %v1322_v63, %v1322_v63 }
 0x7f3   : > { %1386 = vmatmul.bf16.gmra.mxu3 %v1324_v32 }
 0x866   : > { %v1382_v22 = vpop.f32.mrf.mxu3 }
 0x867   : > { %v1391_v33 = vadd.f32 %v1382_v22, %v2289_v17 }
 0x869   : > { %v1397_v34 = vadd.f32 %v1395_v46, %v1391_v33 }
 0x86b   : > { %1400 = vst.msk [vmem:[%s2047_s2] sm:$0xff] %vm737_vm2, %v1397_v34 }
 0x86e   : > { %v1384_v35 = vpop.f32.mrf.mxu3 }
 0x86f   : > { %v1392_v26 = vadd.f32 %v1384_v35, %v2294_v27 }
 0x871   : > { %v1398_v42 = vadd.f32 %v1395_v46, %v1392_v26 }
 0x873   : > { %1401 = vst.msk [vmem:[%s2047_s2 + $0x8] sm:$0xff] %vm737_vm2, %v1398_v42 }
 0x876   : > { %v1387_v53 = vpop.f32.mrf.mxu3 }
 0x877   : > { %v1393_v54 = vadd.f32 %v1387_v53, %v2299_v31 }
 0x879   : > { %v1399_v41 = vadd.f32 %v1395_v46, %v1393_v54 }
 0x87b   : > { %1402 = vst.msk [vmem:[%s2047_s2 + $0x10] sm:$0x1] %vm744_vm3, %v1399_v41 }
 0x87e   : > { %v1389_v7 = vpop.f32.mrf.mxu3 }
 0x87f PF: > { %s2413_s27 = sld [smem:[#allocation6_spill]] }
 0x880   : > { %s2414_s29 = sld [smem:[#allocation4_spill]] }
 0x881   : > { %s2415_s30 = sld [smem:[#allocation5_spill]] }
 0x882   : > { %s2416_s15 = sld [smem:[#allocation7_spill]] }
 0x883   : > { %s2417_s16 = sld [smem:[#allocation8_spill]] }
 0x885   : > { %s25_s17 = sadd.s32 1, %s2413_s27  }
 0x886   : > { %p22_p9 = scmp.ge.s32.totalorder %s25_s17, 50  }
 0x888   :  { %24 = sbr.rel (!%p22_p9) target bundleno = 8 (0x8), region = 158 }

// kernel: _forward_impl.9
= control target key start
LH: loop header
LB: loop body
LE: loop exit
PB: predicated region body
PF: predicated region fallthrough
CT: control target
= control target key end

     0   :  { %11 = vsyncpa [#allocation3], 0  ;;  %vm28_vm0 = vcmask 123904   ;;  %s211_s0 = inlined_call_operand.vmem [shape: f32[2,16], index: 0, kind: input, shape index: {}]   ;;  %s212_s1 = inlined_call_operand.vmem [shape: f32[2,16], index: 1, kind: input, shape index: {}]   ;;  %s213_s2 = inlined_call_operand.vmem [shape: f32[2,16], index: 2, kind: input, shape index: {}]   ;;  %s214_s3 = inlined_call_operand.vmem [shape: f32[2,16], index: 3, kind: input, shape index: {}]   ;;  %s215_s4 = inlined_call_operand.hbm [shape: f32[1,1], index: 4, kind: output, shape index: {0}]   ;;  %s216_s5 = inlined_call_operand.hbm [shape: f32[1,1], index: 5, kind: output, shape index: {1}]  }
   0x1   :  { %v21_v0 = vld [vmem:[%s213_s2] sm:$0x3] }
   0x2   :  { %v22_v1 = vld [vmem:[%s211_s0] sm:$0x3] }
   0x3   :  { %v23_v2 = vsub.f32 %v21_v0, %v22_v1  ;;  %v54_v3 = vld [vmem:[%s211_s0] sm:$0x3] }
   0x4   :  { %v24_v4 = vld [vmem:[%s214_s3] sm:$0x3]  ;;  %v55_v6 = vmul.f32 %v54_v3, %v54_v3 }
   0x5   :  { %v25_v5 = vld [vmem:[%s212_s1] sm:$0x3] }
   0x6   :  { %12 = vsyncpa [#allocation5], 0  ;;  %v27_v7 = vmul.f32 %v23_v2, %v23_v2  ;;  %v26_v8 = vsub.f32 %v24_v4, %v25_v5  ;;  %v56_v9 = vsel %vm28_vm0, %v55_v6, 0.0  ;;  %vm32_vm1 = vcmask 1041408   ;;  %s153_s0 = smov [#allocation4]   ;;  %s85_s28 = sshll.u32 %s216_s5, 4  ;;  %s86_s28 = int_to_ptr.hbm [resolvable:$true] %s85_s28 }
   0x7   :  { %57 = vadd.xlane.f32.xlu1 %v56_v9  ;;  %s83_s1 = sshll.u32 %s153_s0, 4  ;;  %vm52_vm2 = vcmask 0   ;;  %s154_s29 = smov [#allocation2]   ;;  %s84_s1 = int_to_ptr.vmem [resolvable:$true] %s83_s1 }
   0x8   :  { %v29_v10 = vsel %vm28_vm0, %v27_v7, 0.0  ;;  %v40_v11 = vmul.f32 %v26_v8, %v26_v8  ;;  %s72_s30 = sshll.u32 %s154_s29, 4  ;;  %s74_s7 = sshll.u32 %s215_s4, 4  ;;  %s73_s30 = int_to_ptr.vmem [resolvable:$true] %s72_s30  ;;  %s75_s7 = int_to_ptr.hbm [resolvable:$true] %s74_s7 }
   0x9   :  { %30 = vadd.xlane.f32.xlu0 %v29_v10 }
   0xa   :  { %v41_v12 = vsel %vm28_vm0, %v40_v11, 0.0 }
  0x11   :  { %42 = vadd.xlane.f32.xlu0 %v41_v12 }
  0x7a   :  { %v58_v13 = vpop.xlane.xlu1 %57 }
  0x7b   :  { %v59_v15 = vsel %vm32_vm1, %v58_v13, 0.0 }
  0x7c   :  { %v31_v14 = vpop.xlane.xlu0 %30  ;;  %v60_v17 = vrot.slane %v59_v15, 4 }
  0x7d   :  { %v33_v16 = vsel %vm32_vm1, %v31_v14, 0.0 }
  0x7e   :  { %v34_v18 = vrot.slane %v33_v16, 4  ;;  %v61_v19 = vadd.f32 %v60_v17, %v59_v15 }
  0x80   :  { %v35_v20 = vadd.f32 %v34_v18, %v33_v16  ;;  %v62_v21 = vrot.slane %v61_v19, 2 }
  0x82   :  { %v63_v22 = vadd.f32 %v62_v21, %v61_v19  ;;  %v36_v23 = vrot.slane %v35_v20, 2 }
  0x84   :  { %v43_v24 = vpop.xlane.xlu0 %42  ;;  %v64_v25 = vrot.slane %v63_v22, 1  ;;  %v37_v29 = vadd.f32 %v36_v23, %v35_v20 }
  0x85   :  { %v44_v26 = vsel %vm32_vm1, %v43_v24, 0.0 }
  0x86   :  { %v45_v27 = vrot.slane %v44_v26, 4  ;;  %v65_v28 = vadd.f32 %v64_v25, %v63_v22  ;;  %v38_v32 = vrot.slane %v37_v29, 1 }
  0x88   :  { %v46_v30 = vadd.f32 %v45_v27, %v44_v26  ;;  %66 = vst.msk [vmem:[#allocation4] sm:$0x1] %vm52_vm2, %v65_v28  ;;  %v39_v35 = vadd.f32 %v38_v32, %v37_v29 }
  0x89   :  { %88 = dma.vmem_to_hbm [thread:$0]  %s84_s1, 16, %s86_s28, [#allocation5]  }
  0x8a   :  { %v47_v31 = vrot.slane %v46_v30, 2 }
  0x8c   :  { %v48_v33 = vadd.f32 %v47_v31, %v46_v30 }
  0x8e   :  { %v49_v34 = vrot.slane %v48_v33, 1 }
  0x90   :  { %v50_v36 = vadd.f32 %v49_v34, %v48_v33 }
  0x92   :  { %v51_v37 = vadd.f32 %v50_v36, %v39_v35 }
  0x94   :  { %53 = vst.msk [vmem:[#allocation2] sm:$0x1] %vm52_vm2, %v51_v37 }
  0x95   :  { %77 = dma.vmem_to_hbm [thread:$0]  %s73_s30, 16, %s75_s7, [#allocation3]  }
  0x96   :  { %149 = dma.done.wait [#allocation3], 16  }
  0x97   :  { %150 = vsyncadd [#allocation3], 4294967280 }
  0x98   :  { %151 = dma.done.wait [#allocation5], 16  }
  0x99   :  { %152 = vsyncadd [#allocation5], 4294967280 }
  0x9a   :  { %97 = vsyncpa [#allocation3], 1 }
  0x9b   :  { %98 = vsyncpa [#allocation5], 1 }

</bundles_post_ra>
